<compile_context>
chip_gen: v7x
topology: tpu7x:2x2x1
jax: 0.10.0
libtpu: 0.0.40
codegen_flags: <defaults>
</compile_context>

<pallas_src>
import functools
import math

import jax
import jax.numpy as jnp
from jax.experimental import pallas as pl
from jax.experimental.pallas import tpu as pltpu


# ----------------------------------------------------------------------------
# Pallas kernel: full SIREN MLP (matmul chain + sines) for one row tile.
# Weights arrive as whole-array VMEM blocks (constant index maps), the row
# tile of coords / output is selected by the grid.
# ----------------------------------------------------------------------------
def cknet_siren_kernel(coords_ref, w1_ref, b1_ref, wh_ref, bh_ref, wl_ref,
                       bl_ref, o_ref, *, hidden_layers, first_omega_0,
                       hidden_omega_0):
    x = coords_ref[...]                                          # [Tn, Cin_p]
    h = jnp.dot(x, w1_ref[...], preferred_element_type=jnp.float32) + b1_ref[...]
    h = jnp.sin(first_omega_0 * h)

    def hidden_step(h, w, b):
        z = jnp.dot(h, w, preferred_element_type=jnp.float32) + b
        return jnp.sin(hidden_omega_0 * z)

    if hidden_layers <= 4:
        # Small L: static unroll (demo path).
        for i in range(hidden_layers):
            h = hidden_step(h, wh_ref[i], bh_ref[i])
    else:
        # Large L: single loop body the LLO can pipeline; dynamic leading index.
        h = jax.lax.fori_loop(
            0, hidden_layers,
            lambda i, hh: hidden_step(hh, wh_ref[i], bh_ref[i]),
            h)

    o_ref[...] = (jnp.dot(h, wl_ref[...], preferred_element_type=jnp.float32)
                  + bl_ref[...]).astype(o_ref.dtype)


# ----------------------------------------------------------------------------
# One-time packing of G independent CKNets (same architecture) into a single
# block-diagonal SIREN.  Each net only mixes within its own feature block, so
# the packed network computes exactly the G independent forwards at once,
# with lane-dense (G*H, G*out) matmul/output dimensions.
# ----------------------------------------------------------------------------
def pack_cknet_params(params_list):
    G = len(params_list)
    w1_0, _, wh_0, _, wl_0, _ = params_list[0]
    cin, H = w1_0.shape
    L = wh_0.shape[0]
    cout = wl_0.shape[1]
    cin_pad = max(8, int(pl.cdiv(cin, 8) * 8))
    GH, GO = G * H, G * cout

    w1_p = jnp.zeros((cin_pad, GH), jnp.float32)
    b1_p = jnp.zeros((1, GH), jnp.float32)
    wh_p = jnp.zeros((L, GH, GH), jnp.float32)
    bh_p = jnp.zeros((L, 1, GH), jnp.float32)
    wl_p = jnp.zeros((GH, GO), jnp.float32)
    bl_p = jnp.zeros((1, GO), jnp.float32)
    for g, (w1, b1, wh, bh, wl, bl) in enumerate(params_list):
        s, e = g * H, (g + 1) * H
        so, eo = g * cout, (g + 1) * cout
        w1_p = w1_p.at[:cin, s:e].set(w1)
        b1_p = b1_p.at[:, s:e].set(b1)
        wh_p = wh_p.at[:, s:e, s:e].set(wh)
        bh_p = bh_p.at[:, :, s:e].set(bh)
        wl_p = wl_p.at[s:e, so:eo].set(wl)
        bl_p = bl_p.at[:, so:eo].set(bl)
    return (w1_p, b1_p, wh_p, bh_p, wl_p, bl_p), cin_pad


def prepare_coords(coords, cin_pad, max_tile_n=512):
    """One-time padding of the (static) coordinate grid to tile boundaries."""
    n, cin = coords.shape
    tile_n = min(max_tile_n, int(pl.cdiv(n, 8) * 8))
    n_pad = int(pl.cdiv(n, tile_n) * tile_n)
    coords_p = jnp.pad(coords.astype(jnp.float32),
                       ((0, n_pad - n), (0, cin_pad - cin)))
    return coords_p, tile_n


# ----------------------------------------------------------------------------
# Packed forward: one pallas_call for all G nets, row-tiled grid over coords.
# ----------------------------------------------------------------------------
def cknet_forward_packed(coords_p, packed_params, first_omega_0,
                         hidden_omega_0, *, tile_n):
    w1, b1, wh, bh, wl, bl = packed_params
    n_pad, cin_pad = coords_p.shape
    L, GH = wh.shape[0], wh.shape[1]
    GO = wl.shape[1]
    grid = (n_pad // tile_n,)

    flops = 2 * n_pad * (cin_pad * GH + L * GH * GH + GH * GO)
    transcendentals = n_pad * GH * (L + 1)
    bytes_accessed = 4 * (coords_p.size + w1.size + b1.size + wh.size
                          + bh.size + wl.size + bl.size + n_pad * GO)

    kernel = functools.partial(
        cknet_siren_kernel,
        hidden_layers=int(L),
        first_omega_0=first_omega_0,
        hidden_omega_0=hidden_omega_0,
    )
    return pl.pallas_call(
        kernel,
        out_shape=jax.ShapeDtypeStruct((n_pad, GO), jnp.float32),
        grid=grid,
        in_specs=[
            pl.BlockSpec((tile_n, cin_pad), lambda i: (i, 0)),   # coords tile
            pl.BlockSpec((cin_pad, GH), lambda i: (0, 0)),       # w1  (resident)
            pl.BlockSpec((1, GH), lambda i: (0, 0)),             # b1
            pl.BlockSpec((L, GH, GH), lambda i: (0, 0, 0)),      # wh
            pl.BlockSpec((L, 1, GH), lambda i: (0, 0, 0)),       # bh
            pl.BlockSpec((GH, GO), lambda i: (0, 0)),            # wl
            pl.BlockSpec((1, GO), lambda i: (0, 0)),             # bl
        ],
        out_specs=pl.BlockSpec((tile_n, GO), lambda i: (i, 0)),
        compiler_params=pltpu.CompilerParams(
            dimension_semantics=("parallel",)),
        cost_estimate=pl.CostEstimate(flops=flops,
                                      transcendentals=transcendentals,
                                      bytes_accessed=bytes_accessed),
    )(coords_p, w1, b1, wh, bh, wl, bl)


# ----------------------------------------------------------------------------
# Module-faithful single-net forward (== CKNetBase.forward for SIREN).
# This is the G=1 special case; for best performance pack several CKNets and
# call cknet_forward_packed directly (see __main__).
# ----------------------------------------------------------------------------
def cknet_forward(coords, params, first_omega_0, hidden_omega_0):
    packed, cin_pad = pack_cknet_params([params])
    coords_p, tile_n = prepare_coords(coords, cin_pad)
    out = cknet_forward_packed(coords_p, packed, first_omega_0, hidden_omega_0,
                               tile_n=tile_n)
    return out[:coords.shape[0], :params[4].shape[1]]


# ----------------------------------------------------------------------------
# Deterministic parameter init (standard SIREN init, PyTorch-Linear bias init).
# Weights are stored already transposed as [fan_in, fan_out].
# ----------------------------------------------------------------------------
def init_cknet_params(key, in_channels, out_channels, hidden_features,
                      hidden_layers, first_omega_0, hidden_omega_0):
    n_linear = hidden_layers + 2
    keys = jax.random.split(key, 2 * n_linear)

    def linear(kw, kb, fan_in, fan_out, w_bound):
        w = jax.random.uniform(kw, (fan_in, fan_out), jnp.float32, -w_bound, w_bound)
        b_bound = 1.0 / math.sqrt(fan_in)
        b = jax.random.uniform(kb, (1, fan_out), jnp.float32, -b_bound, b_bound)
        return w, b

    w1, b1 = linear(keys[0], keys[1], in_channels, hidden_features,
                    1.0 / in_channels)

    h_bound = math.sqrt(6.0 / hidden_features) / hidden_omega_0
    wh_list, bh_list = [], []
    for i in range(hidden_layers):
        w, b = linear(keys[2 + 2 * i], keys[3 + 2 * i],
                      hidden_features, hidden_features, h_bound)
        wh_list.append(w)
        bh_list.append(b)
    wh = jnp.stack(wh_list, axis=0)          # [L, H, H]
    bh = jnp.stack(bh_list, axis=0)          # [L, 1, H]

    wl, bl = linear(keys[-2], keys[-1], hidden_features, out_channels, h_bound)
    return (w1, b1, wh, bh, wl, bl)


# Pure-JAX reference for verification.
def cknet_ref(coords, params, first_omega_0, hidden_omega_0):
    w1, b1, wh, bh, wl, bl = params
    h = jnp.sin(first_omega_0 * (coords @ w1 + b1))
    for i in range(wh.shape[0]):
        h = jnp.sin(hidden_omega_0 * (h @ wh[i] + bh[i]))
    return h @ wl + bl


if __name__ == "__main__":
    # Module-consistent small configuration:
    #   in_channels      = 2   (2-D kernel-grid coordinates)
    #   out_channels     = 32  (= no_in_channels * no_out_channels, e.g. 4 * 8)
    #   kernel_size      = 7
    #   hidden_features  = 32, hidden_layers = 2, omega_0 = 30
    #   num_nets         = 4   (e.g. the CKNets of 4 conv layers, evaluated
    #                           together -> packed feature dim 4*32 = 128)
    in_channels = 2
    out_channels = 32
    kernel_size = 7
    hidden_features = 32
    hidden_layers = 2
    first_omega_0 = 30.0
    hidden_omega_0 = 30.0
    num_nets = 4

    key = jax.random.PRNGKey(0)
    net_keys = jax.random.split(key, num_nets)
    nets = [init_cknet_params(k, in_channels, out_channels, hidden_features,
                              hidden_layers, first_omega_0, hidden_omega_0)
            for k in net_keys]

    # Kernel-grid coordinates in [-1, 1]^2, flattened to [kernel_size**2, 2].
    lin = jnp.linspace(-1.0, 1.0, kernel_size, dtype=jnp.float32)
    yy, xx = jnp.meshgrid(lin, lin, indexing="ij")
    coords = jnp.stack([xx.reshape(-1), yy.reshape(-1)], axis=-1)   # [49, 2]
    n = coords.shape[0]

    # ---- Optimized path: pack all CKNets once (hoisted), one pallas_call ---
    packed_params, cin_pad = pack_cknet_params(nets)
    coords_p, tile_n = prepare_coords(coords, cin_pad)
    out_packed = jax.block_until_ready(
        cknet_forward_packed(coords_p, packed_params,
                             first_omega_0, hidden_omega_0, tile_n=tile_n))

    for g, params in enumerate(nets):
        got = out_packed[:n, g * out_channels:(g + 1) * out_channels]
        ref = cknet_ref(coords, params, first_omega_0, hidden_omega_0)
        err = float(jnp.abs(got - ref).max())
        assert got.shape == (n, out_channels), got.shape
        assert jnp.allclose(got, ref, rtol=2e-4, atol=2e-4), (g, err)

    # ---- Module-faithful single-net forward (CKNetBase.forward) ------------
    out_single = jax.block_until_ready(
        cknet_forward(coords, nets[0], first_omega_0, hidden_omega_0))
    ref0 = cknet_ref(coords, nets[0], first_omega_0, hidden_omega_0)
    assert out_single.shape == (n, out_channels), out_single.shape
    assert jnp.allclose(out_single, ref0, rtol=2e-4, atol=2e-4), \
        float(jnp.abs(out_single - ref0).max())

    print("KERNEL_OK")
</pallas_src>

<mosaic_0001>
module attributes {stable_mosaic.version = 11 : i64} {
  func.func @cknet_siren_kernel(%arg0: i32, %arg1: memref<56x8xf32, #tpu.memory_space<vmem>>, %arg2: memref<8x128xf32, #tpu.memory_space<vmem>>, %arg3: memref<1x128xf32, #tpu.memory_space<vmem>>, %arg4: memref<2x128x128xf32, #tpu.memory_space<vmem>>, %arg5: memref<2x1x128xf32, #tpu.memory_space<vmem>>, %arg6: memref<128x128xf32, #tpu.memory_space<vmem>>, %arg7: memref<1x128xf32, #tpu.memory_space<vmem>>, %arg8: memref<56x128xf32, #tpu.memory_space<vmem>>) attributes {dimension_semantics = [#tpu.dimension_semantics<parallel>], iteration_bounds = array<i64: 1>, scalar_prefetch = 0 : i64, scratch_operands = 0 : i64, tpu.core_type = #tpu.core_type<tc>, window_params = [{transform_indices = @transform_0, window_bounds = array<i64: 56, 8>}, {pipeline_mode = #tpu.pipeline_mode<synchronous>, transform_indices = @transform_1, window_bounds = array<i64: 8, 128>}, {pipeline_mode = #tpu.pipeline_mode<synchronous>, transform_indices = @transform_2, window_bounds = array<i64: 1, 128>}, {pipeline_mode = #tpu.pipeline_mode<synchronous>, transform_indices = @transform_3, window_bounds = array<i64: 2, 128, 128>}, {pipeline_mode = #tpu.pipeline_mode<synchronous>, transform_indices = @transform_4, window_bounds = array<i64: 2, 1, 128>}, {pipeline_mode = #tpu.pipeline_mode<synchronous>, transform_indices = @transform_5, window_bounds = array<i64: 128, 128>}, {pipeline_mode = #tpu.pipeline_mode<synchronous>, transform_indices = @transform_6, window_bounds = array<i64: 1, 128>}, {transform_indices = @transform_7, window_bounds = array<i64: 56, 128>}]} {
    %c0 = arith.constant 0 : index
    %c0_0 = arith.constant 0 : index
    %0 = vector.load %arg1[%c0, %c0_0] : memref<56x8xf32, #tpu.memory_space<vmem>>, vector<56x8xf32>
    %c0_1 = arith.constant 0 : index
    %c0_2 = arith.constant 0 : index
    %1 = vector.load %arg2[%c0_1, %c0_2] : memref<8x128xf32, #tpu.memory_space<vmem>>, vector<8x128xf32>
    %cst = arith.constant dense<0.000000e+00> : vector<56x128xf32>
    %2 = tpu.matmul %0, %1, %cst {dimension_numbers = #tpu.dot_dimension_numbers<[1], [0], [0], [1], [0, 0, 1, 1], [], []>} : vector<56x8xf32>, vector<8x128xf32>, vector<56x128xf32> -> vector<56x128xf32>
    %c0_3 = arith.constant 0 : index
    %c0_4 = arith.constant 0 : index
    %3 = vector.load %arg3[%c0_3, %c0_4] : memref<1x128xf32, #tpu.memory_space<vmem>>, vector<1x128xf32>
    %4 = vector.broadcast %3 : vector<1x128xf32> to vector<56x128xf32>
    %5 = arith.addf %2, %4 : vector<56x128xf32>
    %cst_5 = arith.constant 3.000000e+01 : f32
    %6 = vector.broadcast %cst_5 : f32 to vector<56x128xf32>
    %7 = arith.mulf %6, %5 : vector<56x128xf32>
    %8 = math.sin %7 : vector<56x128xf32>
    %c0_6 = arith.constant 0 : index
    %c0_7 = arith.constant 0 : index
    %c0_8 = arith.constant 0 : index
    %9 = vector.load %arg4[%c0_6, %c0_7, %c0_8] : memref<2x128x128xf32, #tpu.memory_space<vmem>>, vector<1x128x128xf32>
    %10 = vector.shape_cast %9 : vector<1x128x128xf32> to vector<128x128xf32>
    %c0_9 = arith.constant 0 : index
    %c0_10 = arith.constant 0 : index
    %c0_11 = arith.constant 0 : index
    %11 = vector.load %arg5[%c0_9, %c0_10, %c0_11] : memref<2x1x128xf32, #tpu.memory_space<vmem>>, vector<1x1x128xf32>
    %12 = vector.shape_cast %11 : vector<1x1x128xf32> to vector<1x128xf32>
    %cst_12 = arith.constant dense<0.000000e+00> : vector<56x128xf32>
    %13 = tpu.matmul %8, %10, %cst_12 {dimension_numbers = #tpu.dot_dimension_numbers<[1], [0], [0], [1], [0, 0, 1, 1], [], []>} : vector<56x128xf32>, vector<128x128xf32>, vector<56x128xf32> -> vector<56x128xf32>
    %14 = vector.broadcast %12 : vector<1x128xf32> to vector<56x128xf32>
    %15 = arith.addf %13, %14 : vector<56x128xf32>
    %cst_13 = arith.constant 3.000000e+01 : f32
    %16 = vector.broadcast %cst_13 : f32 to vector<56x128xf32>
    %17 = arith.mulf %16, %15 : vector<56x128xf32>
    %18 = math.sin %17 : vector<56x128xf32>
    %c1 = arith.constant 1 : index
    %c0_14 = arith.constant 0 : index
    %c0_15 = arith.constant 0 : index
    %19 = vector.load %arg4[%c1, %c0_14, %c0_15] : memref<2x128x128xf32, #tpu.memory_space<vmem>>, vector<1x128x128xf32>
    %20 = vector.shape_cast %19 : vector<1x128x128xf32> to vector<128x128xf32>
    %c1_16 = arith.constant 1 : index
    %c0_17 = arith.constant 0 : index
    %c0_18 = arith.constant 0 : index
    %21 = vector.load %arg5[%c1_16, %c0_17, %c0_18] : memref<2x1x128xf32, #tpu.memory_space<vmem>>, vector<1x1x128xf32>
    %22 = vector.shape_cast %21 : vector<1x1x128xf32> to vector<1x128xf32>
    %cst_19 = arith.constant dense<0.000000e+00> : vector<56x128xf32>
    %23 = tpu.matmul %18, %20, %cst_19 {dimension_numbers = #tpu.dot_dimension_numbers<[1], [0], [0], [1], [0, 0, 1, 1], [], []>} : vector<56x128xf32>, vector<128x128xf32>, vector<56x128xf32> -> vector<56x128xf32>
    %24 = vector.broadcast %22 : vector<1x128xf32> to vector<56x128xf32>
    %25 = arith.addf %23, %24 : vector<56x128xf32>
    %cst_20 = arith.constant 3.000000e+01 : f32
    %26 = vector.broadcast %cst_20 : f32 to vector<56x128xf32>
    %27 = arith.mulf %26, %25 : vector<56x128xf32>
    %28 = math.sin %27 : vector<56x128xf32>
    %c0_21 = arith.constant 0 : index
    %c0_22 = arith.constant 0 : index
    %29 = vector.load %arg6[%c0_21, %c0_22] : memref<128x128xf32, #tpu.memory_space<vmem>>, vector<128x128xf32>
    %cst_23 = arith.constant dense<0.000000e+00> : vector<56x128xf32>
    %30 = tpu.matmul %28, %29, %cst_23 {dimension_numbers = #tpu.dot_dimension_numbers<[1], [0], [0], [1], [0, 0, 1, 1], [], []>} : vector<56x128xf32>, vector<128x128xf32>, vector<56x128xf32> -> vector<56x128xf32>
    %c0_24 = arith.constant 0 : index
    %c0_25 = arith.constant 0 : index
    %31 = vector.load %arg7[%c0_24, %c0_25] : memref<1x128xf32, #tpu.memory_space<vmem>>, vector<1x128xf32>
    %32 = vector.broadcast %31 : vector<1x128xf32> to vector<56x128xf32>
    %33 = arith.addf %30, %32 : vector<56x128xf32>
    %c0_26 = arith.constant 0 : index
    %c0_27 = arith.constant 0 : index
    %34 = vector.load %arg8[%c0_26, %c0_27] : memref<56x128xf32, #tpu.memory_space<vmem>>, vector<56x128xf32>
    tpu.vector_store %arg8[%c0_26, %c0_27], %33 {strides = array<i32>} : memref<56x128xf32, #tpu.memory_space<vmem>>, vector<56x128xf32>,
    return
  }
  func.func @transform_0(%arg0: i32) -> (i32, i32) {
    %c0_i32 = arith.constant 0 : i32
    %c0_i32_0 = arith.constant 0 : i32
    return %arg0, %c0_i32 : i32, i32
  }
  func.func @transform_1(%arg0: i32) -> (i32, i32) {
    %c0_i32 = arith.constant 0 : i32
    %c0_i32_0 = arith.constant 0 : i32
    %c0_i32_1 = arith.constant 0 : i32
    return %c0_i32, %c0_i32_0 : i32, i32
  }
  func.func @transform_2(%arg0: i32) -> (i32, i32) {
    %c0_i32 = arith.constant 0 : i32
    %c0_i32_0 = arith.constant 0 : i32
    %c0_i32_1 = arith.constant 0 : i32
    return %c0_i32, %c0_i32_0 : i32, i32
  }
  func.func @transform_3(%arg0: i32) -> (i32, i32, i32) {
    %c0_i32 = arith.constant 0 : i32
    %c0_i32_0 = arith.constant 0 : i32
    %c0_i32_1 = arith.constant 0 : i32
    %c0_i32_2 = arith.constant 0 : i32
    return %c0_i32, %c0_i32_0, %c0_i32_1 : i32, i32, i32
  }
  func.func @transform_4(%arg0: i32) -> (i32, i32, i32) {
    %c0_i32 = arith.constant 0 : i32
    %c0_i32_0 = arith.constant 0 : i32
    %c0_i32_1 = arith.constant 0 : i32
    %c0_i32_2 = arith.constant 0 : i32
    return %c0_i32, %c0_i32_0, %c0_i32_1 : i32, i32, i32
  }
  func.func @transform_5(%arg0: i32) -> (i32, i32) {
    %c0_i32 = arith.constant 0 : i32
    %c0_i32_0 = arith.constant 0 : i32
    %c0_i32_1 = arith.constant 0 : i32
    return %c0_i32, %c0_i32_0 : i32, i32
  }
  func.func @transform_6(%arg0: i32) -> (i32, i32) {
    %c0_i32 = arith.constant 0 : i32
    %c0_i32_0 = arith.constant 0 : i32
    %c0_i32_1 = arith.constant 0 : i32
    return %c0_i32, %c0_i32_0 : i32, i32
  }
  func.func @transform_7(%arg0: i32) -> (i32, i32) {
    %c0_i32 = arith.constant 0 : i32
    %c0_i32_0 = arith.constant 0 : i32
    return %arg0, %c0_i32 : i32, i32
  }
}

</mosaic_0001>

<bundles_post_ra>
// kernel: tpu_custom_call.1
= control target key start
LH: loop header
LB: loop body
LE: loop exit
PB: predicated region body
PF: predicated region fallthrough
CT: control target
= control target key end

     0   :  { %12 = vsyncpa [#allocation3], 0  ;;  %s5743_s0 = inlined_call_operand.vmem [shape: f32[56,8], index: 0, kind: input, shape index: {}]   ;;  %s5744_s1 = inlined_call_operand.vmem [shape: f32[8,128], index: 1, kind: input, shape index: {}]   ;;  %s5745_s2 = inlined_call_operand.vmem [shape: f32[1,128], index: 2, kind: input, shape index: {}]   ;;  %s5746_s3 = inlined_call_operand.hbm [shape: f32[2,128,128], index: 3, kind: input, shape index: {}]   ;;  %s5747_s4 = inlined_call_operand.vmem [shape: f32[2,1,128], index: 4, kind: input, shape index: {}]   ;;  %s5748_s5 = inlined_call_operand.hbm [shape: f32[128,128], index: 5, kind: input, shape index: {}]   ;;  %s5749_s6 = inlined_call_operand.vmem [shape: f32[1,128], index: 6, kind: input, shape index: {}]   ;;  %s5750_s7 = inlined_call_operand.hbm [shape: f32[56,128], index: 7, kind: output, shape index: {}]  }
   0x1   :  { %13 = vsyncpa [#allocation6], 0 }
   0x2   :  { %14 = vsyncpa [#allocation4], 0  ;;  %s3490_s24 = smov [#allocation2]   ;;  %s3418_s28 = scalar_lea.hbm %s5746_s3, 4096 }
   0x3   :  { %s26_s25 = sshll.u32 %s3490_s24, 4  ;;  %p3419_p0 = scmp.ne.s32.totalorder %s5746_s3, %s3418_s28  ;;  %s27_s25 = int_to_ptr.vmem [resolvable:$true] %s26_s25 }
   0x4   :  { %p3422_p1 = scmp.lt.u32.totalorder %s3418_s28, %s5746_s3 }
   0x6   :  { %p3424_p2 = pnand %p3422_p1, %p3419_p0 }
   0x8   :  { %3427 = shalt.err (!%p3424_p2)
}
   0x9   :  { %s3428_s10 = scalar_lea.vmem %s27_s25, 4096  ;;  %p3433_p4 = scmp.lt.s32.totalorder %s27_s25, %s27_s25 }
   0xa   :  { %p3429_p3 = scmp.ne.s32.totalorder %s27_s25, %s3428_s10  ;;  %p3434_p5 = scmp.lt.s32.totalorder %s3428_s10, %s3428_s10 }
   0xc   :  { %p3435_p6 = por %p3434_p5, %p3433_p4 }
   0xe   :  { %p3436_p7 = pnand %p3435_p6, %p3429_p3 }
  0x10   :  { %3439 = shalt.err (!%p3436_p7)
}
  0x11   :  { %s3491_s11 = smov 128   ;;  %s3492_s12 = smov 8  }
  0x12   :  { %32 = dma.hbm_to_vmem [thread:$0]  %s5746_s3, 4096, %s27_s25, [#allocation3], %s3491_s11, %s3491_s11, %s3492_s12  }
  0x13   :  { %s3493_s15 = smov [#allocation5]   ;;  %s3440_s19 = scalar_lea.hbm %s5748_s5, 2048 }
  0x14   :  { %s40_s16 = sshll.u32 %s3493_s15, 4  ;;  %p3441_p8 = scmp.ne.s32.totalorder %s5748_s5, %s3440_s19  ;;  %s41_s16 = int_to_ptr.vmem [resolvable:$true] %s40_s16 }
  0x15   :  { %p3444_p9 = scmp.lt.u32.totalorder %s3440_s19, %s5748_s5 }
  0x17   :  { %p3446_p10 = pnand %p3444_p9, %p3441_p8 }
  0x19   :  { %3449 = shalt.err (!%p3446_p10)
}
  0x1a   :  { %s3450_s24 = scalar_lea.vmem %s41_s16, 2048  ;;  %p3455_p12 = scmp.lt.s32.totalorder %s41_s16, %s41_s16 }
  0x1b   :  { %p3451_p11 = scmp.ne.s32.totalorder %s41_s16, %s3450_s24  ;;  %p3456_p13 = scmp.lt.s32.totalorder %s3450_s24, %s3450_s24 }
  0x1d   :  { %p3457_p0 = por %p3456_p13, %p3455_p12 }
  0x1f   :  { %p3458_p1 = pnand %p3457_p0, %p3451_p11 }
  0x21   :  { %3461 = shalt.err (!%p3458_p1)
}
  0x22   :  { %46 = dma.hbm_to_vmem [thread:$0]  %s5748_s5, 2048, %s41_s16, [#allocation6], %s3491_s11, %s3491_s11, %s3492_s12  }
  0x23   :  { %3484 = dma.done.wait [#allocation3], 4096  }
  0x24   :  { %3485 = vsyncadd [#allocation3], 4294963200 }
  0x25   :  { %3486 = dma.done.wait [#allocation6], 2048  }
  0x26   :  { %3487 = vsyncadd [#allocation6], 4294965248  ;;  %v5753_v0 = vmov 0.0   ;;  %vm3495_vm0 = vmmov 0   ;;  %vm70_vm1 = vcmask 64512   ;;  %v62_v1 = vld [vmem:[%s5744_s1] sm:$0xff] }
  0x27   :  { %2966 = vmatprep.subr.mxu0 %v5753_v0  ;;  %2968 = vmatprep.mubr.msk.f32.mxu0 %vm3495_vm0, %v5753_v0  ;;  %v55_v2 = vld [vmem:[%s5743_s0] sm:$0xff]  ;;  %v56_v3 = vld [vmem:[%s5743_s0 + $0x8] sm:$0xff]  ;;  %v57_v4 = vld [vmem:[%s5743_s0 + $0x10] sm:$0xff]  ;;  %v5751_v12 = vmov 0.0|0.0  }
  0x28   :  { %3021 = vmatprep.mubr.msk.f32.mxu1 %vm3495_vm0, %v5753_v0  ;;  %2967 = vmatpush3.msra.mxu0 %v62_v1  ;;  %v58_v5 = vld [vmem:[%s5743_s0 + $0x18] sm:$0xff]  ;;  %v59_v6 = vld [vmem:[%s5743_s0 + $0x20] sm:$0xff]  ;;  %v60_v7 = vld [vmem:[%s5743_s0 + $0x28] sm:$0xff] }
  0x29   :  { %2969 = vmatmul.mubr.msk.f32.vlgmr.msra.gmra.mrb[0].mxu0 %vm70_vm1, %v55_v2  ;;  %v61_v8 = vld [vmem:[%s5743_s0 + $0x30] sm:$0xff]  ;;  %v927_v9 = vld [vmem:[#allocation2] sm:$0xff]  ;;  %v928_v10 = vld [vmem:[#allocation2 + $0x8] sm:$0xff]  ;;  %3148 = vmatprep.subr.bf16.mxu1 %v5751_v12 }
  0x2a   :  { %2971 = vmatprep.mubr.msk.f32.mxu0 %vm3495_vm0, %v5753_v0  ;;  %v929_v11 = vld [vmem:[#allocation2 + $0x10] sm:$0xff]  ;;  %v3149_v13 = vpack.c.bf16 %v928_v10, %v927_v9  ;;  %v930_v14 = vld [vmem:[#allocation2 + $0x18] sm:$0xff]  ;;  %3172 = vmatprep.subr.bf16.mxu0 %v5751_v12  ;;  %v931_v16 = vld [vmem:[#allocation2 + $0x20] sm:$0xff] }
  0x2b   :  { %v3152_v15 = vpack.c.bf16 %v930_v14, %v929_v11  ;;  %v932_v17 = vld [vmem:[#allocation2 + $0x28] sm:$0xff]  ;;  %v933_v19 = vld [vmem:[#allocation2 + $0x30] sm:$0xff]  ;;  %v934_v20 = vld [vmem:[#allocation2 + $0x38] sm:$0xff] }
  0x2c   :  { %3150 = vmatpush3.bf16.msra.mxu1 %v3149_v13  ;;  %v3155_v18 = vpack.c.bf16 %v932_v17, %v931_v16  ;;  %v3158_v21 = vpack.c.bf16 %v934_v20, %v933_v19  ;;  %v935_v22 = vld [vmem:[#allocation2 + $0x40] sm:$0xff]  ;;  %v936_v23 = vld [vmem:[#allocation2 + $0x48] sm:$0xff]  ;;  %v937_v25 = vld [vmem:[#allocation2 + $0x50] sm:$0xff] }
  0x2d   :  { %2972 = vmatmul.mubr.msk.f32.gmra.mrb[2].mxu0 %vm70_vm1, %v56_v3  ;;  %3151 = vmatprep.subr.bf16.mxu1 %v5751_v12  ;;  %v3161_v24 = vpack.c.bf16 %v936_v23, %v935_v22  ;;  %v938_v26 = vld [vmem:[#allocation2 + $0x58] sm:$0xff]  ;;  %v939_v28 = vld [vmem:[#allocation2 + $0x60] sm:$0xff]  ;;  %v940_v29 = vld [vmem:[#allocation2 + $0x68] sm:$0xff] }
  0x2e   :  { %2974 = vmatprep.mubr.msk.f32.mxu0 %vm3495_vm0, %v5753_v0  ;;  %v3164_v27 = vpack.c.bf16 %v938_v26, %v937_v25  ;;  %v3167_v30 = vpack.c.bf16 %v940_v29, %v939_v28  ;;  %v941_v31 = vld [vmem:[#allocation2 + $0x70] sm:$0xff]  ;;  %v942_v32 = vld [vmem:[#allocation2 + $0x78] sm:$0xff]  ;;  %v2793_v34 = vld [vmem:[%s5745_s2] ss:$0 sm:$0xff] }
  0x2f   :  { %v3170_v33 = vpack.c.bf16 %v942_v32, %v941_v31 }
  0x30   :  { %3153 = vmatpush3.bf16.msra.mxu1 %v3152_v15 }
  0x31   :  { %2975 = vmatmul.mubr.msk.f32.gmra.mrb[4].mxu0 %vm70_vm1, %v57_v4  ;;  %3154 = vmatprep.subr.bf16.mxu1 %v5751_v12 }
  0x32   :  { %2977 = vmatprep.mubr.msk.f32.mxu0 %vm3495_vm0, %v5753_v0 }
  0x34   :  { %3156 = vmatpush3.bf16.msra.mxu1 %v3155_v18 }
  0x35   :  { %2978 = vmatmul.mubr.msk.f32.gmra.mrb[6].mxu0 %vm70_vm1, %v58_v5  ;;  %3157 = vmatprep.subr.bf16.mxu1 %v5751_v12 }
  0x36   :  { %2980 = vmatprep.mubr.msk.f32.mxu0 %vm3495_vm0, %v5753_v0 }
  0x38   :  { %3159 = vmatpush3.bf16.msra.mxu1 %v3158_v21 }
  0x39   :  { %2981 = vmatmul.mubr.msk.f32.gmra.mrb[8].mxu0 %vm70_vm1, %v59_v6  ;;  %3160 = vmatprep.subr.bf16.mxu1 %v5751_v12 }
  0x3a   :  { %2983 = vmatprep.mubr.msk.f32.mxu0 %vm3495_vm0, %v5753_v0 }
  0x3c   :  { %3162 = vmatpush3.bf16.msra.mxu1 %v3161_v24 }
  0x3d   :  { %2984 = vmatmul.mubr.msk.f32.gmra.mrb[10].mxu0 %vm70_vm1, %v60_v7  ;;  %3163 = vmatprep.subr.bf16.mxu1 %v5751_v12 }
  0x3e   :  { %2986 = vmatprep.mubr.msk.f32.mxu0 %vm3495_vm0, %v5753_v0 }
  0x40   :  { %3165 = vmatpush3.bf16.msra.mxu1 %v3164_v27 }
  0x41   :  { %2987 = vmatmul.mubr.msk.f32.gmra.mrb[12].mxu0 %vm70_vm1, %v61_v8  ;;  %3166 = vmatprep.subr.bf16.mxu1 %v5751_v12 }
  0x42   :  { %3074 = vmatprep.mubr.msk.f32.mxu0 %vm3495_vm0, %v5753_v0 }
  0x44   :  { %3168 = vmatpush3.bf16.msra.mxu1 %v3167_v30  ;;  %v5759_v30 = vmov 920167782  }
  0x45   :  { %3169 = vmatprep.subr.bf16.mxu1 %v5751_v12 }
  0x48   :  { %3171 = vmatpush3.bf16.msra.mxu1 %v3170_v33 }
  0x49   :  { %3220 = vmatprep.subr.bf16.mxu1 %v5751_v12 }
  0xfc   :  { %v158_v35 = vpop.f32.mrb[0].mxu0 }
  0xfd   :  { %v159_v36 = vadd.f32 %v2793_v34, %v158_v35  ;;  %v2970_v37 = vpop.f32.mrb[1].mxu0  ;;  %v5756_v35 = vmov 1326507024  }
  0xff   :  { %v3637_v38 = vmul.f32 30.0, %v159_v36 }
 0x100   :  { %v163_v39 = vpop.f32.mrb[2].mxu0 }
 0x101   :  { %v202_v40 = vand.u32 2139095040, %v3637_v38  ;;  %v164_v41 = vadd.f32 %v2793_v34, %v163_v39  ;;  %v2973_v42 = vpop.f32.mrb[3].mxu0  ;;  %v199_v4 = vand.u32 2147483647, %v3637_v38  ;;  %v5761_v39 = vmov 2102212464  }
 0x103   :  { %v203_v43 = vshrl.u32 %v202_v40, 23  ;;  %v3640_v44 = vmul.f32 30.0, %v164_v41  ;;  %v206_v17 = vand.u32 8388607, %v199_v4 }
 0x104   :  { %v168_v45 = vpop.f32.mrb[4].mxu0 }
 0x105   :  { %v2801_v46 = vadd.s32 4294967169, %v203_v43  ;;  %v306_v47 = vand.u32 2139095040, %v3640_v44  ;;  %v169_v48 = vadd.f32 %v2793_v34, %v168_v45  ;;  %v2976_v49 = vpop.f32.mrb[5].mxu0  ;;  %v303_v14 = vand.u32 2147483647, %v3640_v44 }
 0x106   :  { %v207_v29 = vor.u32 8388608, %v206_v17 }
 0x107   :  { %v209_v50 = vadd.s32 1, %v2801_v46  ;;  %v307_v51 = vshrl.u32 %v306_v47, 23  ;;  %v3643_v52 = vmul.f32 30.0, %v169_v48  ;;  %v310_v24 = vand.u32 8388607, %v303_v14 }
 0x108   :  { %v173_v53 = vpop.f32.mrb[6].mxu0 }
 0x109   :  { %v2805_v54 = vadd.s32 4294967169, %v307_v51  ;;  %v410_v55 = vand.u32 2139095040, %v3643_v52  ;;  %v174_v56 = vadd.f32 %v2793_v34, %v173_v53  ;;  %v2979_v57 = vpop.f32.mrb[7].mxu0  ;;  %vm210_vm2 = vcmp.gt.s32.totalorder %v209_v50, 0 }
 0x10a   :  { %v211_v62 = vsel %vm210_vm2, %v209_v50, 0  ;;  %v311_v37 = vor.u32 8388608, %v310_v24  ;;  %v3692_v50 = vshll.u32 %v207_v29, 8 }
 0x10b   :  { %v313_v58 = vadd.s32 1, %v2805_v54  ;;  %v411_v59 = vshrl.u32 %v410_v55, 23  ;;  %v3646_v60 = vmul.f32 30.0, %v174_v56  ;;  %v3650_v5 = vand.u32 31, %v211_v62 }
 0x10c   :  { %v178_v61 = vpop.f32.mrb[8].mxu0  ;;  %v3679_v43 = vshrl.u32 %v211_v62, 5  ;;  %v5755_v55 = vand.u32 2147483647, %v3643_v52 }
 0x10d   :  { %v2982_v63 = vpop.f32.mrb[9].mxu0  ;;  %vm314_vm3 = vcmp.gt.s32.totalorder %v313_v58, 0  ;;  %v2809_v1 = vadd.s32 4294967169, %v411_v59  ;;  %v514_v2 = vand.u32 2139095040, %v3646_v60  ;;  %v179_v3 = vadd.f32 %v2793_v34, %v178_v61 }
 0x10e   :  { %v315_v6 = vsel %vm314_vm3, %v313_v58, 0  ;;  %v3660_v18 = vsub.s32 32, %v3650_v5  ;;  %v228_v45 = vshll.u32 %v5759_v30, %v3650_v5  ;;  %v3701_v58 = vshll.u32 %v311_v37, 8 }
 0x10f   :  { %v417_v7 = vadd.s32 1, %v2809_v1  ;;  %v515_v8 = vshrl.u32 %v514_v2, 23  ;;  %v3652_v10 = vmul.f32 30.0, %v179_v3  ;;  %v3655_v15 = vand.u32 31, %v315_v6 }
 0x110   :  { %v183_v9 = vpop.f32.mrb[10].mxu0  ;;  %v226_v31 = vshrl.u32 %v5759_v30, %v3660_v18  ;;  %v229_v36 = vshrl.u32 %v5756_v35, %v3660_v18  ;;  %v3687_v48 = vshrl.u32 %v315_v6, 5  ;;  %vm234_vm7 = vcmp.lt.s32.totalorder %v3679_v43, 4 }
 0x111   :  { %v184_v11 = vadd.f32 %v2793_v34, %v183_v9  ;;  %v2985_v13 = vpop.f32.mrb[11].mxu0  ;;  %vm418_vm4 = vcmp.gt.s32.totalorder %v417_v7, 0  ;;  %v2813_v16 = vadd.s32 4294967169, %v515_v8  ;;  %v618_v19 = vand.u32 2139095040, %v3652_v10 }
 0x112   :  { %v419_v21 = vsel %vm418_vm4, %v417_v7, 0  ;;  %v3668_v28 = vsub.s32 32, %v3655_v15  ;;  %v230_v51 = vor.u32 %v229_v36, %v228_v45  ;;  %v329_v53 = vshll.u32 %v5761_v39, %v3655_v15 }
 0x113   :  { %v521_v22 = vadd.s32 1, %v2813_v16  ;;  %v619_v25 = vshrl.u32 %v618_v19, 23  ;;  %v3665_v26 = vmul.f32 30.0, %v184_v11  ;;  %v3672_v32 = vand.u32 31, %v419_v21 }
 0x114   :  { %v188_v20 = vpop.f32.mrb[12].mxu0  ;;  %v330_v46 = vshrl.u32 %v5759_v30, %v3668_v28  ;;  %v333_v56 = vshrl.u32 %v5756_v35, %v3668_v28  ;;  %v3706_v61 = vshrl.u32 %v419_v21, 5  ;;  %v332_v1 = vshll.u32 %v5759_v30, %v3655_v15 }
 0x115   :  { %v2988_v23 = vpop.f32.mrb[13].mxu0  ;;  %v189_v27 = vadd.f32 %v2793_v34, %v188_v20  ;;  %vm522_vm5 = vcmp.gt.s32.totalorder %v521_v22, 0  ;;  %v2817_v33 = vadd.s32 4294967169, %v619_v25  ;;  %v225_v34 = vshll.u32 %v5761_v39, %v3650_v5 }
 0x116   :  { %v523_v40 = vsel %vm522_vm5, %v521_v22, 0  ;;  %v722_v42 = vand.u32 2139095040, %v3665_v26  ;;  %v3690_v49 = vsub.s32 32, %v3672_v32  ;;  %v3704_v59 = vor.u32 %v330_v46, %v329_v53 }
 0x117   :  { %v625_v41 = vadd.s32 1, %v2817_v33  ;;  %v3685_v47 = vor.u32 %v226_v31, %v225_v34  ;;  %v3696_v54 = vand.u32 31, %v523_v40  ;;  %v3708_v62 = vmul.f32 30.0, %v189_v27 }
 0x118   :  { %v723_v57 = vshrl.u32 %v722_v42, 23  ;;  %vm338_vm8 = vcmp.lt.s32.totalorder %v3687_v48, 4  ;;  %v434_v2 = vshrl.u32 %v5759_v30, %v3690_v49  ;;  %v244_v3 = vsel %vm234_vm7, %v230_v51, 1326507024 }
 0x119   :  { %vm626_vm6 = vcmp.gt.s32.totalorder %v625_v41, 0  ;;  %v240_v63 = vsel %vm234_vm7, %v3685_v47, 920167782  ;;  %v437_v6 = vshrl.u32 %v5756_v35, %v3690_v49  ;;  %v3723_v7 = vsub.s32 32, %v3696_v54 }
 0x11a   :  { %v627_v8 = vsel %vm626_vm6, %v625_v41, 0  ;;  %v334_v9 = vor.u32 %v333_v56, %v332_v1  ;;  %v433_v11 = vshll.u32 %v5761_v39, %v3672_v32  ;;  %v436_v13 = vshll.u32 %v5759_v30, %v3672_v32 }
 0x11b   :  { %v2821_v16 = vadd.s32 4294967169, %v723_v57  ;;  %v3732_v17 = vsel %vm338_vm8, %v3704_v59, 920167782  ;;  %vm442_vm9 = vcmp.lt.s32.totalorder %v3706_v61, 4  ;;  %v3735_v19 = vshrl.u32 %v523_v40, 5 }
 0x11c   :  { %v826_v20 = vand.u32 2139095040, %v3708_v62  ;;  %v3738_v21 = vor.u32 %v434_v2, %v433_v11  ;;  %v3740_v22 = vand.u32 31, %v627_v8  ;;  %v5763_v23 = vmov 2475754826  }
 0x11d   :  { %v217_v24 = vshrl.u32 %v5763_v23, %v3660_v18  ;;  %v3501_v25 = vmov 2131351028   ;;  %v438_v29 = vor.u32 %v437_v6, %v436_v13  ;;  %v538_v31 = vshrl.u32 %v5759_v30, %v3723_v7 }
 0x11e   :  { %v220_v27 = vshrl.u32 %v3501_v25, %v3660_v18  ;;  %v3502_v33 = vmov 683565275   ;;  %v223_v37 = vshrl.u32 %v5761_v39, %v3660_v18  ;;  %v541_v34 = vshrl.u32 %v5756_v35, %v3723_v7 }
 0x11f   :  { %v216_v36 = vshll.u32 %v3502_v33, %v3650_v5  ;;  %v729_v40 = vadd.s32 1, %v2821_v16  ;;  %v219_v41 = vshll.u32 %v5763_v23, %v3650_v5  ;;  %v222_v42 = vshll.u32 %v3501_v25, %v3650_v5 }
 0x120   :  { %v3760_v45 = vsel %vm338_vm8, %v334_v9, 1326507024  ;;  %v537_v46 = vshll.u32 %v5761_v39, %v3696_v54  ;;  %v540_v51 = vshll.u32 %v5759_v30, %v3696_v54  ;;  %v827_v53 = vshrl.u32 %v826_v20, 23 }
 0x121   :  { %v3767_v56 = vsub.s32 32, %v3740_v22  ;;  %v218_v57 = vor.u32 %v217_v24, %v216_v36  ;;  %v221_v1 = vor.u32 %v220_v27, %v219_v41  ;;  %v224_v2 = vor.u32 %v223_v37, %v222_v42 }
 0x122   :  { %v3772_v5 = vsel %vm442_vm9, %v3738_v21, 920167782  ;;  %v3776_v6 = vsel %vm442_vm9, %v438_v29, 1326507024  ;;  %vm546_vm10 = vcmp.lt.s32.totalorder %v3735_v19, 4  ;;  %v215_v9 = vshrl.u32 %v3502_v33, %v3660_v18 }
 0x123   :  { %v3781_v11 = vor.u32 %v538_v31, %v537_v46  ;;  %v542_v13 = vor.u32 %v541_v34, %v540_v51  ;;  %v3783_v16 = vshrl.u32 %v627_v8, 5  ;;  %vm730_vm11 = vcmp.gt.s32.totalorder %v729_v40, 0 }
 0x124   :  { %v641_v20 = vshll.u32 %v5761_v39, %v3740_v22  ;;  %v3789_v24 = vshll.u32 %v5759_v30, %v3740_v22  ;;  %v2825_v27 = vadd.s32 4294967169, %v827_v53  ;;  %vm231_vm12 = vcmp.lt.s32.totalorder %v3679_v43, 1 }
 0x125   :  { %v642_v29 = vshrl.u32 %v5759_v30, %v3767_v56  ;;  %vm233_vm13 = vcmp.lt.s32.totalorder %v3679_v43, 3  ;;  %v236_v18 = vsel %vm234_vm7, %v224_v2, 2102212464  ;;  %v239_v8 = vsel %vm231_vm12, %v218_v57, %v221_v1 }
 0x126   :  { %v731_v31 = vsel %vm730_vm11, %v729_v40, 0  ;;  %vm232_vm14 = vcmp.lt.s32.totalorder %v3679_v43, 2  ;;  %v235_v36 = vsel %vm231_vm12, %v215_v9, %v218_v57  ;;  %v241_v37 = vsel %vm233_vm13, %v224_v2, %v240_v63 }
 0x127   :  { %v237_v34 = vsel %vm233_vm13, %v221_v1, %v236_v18  ;;  %v242_v41 = vsel %vm232_vm14, %v239_v8, %v241_v37  ;;  %v243_v42 = vsel %vm231_vm12, %v221_v1, %v224_v2  ;;  %v245_v46 = vsel %vm233_vm13, %v3685_v47, %v244_v3 }
 0x128   :  { %v3804_v51 = vsel %vm546_vm10, %v3781_v11, 920167782  ;;  %v3808_v53 = vsel %vm546_vm10, %v542_v13, 1326507024  ;;  %v3812_v40 = vshrl.u32 %v5756_v35, %v3767_v56  ;;  %v246_v63 = vsel %vm232_vm14, %v243_v42, %v245_v46 }
 0x129   :  { %v3817_v57 = vmul.u32.u64.low %v3692_v50, %v246_v63  ;;  %v3818_v1 = vmul.u32.u64.high %v3692_v50, %v246_v63, %v3817_v57  ;;  %v3821_v47 = vmul.u32.u64.low %v3692_v50, %v242_v41  ;;  %v3822_v3 = vmul.u32.u64.high %v3692_v50, %v242_v41, %v3821_v47 }
 0x12a   :  { %v3825_v2 = vshrl.u32 %v731_v31, 5  ;;  %v3827_v9 = vand.u32 31, %v731_v31  ;;  %v3829_v13 = vadd.s32 1, %v2825_v27  ;;  %v238_v18 = vsel %vm232_vm14, %v235_v36, %v237_v34 }
 0x12b   :  { %v3833_v8 = vor.u32 %v642_v29, %v641_v20  ;;  %v320_v37 = vshll.u32 %v3502_v33, %v3655_v15  ;;  %v321_v42 = vshrl.u32 %v5763_v23, %v3668_v28  ;;  %v324_v41 = vshrl.u32 %v3501_v25, %v3668_v28 }
 0x12c   :  { %v646_v31 = vor.u32 %v3812_v40, %v3789_v24  ;;  %v323_v27 = vshll.u32 %v5763_v23, %v3655_v15  ;;  %v326_v43 = vshll.u32 %v3501_v25, %v3655_v15  ;;  %v327_v20 = vshrl.u32 %v5761_v39, %v3668_v28 }
 0x12d   :  { %v254_v29 = vmul.u32 %v3692_v50, %v238_v18  ;;  %vm256_vm15 = vc.u32 %v3818_v1, %v3821_v47  ;;  %v257_v36 = vadd.s32 1, %v3822_v3  ;;  %v322_v34 = vor.u32 %v321_v42, %v320_v37 }
 0x12e   :  { %v319_v46 = vshrl.u32 %v3502_v33, %v3668_v28  ;;  %v325_v63 = vor.u32 %v324_v41, %v323_v27  ;;  %v328_v57 = vor.u32 %v327_v20, %v326_v43  ;;  %vm337_vm1 = vcmp.lt.s32.totalorder %v3687_v48, 3 }
 0x12f   :  { %v258_v15 = vsel %vm256_vm15, %v257_v36, %v3822_v3  ;;  %vm335_vm2 = vcmp.lt.s32.totalorder %v3687_v48, 1  ;;  %vm336_vm3 = vcmp.lt.s32.totalorder %v3687_v48, 2  ;;  %v349_v50 = vsel %vm337_vm1, %v3704_v59, %v3760_v45 }
 0x130   :  { %v259_v18 = vadd.s32 %v258_v15, %v254_v29  ;;  %v340_v37 = vsel %vm338_vm8, %v328_v57, 2102212464  ;;  %v343_v42 = vsel %vm335_vm2, %v322_v34, %v325_v63  ;;  %v345_v28 = vsel %vm337_vm1, %v328_v57, %v3732_v17 }
 0x131   :  { %v3865_v41 = vsub.s32 32, %v3827_v9  ;;  %v339_v27 = vsel %vm335_vm2, %v319_v46, %v322_v34  ;;  %v346_v3 = vsel %vm336_vm3, %v343_v42, %v345_v28  ;;  %v347_v43 = vsel %vm335_vm2, %v325_v63, %v328_v57 }
 0x132   :  { %v260_v20 = vadd.s32 536870912, %v259_v18  ;;  %v341_v36 = vsel %vm337_vm1, %v325_v63, %v340_v37  ;;  %v350_v59 = vsel %vm336_vm3, %v347_v43, %v349_v50  ;;  %v425_v45 = vshrl.u32 %v5763_v23, %v3690_v49 }
 0x133   :  { %v3874_v29 = vmul.u32.u64.low %v3701_v58, %v350_v59  ;;  %v3875_v15 = vmul.u32.u64.high %v3701_v58, %v350_v59, %v3874_v29  ;;  %v3878_v17 = vmul.u32.u64.low %v3701_v58, %v346_v3  ;;  %v3879_v12 = vmul.u32.u64.high %v3701_v58, %v346_v3, %v3878_v17 }
 0x134   :  { %v3884_v34 = vshll.u32 %v5761_v39, %v3827_v9  ;;  %v261_v46 = vshrl.u32 %v260_v20, 30  ;;  %v414_v63 = vand.u32 8388607, %v5755_v55  ;;  %v424_v57 = vshll.u32 %v3502_v33, %v3672_v32 }
 0x135   :  { %vm201_vm4 = vcmp.lt.s32.totalorder %v3637_v38, 0  ;;  %v342_v50 = vsel %vm336_vm3, %v339_v27, %v341_v36  ;;  %v427_v37 = vshll.u32 %v5763_v23, %v3672_v32  ;;  %v428_v42 = vshrl.u32 %v3501_v25, %v3690_v49 }
 0x136   :  { %v431_v28 = vshrl.u32 %v5761_v39, %v3690_v49  ;;  %v3901_v3 = vshll.u32 %v5759_v30, %v3827_v9  ;;  %v262_v43 = vshll.u32 %v261_v46, 30  ;;  %v426_v20 = vor.u32 %v425_v45, %v424_v57 }
 0x137   :  { %v430_v59 = vshll.u32 %v3501_v25, %v3672_v32  ;;  %vm834_vm5 = vcmp.gt.s32.totalorder %v3829_v13, 0  ;;  %vm360_vm6 = vc.u32 %v3875_v15, %v3878_v17  ;;  %v361_v48 = vadd.s32 1, %v3879_v12 }
 0x138   :  { %v429_v27 = vor.u32 %v428_v42, %v427_v37  ;;  %vm650_vm7 = vcmp.lt.s32.totalorder %v3783_v16, 4  ;;  %vm3912_vm8 = vcmp.le.f32.partialorder %v199_v4, 0.7853982  ;;  %v3916_v45 = vsub.s32 %v259_v18, %v262_v43 }
 0x139   :  { %v358_v32 = vmul.u32 %v3701_v58, %v342_v50  ;;  %v415_v29 = vor.u32 8388608, %v414_v63  ;;  %v432_v57 = vor.u32 %v431_v28, %v430_v59  ;;  %v285_v0 = vsub.s32 4, %v261_v46 }
 0x13a   :  { %v362_v55 = vsel %vm360_vm6, %v361_v48, %v3879_v12  ;;  %vm439_vm11 = vcmp.lt.s32.totalorder %v3706_v61, 1  ;;  %vm441_vm12 = vcmp.lt.s32.totalorder %v3706_v61, 3  ;;  %v265_v37 = vsub.s32 0, %v3916_v45 }
 0x13b   :  { %v363_v42 = vadd.s32 %v362_v55, %v358_v32  ;;  %v447_v4 = vsel %vm439_vm11, %v426_v20, %v429_v27  ;;  %v453_v58 = vsel %vm441_vm12, %v3738_v21, %v3776_v6  ;;  %v746_v18 = vshrl.u32 %v5759_v30, %v3865_v41 }
 0x13c   :  { %v423_v12 = vshrl.u32 %v3502_v33, %v3690_v49  ;;  %v449_v63 = vsel %vm441_vm12, %v432_v57, %v3772_v5  ;;  %v451_v55 = vsel %vm439_vm11, %v429_v27, %v432_v57  ;;  %v2802_v50 = vmin.u32 %v265_v37, %v3916_v45 }
 0x13d   :  { %v364_v28 = vadd.s32 536870912, %v363_v42  ;;  %vm440_vm13 = vcmp.lt.s32.totalorder %v3706_v61, 2  ;;  %v444_v21 = vsel %vm442_vm9, %v432_v57, 2102212464  ;;  %v3944_v6 = vshrl.u32 %v5756_v35, %v3865_v41 }
 0x13e   :  { %v450_v49 = vsel %vm440_vm13, %v447_v4, %v449_v63  ;;  %v454_v5 = vsel %vm440_vm13, %v451_v55, %v453_v58  ;;  %v455_v43 = vshll.u32 %v415_v29, 8  ;;  %v835_v59 = vsel %vm834_vm5, %v3829_v13, 0 }
 0x13f   :  { %v267_v48 = vclz %v2802_v50  ;;  %v286_v32 = vsel %vm201_vm4, %v285_v0, %v261_v46  ;;  %v443_v57 = vsel %vm439_vm11, %v423_v12, %v426_v20  ;;  %v365_v37 = vshrl.u32 %v364_v28, 30 }
 0x140   :  { %v445_v35 = vsel %vm441_vm12, %v429_v27, %v444_v21  ;;  %v3959_v4 = vmul.u32.u64.low %v455_v43, %v454_v5  ;;  %v3960_v63 = vmul.u32.u64.high %v455_v43, %v454_v5, %v3959_v4  ;;  %vm754_vm9 = vcmp.lt.s32.totalorder %v3825_v2, 4 }
 0x141   :  { %v2803_v29 = vadd.s32 4294967294, %v267_v48  ;;  %v3963_v58 = vmul.u32.u64.low %v455_v43, %v450_v49  ;;  %v3964_v55 = vmul.u32.u64.high %v455_v43, %v450_v49, %v3963_v58  ;;  %v3970_v0 = vsel %vm650_vm7, %v3833_v8, 920167782 }
 0x142   :  { %v3977_v13 = vsel %vm650_vm7, %v646_v31, 1326507024  ;;  %v288_v46 = vsel %vm3912_vm8, 0, %v286_v32  ;;  %v366_v20 = vshll.u32 %v365_v37, 30  ;;  %v3981_v27 = vshrl.u32 %v835_v59, 5 }
 0x143   :  { %v3983_v12 = vand.u32 31, %v835_v59  ;;  %vm2804_vm14 = vcmp.lt.s32.totalorder %v2803_v29, 0  ;;  %vm305_vm15 = vcmp.lt.s32.totalorder %v3640_v44, 0  ;;  %v446_v50 = vsel %vm440_vm13, %v443_v57, %v445_v35 }
 0x144   :  { %v3989_v24 = vor.u32 %v746_v18, %v3884_v34  ;;  %v270_v31 = vsel %vm2804_vm14, 0, %v2803_v29  ;;  %v3993_v28 = vsub.s32 %v363_v42, %v366_v20  ;;  %v255_v21 = vadd.s32 %v3821_v47, %v3818_v1 }
 0x145   :  { %v271_v49 = vsub.s32 32, %v270_v31  ;;  %v275_v5 = vsub.s32 4294967266, %v270_v31  ;;  %v292_v59 = vadd.s32 3, %v288_v46  ;;  %v462_v32 = vmul.u32 %v455_v43, %v446_v50 }
 0x146   :  { %v369_v48 = vsub.s32 0, %v3993_v28  ;;  %vm464_vm1 = vc.u32 %v3960_v63, %v3963_v58  ;;  %v465_v35 = vadd.s32 1, %v3964_v55  ;;  %v272_v61 = vshll.u32 %v3916_v45, %v270_v31 }
 0x147   :  { %v273_v34 = vshrl.u32 %v255_v21, %v271_v49  ;;  %v276_v18 = vadd.s32 127, %v275_v5  ;;  %vm4004_vm2 = vcmp.le.f32.partialorder %v303_v14, 0.7853982  ;;  %v5758_v1 = vand.u32 2147483647, %v3646_v60 }
 0x148   :  { %v4010_v47 = vsub.s32 32, %v3983_v12  ;;  %v2806_v43 = vmin.u32 %v369_v48, %v3993_v28  ;;  %v389_v57 = vsub.s32 4, %v365_v37  ;;  %v466_v4 = vsel %vm464_vm1, %v465_v35, %v3964_v55 }
 0x149   :  { %v4017_v45 = vsel %vm754_vm9, %v3989_v24, 920167782  ;;  %v274_v29 = vor.u32 %v273_v34, %v272_v61  ;;  %v277_v14 = vshll.u32 %v276_v18, 23  ;;  %v467_v46 = vadd.s32 %v466_v4, %v462_v32 }
 0x14a   :  { %v4019_v20 = vand.u32 3, %v292_v59  ;;  %v359_v50 = vadd.s32 %v3878_v17, %v3875_v15  ;;  %v371_v31 = vclz %v2806_v43  ;;  %v529_v21 = vshrl.u32 %v5763_v23, %v3723_v7 }
 0x14b   :  { %v278_v49 = vor.u32 4788187, %v277_v14  ;;  %v468_v5 = vadd.s32 536870912, %v467_v46  ;;  %v518_v55 = vand.u32 8388607, %v5758_v1  ;;  %v532_v48 = vshrl.u32 %v3501_v25, %v3723_v7 }
 0x14c   :  { %v2807_v35 = vadd.s32 4294967294, %v371_v31  ;;  %v390_v59 = vsel %vm305_vm15, %v389_v57, %v365_v37  ;;  %v528_v32 = vshll.u32 %v3502_v33, %v3696_v54  ;;  %v531_v15 = vshll.u32 %v5763_v23, %v3696_v54 }
 0x14d   :  { %v279_v17 = vand.u32 2147483647, %v278_v49  ;;  %v281_v61 = vcvt.s32.f32 %v274_v29  ;;  %v469_v34 = vshrl.u32 %v468_v5, 30  ;;  %v535_v18 = vshrl.u32 %v5761_v39, %v3723_v7 }
 0x14e   :  { %vm2808_vm3 = vcmp.lt.s32.totalorder %v2807_v35, 0  ;;  %vm409_vm5 = vcmp.lt.s32.totalorder %v3643_v52, 0  ;;  %v527_v43 = vshrl.u32 %v3502_v33, %v3723_v7  ;;  %v530_v4 = vor.u32 %v529_v21, %v528_v32 }
 0x14f   :  { %v534_v37 = vshll.u32 %v3501_v25, %v3696_v54  ;;  %v282_v57 = vmul.f32 %v281_v61, %v279_v17  ;;  %v374_v14 = vsel %vm2808_vm3, 0, %v2807_v35  ;;  %v470_v31 = vshll.u32 %v469_v34, 30 }
 0x150   :  { %v533_v1 = vor.u32 %v532_v48, %v531_v15  ;;  %v375_v49 = vsub.s32 32, %v374_v14  ;;  %v379_v29 = vsub.s32 4294967266, %v374_v14  ;;  %v392_v5 = vsel %vm4004_vm2, 0, %v390_v59 }
 0x151   :  { %v519_v30 = vor.u32 8388608, %v518_v55  ;;  %v283_v40 = vxor.u32 2147483648, %v282_v57  ;;  %v5769_v39 = vand.u32 2147483647, %v3643_v52  ;;  %v4050_v7 = vsub.s32 %v467_v46, %v470_v31 }
 0x152   :  { %v536_v54 = vor.u32 %v535_v18, %v534_v37  ;;  %vm543_vm11 = vcmp.lt.s32.totalorder %v3735_v19, 1  ;;  %v376_v21 = vshll.u32 %v3993_v28, %v374_v14  ;;  %v377_v48 = vshrl.u32 %v359_v50, %v375_v49 }
 0x153   :  { %vm4046_vm6 = vcmp.le.f32.partialorder %v5769_v39, 0.7853982  ;;  %v380_v35 = vadd.s32 127, %v379_v29  ;;  %vm545_vm12 = vcmp.lt.s32.totalorder %v3735_v19, 3  ;;  %v284_v55 = vsel %vm201_vm4, %v283_v40, %v282_v57 }
 0x154   :  { %v473_v59 = vsub.s32 0, %v4050_v7  ;;  %v493_v39 = vsub.s32 4, %v469_v34  ;;  %v551_v32 = vsel %vm543_vm11, %v530_v4, %v533_v1  ;;  %v287_v46 = vsel %vm3912_vm8, %v3637_v38, %v284_v55 }
 0x155   :  { %v378_v15 = vor.u32 %v377_v48, %v376_v21  ;;  %v381_v17 = vshll.u32 %v380_v35, 23  ;;  %v557_v28 = vsel %vm545_vm12, %v3781_v11, %v3808_v53  ;;  %3334 = vcosq.f32 %v287_v46 }
 0x156   :  { %v2810_v40 = vmin.u32 %v473_v59, %v4050_v7  ;;  %v553_v50 = vsel %vm545_vm12, %v536_v54, %v3804_v51  ;;  %v555_v61 = vsel %vm543_vm11, %v533_v1, %v536_v54  ;;  %3336 = vsinq.f32 %v287_v46 }
 0x157   :  { %v382_v36 = vor.u32 4788187, %v381_v17  ;;  %vm544_vm4 = vcmp.lt.s32.totalorder %v3735_v19, 2  ;;  %v548_v18 = vsel %vm546_vm10, %v536_v54, 2102212464  ;;  %v396_v37 = vadd.s32 3, %v392_v5 }
 0x158   :  { %v475_v57 = vclz %v2810_v40  ;;  %v494_v11 = vsel %vm409_vm5, %v493_v39, %v469_v34  ;;  %v558_v53 = vsel %vm544_vm4, %v555_v61, %v557_v28  ;;  %v385_v51 = vcvt.s32.f32 %v378_v15 }
 0x159   :  { %v383_v14 = vand.u32 2147483647, %v382_v36  ;;  %v554_v31 = vsel %vm544_vm4, %v551_v32, %v553_v50  ;;  %v559_v49 = vshll.u32 %v519_v30, 8  ;;  %vm298_vm8 = vcmp.eq.s32.totalorder %v4019_v20, 2 }
 0x15a   :  { %v2811_v29 = vadd.s32 4294967294, %v475_v57  ;;  %v547_v54 = vsel %vm543_vm11, %v527_v43, %v530_v4  ;;  %v549_v5 = vsel %vm545_vm12, %v533_v1, %v548_v18  ;;  %vm295_vm10 = vcmp.eq.s32.totalorder %v4019_v20, 0 }
 0x15b   :  { %v386_v34 = vmul.f32 %v385_v51, %v383_v14  ;;  %v496_v21 = vsel %vm4046_vm6, 0, %v494_v11  ;;  %v4090_v48 = vmul.u32.u64.low %v559_v49, %v558_v53  ;;  %v4091_v35 = vmul.u32.u64.high %v559_v49, %v558_v53, %v4090_v48 }
 0x15c   :  { %vm294_vm13 = vcmp.lt.s32.totalorder %v4019_v20, 2  ;;  %v463_v30 = vadd.s32 %v3963_v58, %v3960_v63  ;;  %vm2812_vm14 = vcmp.lt.s32.totalorder %v2811_v29, 0  ;;  %vm291_vm1 = vweird.f32 %v3637_v38 }
 0x15d   :  { %v4096_v55 = vmul.u32.u64.low %v559_v49, %v554_v31  ;;  %v4097_v43 = vmul.u32.u64.high %v559_v49, %v554_v31, %v4096_v55  ;;  %v387_v1 = vxor.u32 2147483648, %v386_v34  ;;  %v4101_v4 = vand.u32 3, %v396_v37 }
 0x15e   :  { %v478_v59 = vsel %vm2812_vm14, 0, %v2811_v29  ;;  %v550_v39 = vsel %vm544_vm4, %v547_v54, %v549_v5  ;;  %v500_v15 = vadd.s32 3, %v496_v21  ;;  %v615_v17 = vand.u32 2147483647, %v3652_v10 }
 0x15f   :  { %v479_v32 = vsub.s32 32, %v478_v59  ;;  %v483_v46 = vsub.s32 4294967266, %v478_v59  ;;  %v388_v63 = vsel %vm305_vm15, %v387_v1, %v386_v34  ;;  %v480_v58 = vshll.u32 %v4050_v7, %v478_v59  ;;  %v3335_v40 = vpop.eup %3334 }
 0x160   :  { %vm568_vm3 = vc.u32 %v4091_v35, %v4096_v55  ;;  %v632_v28 = vshll.u32 %v3502_v33, %v3740_v22  ;;  %v391_v19 = vsel %vm4004_vm2, %v3640_v44, %v388_v63  ;;  %v569_v36 = vadd.s32 1, %v4097_v43  ;;  %v3337_v18 = vpop.eup %3336 }
 0x161   :  { %v481_v50 = vshrl.u32 %v463_v30, %v479_v32  ;;  %v484_v61 = vadd.s32 127, %v483_v46  ;;  %v299_v37 = vxor.u32 2147483648, %v3335_v40  ;;  %3338 = vcosq.f32 %v391_v19 }
 0x162   :  { %v566_v57 = vmul.u32 %v559_v49, %v550_v39  ;;  %v636_v7 = vshrl.u32 %v3501_v25, %v3767_v56  ;;  %v296_v11 = vxor.u32 2147483648, %v3337_v18  ;;  %3340 = vsinq.f32 %v391_v19 }
 0x163   :  { %v482_v53 = vor.u32 %v481_v50, %v480_v58  ;;  %v485_v14 = vshll.u32 %v484_v61, 23  ;;  %v300_v51 = vsel %vm298_vm8, %v299_v37, %v3337_v18  ;;  %v570_v42 = vsel %vm568_vm3, %v569_v36, %v4097_v43 }
 0x164   :  { %v5772_v31 = vmov 2475754826   ;;  %v297_v54 = vsel %vm295_vm10, %v3335_v40, %v296_v11  ;;  %v571_v34 = vadd.s32 %v570_v42, %v566_v57  ;;  %v622_v21 = vand.u32 8388607, %v615_v17 }
 0x165   :  { %v633_v29 = vshrl.u32 %v5772_v31, %v3767_v56  ;;  %v635_v49 = vshll.u32 %v5772_v31, %v3740_v22  ;;  %v486_v5 = vor.u32 4788187, %v485_v14  ;;  %v301_v48 = vsel %vm294_vm13, %v297_v54, %v300_v51 }
 0x166   :  { %v638_v43 = vshll.u32 %v3501_v25, %v3740_v22  ;;  %v5773_v1 = vmov 2102212464   ;;  %v302_v39 = vsel %vm291_vm1, nan, %v301_v48  ;;  %v489_v46 = vcvt.s32.f32 %v482_v53 }
 0x167   :  { %v637_v30 = vor.u32 %v636_v7, %v635_v49  ;;  %v639_v59 = vshrl.u32 %v5773_v1, %v3767_v56  ;;  %v487_v32 = vand.u32 2147483647, %v486_v5  ;;  %v572_v63 = vadd.s32 536870912, %v571_v34  ;;  %3022 = vmatmul.mubr.f32.vlgmr.msra.gmra.mrb[0].mxu1 %v302_v39 }
 0x168   :  { %v5774_v58 = vor.u32 %v3944_v6, %v3901_v3  ;;  %vm398_vm15 = vcmp.lt.s32.totalorder %v4101_v4, 2  ;;  %v634_v22 = vor.u32 %v633_v29, %v632_v28  ;;  %v5775_v19 = vmov 0.0  }
 0x169   :  { %v640_v40 = vor.u32 %v639_v59, %v638_v43  ;;  %3024 = vmatprep.mubr.msk.f32.mxu1 %vm3495_vm0, %v5775_v19  ;;  %vm395_vm2 = vweird.f32 %v3640_v44  ;;  %v490_v38 = vmul.f32 %v489_v46, %v487_v32  ;;  %v4152_v50 = vshrl.u32 %v572_v63, 30 }
 0x16a   :  { %v4146_v20 = vsel %vm754_vm9, %v5774_v58, 1326507024  ;;  %vm647_vm11 = vcmp.lt.s32.totalorder %v3783_v16, 1  ;;  %vm649_vm12 = vcmp.lt.s32.totalorder %v3783_v16, 3  ;;  %vm399_vm4 = vcmp.eq.s32.totalorder %v4101_v4, 0 }
 0x16b   :  { %v623_v3 = vor.u32 8388608, %v622_v21  ;;  %v659_v6 = vsel %vm647_vm11, %v637_v30, %v640_v40  ;;  %v661_v28 = vsel %vm649_vm12, %v3833_v8, %v3977_v13  ;;  %vm402_vm8 = vcmp.eq.s32.totalorder %v4101_v4, 2  ;;  %v3339_v37 = vpop.eup %3338 }
 0x16c   :  { %v491_v61 = vxor.u32 2147483648, %v490_v38  ;;  %v4164_v36 = vand.u32 3, %v500_v15  ;;  %v574_v18 = vshll.u32 %v4152_v50, 30  ;;  %v631_v57 = vshrl.u32 %v3502_v33, %v3767_v56  ;;  %v3341_v13 = vpop.eup %3340 }
 0x16d   :  { %vm648_vm10 = vcmp.lt.s32.totalorder %v3783_v16, 2  ;;  %v655_v7 = vsel %vm647_vm11, %v634_v22, %v637_v30  ;;  %v657_v8 = vsel %vm649_vm12, %v640_v40, %v3970_v0  ;;  %v403_v11 = vxor.u32 2147483648, %v3339_v37 }
 0x16e   :  { %v492_v15 = vsel %vm409_vm5, %v491_v61, %v490_v38  ;;  %v4177_v53 = vsub.s32 %v571_v34, %v574_v18  ;;  %v662_v14 = vsel %vm648_vm10, %v659_v6, %v661_v28  ;;  %v400_v56 = vxor.u32 2147483648, %v3341_v13 }
 0x16f   :  { %v495_v51 = vsel %vm4046_vm6, %v3643_v52, %v492_v15  ;;  %v652_v42 = vsel %vm650_vm7, %v640_v40, 2102212464  ;;  %v663_v29 = vshll.u32 %v623_v3, 8  ;;  %v404_v0 = vsel %vm402_vm8, %v403_v11, %v3341_v13 }
 0x170   :  { %3342 = vcosq.f32 %v495_v51  ;;  %v577_v49 = vsub.s32 0, %v4177_v53  ;;  %v658_v54 = vsel %vm648_vm10, %v655_v7, %v657_v8  ;;  %v401_v5 = vsel %vm399_vm4, %v3339_v37, %v400_v56 }
 0x171   :  { %3344 = vsinq.f32 %v495_v51  ;;  %v4193_v34 = vmul.u32.u64.low %v663_v29, %v662_v14  ;;  %v4194_v23 = vmul.u32.u64.high %v663_v29, %v662_v14, %v4193_v34  ;;  %v405_v21 = vsel %vm398_vm15, %v401_v5, %v404_v0 }
 0x172   :  { %v2814_v48 = vmin.u32 %v577_v49, %v4177_v53  ;;  %v651_v43 = vsel %vm647_vm11, %v631_v57, %v634_v22  ;;  %v653_v59 = vsel %vm649_vm12, %v637_v30, %v652_v42  ;;  %v5776_v39 = vmov 920167782  }
 0x173   :  { %v4205_v32 = vshrl.u32 %v5776_v39, %v4010_v47  ;;  %v406_v46 = vsel %vm395_vm2, nan, %v405_v21  ;;  %v4209_v63 = vmul.u32.u64.low %v663_v29, %v658_v54  ;;  %v4210_v58 = vmul.u32.u64.high %v663_v29, %v658_v54, %v4209_v63 }
 0x174   :  { %3025 = vmatmul.mubr.f32.gmra.mrb[2].mxu1 %v406_v46  ;;  %vm506_vm7 = vcmp.eq.s32.totalorder %v4164_v36, 2  ;;  %vm513_vm5 = vcmp.lt.s32.totalorder %v3646_v60, 0  ;;  %v579_v4 = vclz %v2814_v48  ;;  %v719_v22 = vand.u32 2147483647, %v3665_v26 }
 0x175   :  { %3027 = vmatprep.mubr.msk.f32.mxu1 %vm3495_vm0, %v5775_v19  ;;  %vm503_vm6 = vcmp.eq.s32.totalorder %v4164_v36, 0  ;;  %v567_v44 = vadd.s32 %v4096_v55, %v4091_v35  ;;  %v597_v30 = vsub.s32 4, %v4152_v50  ;;  %v654_v40 = vsel %vm648_vm10, %v651_v43, %v653_v59 }
 0x176   :  { %vm672_vm13 = vc.u32 %v4194_v23, %v4209_v63  ;;  %vm502_vm14 = vcmp.lt.s32.totalorder %v4164_v36, 2  ;;  %v5777_v38 = vand.u32 2147483647, %v3646_v60  ;;  %v2815_v6 = vadd.s32 4294967294, %v579_v4 }
 0x177   :  { %v736_v35 = vshll.u32 %v3502_v33, %v3827_v9  ;;  %v737_v55 = vshrl.u32 %v5772_v31, %v3865_v41  ;;  %v739_v16 = vshll.u32 %v5772_v31, %v3827_v9  ;;  %vm499_vm3 = vweird.f32 %v3643_v52 }
 0x178   :  { %vm4229_vm1 = vcmp.le.f32.partialorder %v5777_v38, 0.7853982  ;;  %v673_v28 = vadd.s32 1, %v4210_v58  ;;  %v740_v61 = vshrl.u32 %v3501_v25, %v3865_v41  ;;  %v742_v18 = vshll.u32 %v3501_v25, %v3827_v9 }
 0x179   :  { %v743_v37 = vshrl.u32 %v5773_v1, %v3865_v41  ;;  %vm2816_vm15 = vcmp.lt.s32.totalorder %v2815_v6, 0  ;;  %v670_v57 = vmul.u32 %v663_v29, %v654_v40  ;;  %v726_v7 = vand.u32 8388607, %v719_v22 }
 0x17a   :  { %v738_v8 = vor.u32 %v737_v55, %v736_v35  ;;  %v582_v13 = vsel %vm2816_vm15, 0, %v2815_v6  ;;  %v674_v11 = vsel %vm672_vm13, %v673_v28, %v4210_v58  ;;  %v741_v15 = vor.u32 %v740_v61, %v739_v16  ;;  %v3343_v56 = vpop.eup %3342 }
 0x17b   :  { %v744_v14 = vor.u32 %v743_v37, %v742_v18  ;;  %v583_v51 = vsub.s32 32, %v582_v13  ;;  %v587_v9 = vsub.s32 4294967266, %v582_v13  ;;  %v598_v42 = vsel %vm513_vm5, %v597_v30, %v4152_v50  ;;  %v3345_v0 = vpop.eup %3344 }
 0x17c   :  { %v675_v29 = vadd.s32 %v674_v11, %v670_v57  ;;  %v507_v49 = vxor.u32 2147483648, %v3343_v56  ;;  %v584_v54 = vshll.u32 %v4177_v53, %v582_v13  ;;  %vm751_vm2 = vcmp.lt.s32.totalorder %v3825_v2, 1 }
 0x17d   :  { %vm753_vm11 = vcmp.lt.s32.totalorder %v3825_v2, 3  ;;  %v504_v5 = vxor.u32 2147483648, %v3345_v0  ;;  %v585_v34 = vshrl.u32 %v567_v44, %v583_v51  ;;  %v588_v21 = vadd.s32 127, %v587_v9 }
 0x17e   :  { %v676_v48 = vadd.s32 536870912, %v675_v29  ;;  %v508_v43 = vsel %vm506_vm7, %v507_v49, %v3345_v0  ;;  %v727_v59 = vor.u32 8388608, %v726_v7  ;;  %v759_v50 = vsel %vm751_vm2, %v738_v8, %v741_v15 }
 0x17f   :  { %v761_v46 = vsel %vm753_vm11, %v744_v14, %v4017_v45  ;;  %v505_v53 = vsel %vm503_vm6, %v3343_v56, %v504_v5  ;;  %v586_v58 = vor.u32 %v585_v34, %v584_v54  ;;  %v589_v4 = vshll.u32 %v588_v21, 23 }
 0x180   :  { %v4268_v30 = vshrl.u32 %v676_v48, 30  ;;  %v509_v44 = vsel %vm502_vm14, %v505_v53, %v508_v43  ;;  %v600_v40 = vsel %vm4229_vm1, 0, %v598_v42  ;;  %v735_v38 = vshrl.u32 %v3502_v33, %v3865_v41 }
 0x181   :  { %v763_v6 = vsel %vm751_vm2, %v741_v15, %v744_v14  ;;  %v510_v45 = vsel %vm499_vm3, nan, %v509_v44  ;;  %v590_v35 = vor.u32 4788187, %v589_v4  ;;  %vm752_vm12 = vcmp.lt.s32.totalorder %v3825_v2, 2 }
 0x182   :  { %v678_v55 = vshll.u32 %v4268_v30, 30  ;;  %3028 = vmatmul.mubr.f32.gmra.mrb[4].mxu1 %v510_v45  ;;  %v756_v36 = vsel %vm754_vm9, %v744_v14, 2102212464  ;;  %v762_v16 = vsel %vm752_vm12, %v759_v50, %v761_v46  ;;  %v765_v41 = vsel %vm753_vm11, %v3989_v24, %v4146_v20 }
 0x183   :  { %v767_v28 = vshll.u32 %v727_v59, 8  ;;  %3030 = vmatprep.mubr.msk.f32.mxu1 %vm3495_vm0, %v5775_v19  ;;  %v591_v52 = vand.u32 2147483647, %v590_v35  ;;  %v593_v61 = vcvt.s32.f32 %v586_v58  ;;  %v766_v37 = vsel %vm752_vm12, %v763_v6, %v765_v41 }
 0x184   :  { %v679_v18 = vsub.s32 %v675_v29, %v678_v55  ;;  %v5780_v57 = vmov 1326507024   ;;  %v604_v13 = vadd.s32 3, %v600_v40  ;;  %v755_v24 = vsel %vm751_vm2, %v735_v38, %v738_v8 }
 0x185   :  { %v853_v7 = vshrl.u32 %v5780_v57, %v4010_v47  ;;  %v4296_v11 = vmul.u32.u64.low %v767_v28, %v766_v37  ;;  %v4297_v14 = vmul.u32.u64.high %v767_v28, %v766_v37, %v4296_v11  ;;  %v594_v56 = vmul.f32 %v593_v61, %v591_v52 }
 0x186   :  { %v681_v51 = vsub.s32 0, %v679_v18  ;;  %v757_v20 = vsel %vm753_vm11, %v741_v15, %v756_v36  ;;  %v849_v9 = vshll.u32 %v5773_v1, %v3983_v12  ;;  %v852_v0 = vshll.u32 %v5776_v39, %v3983_v12 }
 0x187   :  { %v4305_v42 = vmul.u32.u64.low %v767_v28, %v762_v16  ;;  %v4306_v29 = vmul.u32.u64.high %v767_v28, %v762_v16, %v4305_v42  ;;  %v595_v49 = vxor.u32 2147483648, %v594_v56  ;;  %vm858_vm9 = vcmp.lt.s32.totalorder %v3981_v27, 4 }
 0x188   :  { %v2818_v54 = vmin.u32 %v681_v51, %v679_v18  ;;  %v851_v5 = vor.u32 %v4205_v32, %v849_v9  ;;  %v758_v8 = vsel %vm752_vm12, %v755_v24, %v757_v20  ;;  %v854_v15 = vor.u32 %v853_v7, %v852_v0 }
 0x189   :  { %v596_v34 = vsel %vm513_vm5, %v595_v49, %v594_v56  ;;  %v4317_v21 = vand.u32 3, %v604_v13  ;;  %v671_v59 = vadd.s32 %v4209_v63, %v4194_v23  ;;  %vm776_vm4 = vc.u32 %v4297_v14, %v4305_v42 }
 0x18a   :  { %v683_v48 = vclz %v2818_v54  ;;  %v599_v43 = vsel %vm4229_vm1, %v3646_v60, %v596_v34  ;;  %v823_v2 = vand.u32 2147483647, %v3708_v62  ;;  %v774_v50 = vmul.u32 %v767_v28, %v758_v8 }
 0x18b   :  { %3346 = vcosq.f32 %v599_v43  ;;  %v777_v46 = vadd.s32 1, %v4306_v29  ;;  %v841_v53 = vshrl.u32 %v5772_v31, %v4010_v47  ;;  %v843_v3 = vshll.u32 %v5772_v31, %v3983_v12 }
 0x18c   :  { %v2819_v32 = vadd.s32 4294967294, %v683_v48  ;;  %3348 = vsinq.f32 %v599_v43  ;;  %v844_v23 = vshrl.u32 %v3501_v25, %v4010_v47  ;;  %v846_v58 = vshll.u32 %v3501_v25, %v3983_v12 }
 0x18d   :  { %v778_v63 = vsel %vm776_vm4, %v777_v46, %v4306_v29  ;;  %v847_v4 = vshrl.u32 %v5773_v1, %v4010_v47  ;;  %v830_v38 = vand.u32 8388607, %v823_v2  ;;  %v840_v6 = vshll.u32 %v3502_v33, %v3983_v12 }
 0x18e   :  { %vm2820_vm8 = vcmp.lt.s32.totalorder %v2819_v32, 0  ;;  %v779_v40 = vadd.s32 %v778_v63, %v774_v50  ;;  %v845_v55 = vor.u32 %v844_v23, %v843_v3  ;;  %v864_v16 = vsel %vm858_vm9, %v851_v5, 920167782 }
 0x18f   :  { %v686_v44 = vsel %vm2820_vm8, 0, %v2819_v32  ;;  %v848_v36 = vor.u32 %v847_v4, %v846_v58  ;;  %v868_v41 = vsel %vm858_vm9, %v854_v15, 1326507024  ;;  %vm606_vm10 = vcmp.lt.s32.totalorder %v4317_v21, 2 }
 0x190   :  { %v687_v45 = vsub.s32 32, %v686_v44  ;;  %v691_v35 = vsub.s32 4294967266, %v686_v44  ;;  %v780_v28 = vadd.s32 536870912, %v779_v40  ;;  %v688_v52 = vshll.u32 %v679_v18, %v686_v44 }
 0x191   :  { %v842_v7 = vor.u32 %v841_v53, %v840_v6  ;;  %vm603_vm7 = vweird.f32 %v3646_v60  ;;  %v831_v13 = vor.u32 8388608, %v830_v38  ;;  %vm855_vm5 = vcmp.lt.s32.totalorder %v3981_v27, 1 }
 0x192   :  { %v689_v61 = vshrl.u32 %v671_v59, %v687_v45  ;;  %v692_v37 = vadd.s32 127, %v691_v35  ;;  %v4349_v12 = vshrl.u32 %v780_v28, 30  ;;  %vm857_vm6 = vcmp.lt.s32.totalorder %v3981_v27, 3 }
 0x193   :  { %v867_v51 = vsel %vm855_vm5, %v845_v55, %v848_v36  ;;  %v869_v18 = vsel %vm857_vm6, %v851_v5, %v868_v41  ;;  %vm607_vm13 = vcmp.eq.s32.totalorder %v4317_v21, 0  ;;  %vm610_vm14 = vcmp.eq.s32.totalorder %v4317_v21, 2 }
 0x194   :  { %v690_v11 = vor.u32 %v689_v61, %v688_v52  ;;  %v693_v56 = vshll.u32 %v692_v37, 23  ;;  %v701_v24 = vsub.s32 4, %v4268_v30  ;;  %v782_v20 = vshll.u32 %v4349_v12, 30 }
 0x195   :  { %v3347_v9 = vpop.eup %3346  ;;  %vm856_vm1 = vcmp.lt.s32.totalorder %v3981_v27, 2  ;;  %v863_v0 = vsel %vm855_vm5, %v842_v7, %v845_v55  ;;  %v865_v49 = vsel %vm857_vm6, %v848_v36, %v864_v16  ;;  %v860_v15 = vsel %vm858_vm9, %v848_v36, 2102212464 }
 0x196   :  { %v694_v29 = vor.u32 4788187, %v693_v56  ;;  %v3349_v54 = vpop.eup %3348  ;;  %v611_v5 = vxor.u32 2147483648, %v3347_v9  ;;  %v783_v8 = vsub.s32 %v779_v40, %v782_v20  ;;  %v870_v34 = vsel %vm856_vm1, %v867_v51, %v869_v18 }
 0x197   :  { %v608_v48 = vxor.u32 2147483648, %v3349_v54  ;;  %v697_v59 = vcvt.s32.f32 %v690_v11  ;;  %v871_v32 = vshll.u32 %v831_v13, 8  ;;  %v839_v53 = vshrl.u32 %v3502_v33, %v4010_v47 }
 0x198   :  { %v695_v43 = vand.u32 2147483647, %v694_v29  ;;  %v612_v50 = vsel %vm610_vm14, %v611_v5, %v3349_v54  ;;  %v785_v46 = vsub.s32 0, %v783_v8  ;;  %v866_v3 = vsel %vm856_vm1, %v863_v0, %v865_v49 }
 0x199   :  { %v609_v23 = vsel %vm607_vm13, %v3347_v9, %v608_v48  ;;  %v4378_v58 = vmul.u32.u64.low %v871_v32, %v870_v34  ;;  %v4379_v4 = vmul.u32.u64.high %v871_v32, %v870_v34, %v4378_v58  ;;  %v859_v38 = vsel %vm855_vm5, %v839_v53, %v842_v7 }
 0x19a   :  { %v698_v63 = vmul.f32 %v697_v59, %v695_v43  ;;  %v613_v44 = vsel %vm606_vm10, %v609_v23, %v612_v50  ;;  %v2822_v40 = vmin.u32 %v785_v46, %v783_v8  ;;  %v861_v47 = vsel %vm857_vm6, %v845_v55, %v860_v15 }
 0x19b   :  { %v614_v6 = vsel %vm603_vm7, nan, %v613_v44  ;;  %v4389_v35 = vmul.u32.u64.low %v871_v32, %v866_v3  ;;  %v4390_v36 = vmul.u32.u64.high %v871_v32, %v866_v3, %v4389_v35  ;;  %vm617_vm3 = vcmp.lt.s32.totalorder %v3652_v10, 0 }
 0x19c   :  { %v699_v45 = vxor.u32 2147483648, %v698_v63  ;;  %3031 = vmatmul.mubr.f32.gmra.mrb[6].mxu1 %v614_v6  ;;  %v787_v21 = vclz %v2822_v40  ;;  %vm4398_vm15 = vcmp.le.f32.partialorder %v615_v17, 0.7853982  ;;  %v702_v55 = vsel %vm617_vm3, %v701_v24, %v4268_v30 }
 0x19d   :  { %3033 = vmatprep.mubr.msk.f32.mxu1 %vm3495_vm0, %v5775_v19  ;;  %v862_v41 = vsel %vm856_vm1, %v859_v38, %v861_v47  ;;  %vm880_vm2 = vc.u32 %v4379_v4, %v4389_v35  ;;  %v881_v17 = vadd.s32 1, %v4390_v36  ;;  %v704_v61 = vsel %vm4398_vm15, 0, %v702_v55 }
 0x19e   :  { %v700_v60 = vsel %vm617_vm3, %v699_v45, %v698_v63  ;;  %v2823_v52 = vadd.s32 4294967294, %v787_v21  ;;  %v878_v30 = vmul.u32 %v871_v32, %v862_v41  ;;  %v775_v7 = vadd.s32 %v4305_v42, %v4297_v14 }
 0x19f   :  { %v703_v28 = vsel %vm4398_vm15, %v3652_v10, %v700_v60  ;;  %v882_v27 = vsel %vm880_vm2, %v881_v17, %v4390_v36  ;;  %v708_v51 = vadd.s32 3, %v704_v61  ;;  %v805_v46 = vsub.s32 4, %v4349_v12 }
 0x1a0   :  { %3350 = vcosq.f32 %v703_v28  ;;  %vm2824_vm11 = vcmp.lt.s32.totalorder %v2823_v52, 0  ;;  %v883_v56 = vadd.s32 %v882_v27, %v878_v30  ;;  %vm707_vm8 = vweird.f32 %v3652_v10 }
 0x1a1   :  { %3352 = vsinq.f32 %v703_v28  ;;  %v790_v37 = vsel %vm2824_vm11, 0, %v2823_v52  ;;  %v709_v54 = vand.u32 3, %v708_v51  ;;  %vm721_vm10 = vcmp.lt.s32.totalorder %v3665_v26, 0 }
 0x1a2   :  { %v791_v13 = vsub.s32 32, %v790_v37  ;;  %v795_v11 = vsub.s32 4294967266, %v790_v37  ;;  %v792_v18 = vshll.u32 %v783_v8, %v790_v37  ;;  %v884_v9 = vadd.s32 536870912, %v883_v56 }
 0x1a3   :  { %vm711_vm12 = vcmp.eq.s32.totalorder %v709_v54, 0  ;;  %vm714_vm9 = vcmp.eq.s32.totalorder %v709_v54, 2  ;;  %vm710_vm4 = vcmp.lt.s32.totalorder %v709_v54, 2  ;;  %vm720_vm7 = vcmp.le.f32.partialorder %v719_v22, 0.7853982 }
 0x1a4   :  { %v793_v24 = vshrl.u32 %v775_v7, %v791_v13  ;;  %v796_v20 = vadd.s32 127, %v795_v11  ;;  %v4416_v49 = vshrl.u32 %v884_v9, 30  ;;  %v806_v38 = vsel %vm721_vm10, %v805_v46, %v4349_v12 }
 0x1a5   :  { %v808_v45 = vsel %vm720_vm7, 0, %v806_v38  ;;  %v879_v16 = vadd.s32 %v4389_v35, %v4379_v4  ;;  %vm811_vm1 = vweird.f32 %v3665_v26  ;;  %vm825_vm3 = vcmp.lt.s32.totalorder %v3708_v62, 0 }
 0x1a6   :  { %v794_v29 = vor.u32 %v793_v24, %v792_v18  ;;  %v797_v0 = vshll.u32 %v796_v20, 23  ;;  %v886_v15 = vshll.u32 %v4416_v49, 30  ;;  %v812_v21 = vadd.s32 3, %v808_v45 }
 0x1a7   :  { %v909_v51 = vsub.s32 4, %v4416_v49  ;;  %vm824_vm15 = vcmp.le.f32.partialorder %v823_v2, 0.7853982 }
 0x1a8   :  { %v798_v5 = vor.u32 4788187, %v797_v0  ;;  %v801_v42 = vcvt.s32.f32 %v794_v29  ;;  %v887_v59 = vsub.s32 %v883_v56, %v886_v15  ;;  %v813_v28 = vand.u32 3, %v812_v21 }
 0x1a9   :  { %v910_v29 = vsel %vm825_vm3, %v909_v51, %v4416_v49 }
 0x1aa   :  { %v3351_v34 = vpop.eup %3350  ;;  %v799_v14 = vand.u32 2147483647, %v798_v5  ;;  %v889_v53 = vsub.s32 0, %v887_v59  ;;  %vm818_vm6 = vcmp.eq.s32.totalorder %v813_v28, 2  ;;  %vm815_vm13 = vcmp.eq.s32.totalorder %v813_v28, 0 }
 0x1ab   :  { %v3353_v48 = vpop.eup %3352  ;;  %v715_v43 = vxor.u32 2147483648, %v3351_v34  ;;  %vm814_vm14 = vcmp.lt.s32.totalorder %v813_v28, 2  ;;  %v912_v54 = vsel %vm824_vm15, 0, %v910_v29 }
 0x1ac   :  { %v712_v32 = vxor.u32 2147483648, %v3353_v48  ;;  %v802_v50 = vmul.f32 %v801_v42, %v799_v14  ;;  %v2826_v58 = vmin.u32 %v889_v53, %v887_v59  ;;  %v1786_v53 = vld [vmem:[#allocation2 + $0x80] sm:$0xff] }
 0x1ad   :  { %v716_v8 = vsel %vm714_vm9, %v715_v43, %v3353_v48  ;;  %vm915_vm9 = vweird.f32 %v3708_v62 }
 0x1ae   :  { %v713_v3 = vsel %vm711_vm12, %v3351_v34, %v712_v32  ;;  %v803_v63 = vxor.u32 2147483648, %v802_v50  ;;  %v891_v47 = vclz %v2826_v58 }
 0x1af   :  { %v717_v23 = vsel %vm710_vm4, %v713_v3, %v716_v8  ;;  %v1787_v3 = vld [vmem:[#allocation2 + $0x88] sm:$0xff] }
 0x1b0   :  { %v718_v44 = vsel %vm707_vm8, nan, %v717_v23  ;;  %v804_v40 = vsel %vm721_vm10, %v803_v63, %v802_v50  ;;  %v2827_v10 = vadd.s32 4294967294, %v891_v47  ;;  %v3173_v58 = vpack.c.bf16 %v1787_v3, %v1786_v53 }
 0x1b1   :  { %3034 = vmatmul.mubr.f32.gmra.mrb[8].mxu1 %v718_v44  ;;  %v807_v6 = vsel %vm720_vm7, %v3665_v26, %v804_v40  ;;  %v916_v26 = vadd.s32 3, %v912_v54  ;;  %v1789_v44 = vld [vmem:[#allocation2 + $0x98] sm:$0xff]  ;;  %v5783_v47 = vmov 0.0|0.0  }
 0x1b2   :  { %3036 = vmatprep.mubr.msk.f32.mxu1 %vm3495_vm0, %v5775_v19  ;;  %3354 = vcosq.f32 %v807_v6  ;;  %vm2828_vm5 = vcmp.lt.s32.totalorder %v2827_v10, 0  ;;  %3174 = vmatpush3.bf16.msra.mxu0 %v3173_v58 }
 0x1b3   :  { %3356 = vsinq.f32 %v807_v6  ;;  %v894_v36 = vsel %vm2828_vm5, 0, %v2827_v10  ;;  %v917_v5 = vand.u32 3, %v916_v26  ;;  %3175 = vmatprep.subr.bf16.mxu0 %v5783_v47  ;;  %v1790_v6 = vld [vmem:[#allocation2 + $0xa0] sm:$0xff]  ;;  %v1791_v10 = vld [vmem:[#allocation2 + $0xa8] sm:$0xff] }
 0x1b4   :  { %v895_v22 = vsub.s32 32, %v894_v36  ;;  %v899_v60 = vsub.s32 4294967266, %v894_v36  ;;  %v896_v55 = vshll.u32 %v887_v59, %v894_v36  ;;  %v4445_v59 = vld [vmem:[%s5747_s4] ss:$0 sm:$0xff] }
 0x1b5   :  { %vm922_vm2 = vcmp.eq.s32.totalorder %v917_v5, 2  ;;  %vm919_vm11 = vcmp.eq.s32.totalorder %v917_v5, 0  ;;  %vm918_vm12 = vcmp.lt.s32.totalorder %v917_v5, 2 }
 0x1b6   :  { %v897_v12 = vshrl.u32 %v879_v16, %v895_v22  ;;  %v900_v41 = vadd.s32 127, %v899_v60  ;;  %v3179_v22 = vpack.c.bf16 %v1791_v10, %v1790_v6 }
 0x1b8   :  { %v898_v52 = vor.u32 %v897_v12, %v896_v55  ;;  %v901_v17 = vshll.u32 %v900_v41, 23  ;;  %v1792_v12 = vld [vmem:[#allocation2 + $0xb0] sm:$0xff]  ;;  %v1793_v41 = vld [vmem:[#allocation2 + $0xb8] sm:$0xff] }
 0x1ba   :  { %v902_v30 = vor.u32 4788187, %v901_v17  ;;  %v905_v11 = vcvt.s32.f32 %v898_v52  ;;  %v1794_v52 = vld [vmem:[#allocation2 + $0xc0] sm:$0xff]  ;;  %v1795_v17 = vld [vmem:[#allocation2 + $0xc8] sm:$0xff] }
 0x1bc   :  { %v3355_v61 = vpop.eup %3354  ;;  %v903_v13 = vand.u32 2147483647, %v902_v30 }
 0x1bd   :  { %v3357_v37 = vpop.eup %3356  ;;  %v819_v27 = vxor.u32 2147483648, %v3355_v61 }
 0x1be   :  { %v816_v7 = vxor.u32 2147483648, %v3357_v37  ;;  %v906_v35 = vmul.f32 %v905_v11, %v903_v13  ;;  %v3182_v13 = vpack.c.bf16 %v1793_v41, %v1792_v12 }
 0x1bf   :  { %v820_v56 = vsel %vm818_vm6, %v819_v27, %v3357_v37  ;;  %v1796_v37 = vld [vmem:[#allocation2 + $0xd0] sm:$0xff]  ;;  %v1797_v27 = vld [vmem:[#allocation2 + $0xd8] sm:$0xff] }
 0x1c0   :  { %v817_v4 = vsel %vm815_vm13, %v3355_v61, %v816_v7  ;;  %v907_v20 = vxor.u32 2147483648, %v906_v35 }
 0x1c1   :  { %v821_v18 = vsel %vm814_vm14, %v817_v4, %v820_v56  ;;  %v3185_v56 = vpack.c.bf16 %v1795_v17, %v1794_v52 }
 0x1c2   :  { %v822_v24 = vsel %vm811_vm1, nan, %v821_v18  ;;  %v908_v9 = vsel %vm825_vm3, %v907_v20, %v906_v35  ;;  %v3188_v18 = vpack.c.bf16 %v1797_v27, %v1796_v37  ;;  %v1801_v37 = vld [vmem:[#allocation2 + $0xf8] sm:$0xff] }
 0x1c3   :  { %3037 = vmatmul.mubr.f32.gmra.mrb[10].mxu1 %v822_v24  ;;  %v911_v0 = vsel %vm824_vm15, %v3708_v62, %v908_v9  ;;  %v1788_v62 = vld [vmem:[#allocation2 + $0x90] sm:$0xff] }
 0x1c4   :  { %3039 = vmatprep.mubr.msk.f32.mxu1 %vm3495_vm0, %v5775_v19  ;;  %3358 = vcosq.f32 %v911_v0  ;;  %v3176_v38 = vpack.c.bf16 %v1789_v44, %v1788_v62 }
 0x1c5   :  { %3360 = vsinq.f32 %v911_v0 }
 0x1c6   :  { %3177 = vmatpush3.bf16.msra.mxu0 %v3176_v38 }
 0x1c7   :  { %3178 = vmatprep.subr.bf16.mxu0 %v5783_v47 }
 0x1ca   :  { %3180 = vmatpush3.bf16.msra.mxu0 %v3179_v22 }
 0x1cb   :  { %3181 = vmatprep.subr.bf16.mxu0 %v5783_v47 }
 0x1ce   :  { %v3359_v15 = vpop.eup %3358  ;;  %3183 = vmatpush3.bf16.msra.mxu0 %v3182_v13 }
 0x1cf   :  { %v3361_v34 = vpop.eup %3360  ;;  %v923_v48 = vxor.u32 2147483648, %v3359_v15  ;;  %3184 = vmatprep.subr.bf16.mxu0 %v5783_v47 }
 0x1d0   :  { %v920_v43 = vxor.u32 2147483648, %v3361_v34 }
 0x1d1   :  { %v924_v14 = vsel %vm922_vm2, %v923_v48, %v3361_v34 }
 0x1d2   :  { %v921_v42 = vsel %vm919_vm11, %v3359_v15, %v920_v43  ;;  %3186 = vmatpush3.bf16.msra.mxu0 %v3185_v56 }
 0x1d3   :  { %v925_v2 = vsel %vm918_vm12, %v921_v42, %v924_v14  ;;  %3187 = vmatprep.subr.bf16.mxu0 %v5783_v47 }
 0x1d4   :  { %v926_v49 = vsel %vm915_vm9, nan, %v925_v2  ;;  %v1798_v2 = vld [vmem:[#allocation2 + $0xe0] sm:$0xff] }
 0x1d5   :  { %3040 = vmatmul.mubr.f32.gmra.mrb[12].mxu1 %v926_v49  ;;  %v1799_v49 = vld [vmem:[#allocation2 + $0xe8] sm:$0xff] }
 0x1d6   :  { %3136 = vmatprep.mubr.msk.f32.mxu1 %vm3495_vm0, %v5775_v19  ;;  %v3191_v38 = vpack.c.bf16 %v1799_v49, %v1798_v2  ;;  %3189 = vmatpush3.bf16.msra.mxu0 %v3188_v18 }
 0x1d7   :  { %3190 = vmatprep.subr.bf16.mxu0 %v5783_v47 }
 0x1da   :  { %3192 = vmatpush3.bf16.msra.mxu0 %v3191_v38 }
 0x1db   :  { %3193 = vmatprep.subr.bf16.mxu0 %v5783_v47 }
 0x23a   :  { %v1016_v32 = vpop.f32.mrb[0].mxu1 }
 0x23b   :  { %v1017_v8 = vadd.f32 %v4445_v59, %v1016_v32  ;;  %v3023_v50 = vpop.f32.mrb[1].mxu1 }
 0x23d   :  { %v4448_v46 = vmul.f32 30.0, %v1017_v8 }
 0x23f   :  { %v1057_v23 = vand.u32 2147483647, %v4448_v46  ;;  %v1060_v63 = vand.u32 2139095040, %v4448_v46  ;;  %vm1059_vm11 = vcmp.lt.s32.totalorder %v4448_v46, 0 }
 0x241   :  { %v1061_v40 = vshrl.u32 %v1060_v63, 23  ;;  %v1064_v36 = vand.u32 8388607, %v1057_v23  ;;  %vm4534_vm12 = vcmp.le.f32.partialorder %v1057_v23, 0.7853982 }
 0x243   :  { %v2830_v45 = vadd.s32 4294967169, %v1061_v40  ;;  %v1065_v28 = vor.u32 8388608, %v1064_v36 }
 0x245   :  { %v1067_v21 = vadd.s32 1, %v2830_v45  ;;  %v4460_v35 = vshll.u32 %v1065_v28, 8 }
 0x247   :  { %v1021_v16 = vpop.f32.mrb[2].mxu1  ;;  %vm1068_vm4 = vcmp.gt.s32.totalorder %v1067_v21, 0 }
 0x248   :  { %v1022_v60 = vadd.f32 %v4445_v59, %v1021_v16  ;;  %v3026_v55 = vpop.f32.mrb[3].mxu1  ;;  %v1069_v61 = vsel %vm1068_vm4, %v1067_v21, 0 }
 0x249   :  { %v1071_v7 = vand.u32 31, %v1069_v61  ;;  %v1070_v11 = vshrl.u32 %v1069_v61, 5  ;;  %v1800_v61 = vld [vmem:[#allocation2 + $0xf0] sm:$0xff] }
 0x24a   :  { %v4457_v30 = vmul.f32 30.0, %v1022_v60  ;;  %v3194_v18 = vpack.c.bf16 %v1801_v37, %v1800_v61 }
 0x24b   :  { %v1072_v4 = vsub.s32 32, %v1071_v7  ;;  %v1074_v24 = vshll.u32 %v3502_v33, %v1071_v7  ;;  %v1077_v20 = vshll.u32 %v5772_v31, %v1071_v7  ;;  %v1080_v9 = vshll.u32 %v3501_v25, %v1071_v7 }
 0x24c   :  { %v1164_v51 = vand.u32 2139095040, %v4457_v30  ;;  %v1083_v29 = vshll.u32 %v5773_v1, %v1071_v7  ;;  %v1086_v5 = vshll.u32 %v5776_v39, %v1071_v7  ;;  %vm1089_vm8 = vcmp.lt.s32.totalorder %v1070_v11, 1  ;;  %3195 = vmatpush3.bf16.msra.mxu0 %v3194_v18 }
 0x24d   :  { %v1075_v0 = vshrl.u32 %v5772_v31, %v1072_v4  ;;  %v1078_v54 = vshrl.u32 %v3501_v25, %v1072_v4  ;;  %v1081_v26 = vshrl.u32 %v5773_v1, %v1072_v4  ;;  %v1084_v15 = vshrl.u32 %v5776_v39, %v1072_v4  ;;  %3196 = vmatprep.subr.bf16.mxu0 %v5783_v47 }
 0x24e   :  { %v1087_v34 = vshrl.u32 %v5780_v57, %v1072_v4  ;;  %vm1090_vm10 = vcmp.lt.s32.totalorder %v1070_v11, 2  ;;  %v1165_v42 = vshrl.u32 %v1164_v51, 23  ;;  %v1073_v32 = vshrl.u32 %v3502_v33, %v1072_v4 }
 0x24f   :  { %v1076_v48 = vor.u32 %v1075_v0, %v1074_v24  ;;  %v1079_v43 = vor.u32 %v1078_v54, %v1077_v20  ;;  %v1082_v14 = vor.u32 %v1081_v26, %v1080_v9  ;;  %v1085_v8 = vor.u32 %v1084_v15, %v1083_v29 }
 0x250   :  { %v1088_v50 = vor.u32 %v1087_v34, %v1086_v5  ;;  %vm1092_vm7 = vcmp.lt.s32.totalorder %v1070_v11, 4  ;;  %vm1091_vm5 = vcmp.lt.s32.totalorder %v1070_v11, 3  ;;  %v2834_v44 = vadd.s32 4294967169, %v1165_v42 }
 0x251   :  { %v1094_v53 = vsel %vm1092_vm7, %v1082_v14, 2102212464  ;;  %v1097_v3 = vsel %vm1089_vm8, %v1076_v48, %v1079_v43  ;;  %v1101_v62 = vsel %vm1089_vm8, %v1079_v43, %v1082_v14  ;;  %v1098_v63 = vsel %vm1092_vm7, %v1085_v8, 920167782 }
 0x252   :  { %v1102_v58 = vsel %vm1092_vm7, %v1088_v50, 1326507024  ;;  %v1093_v6 = vsel %vm1089_vm8, %v1073_v32, %v1076_v48  ;;  %v1099_v10 = vsel %vm1091_vm5, %v1082_v14, %v1098_v63  ;;  %v1095_v16 = vsel %vm1091_vm5, %v1079_v43, %v1094_v53 }
 0x253   :  { %v1103_v45 = vsel %vm1091_vm5, %v1085_v8, %v1102_v58  ;;  %v1100_v22 = vsel %vm1090_vm10, %v1097_v3, %v1099_v10  ;;  %v1171_v55 = vadd.s32 1, %v2834_v44  ;;  %v1161_v27 = vand.u32 2147483647, %v4457_v30 }
 0x254   :  { %v1104_v60 = vsel %vm1090_vm10, %v1101_v62, %v1103_v45  ;;  %v4490_v28 = vmul.u32.u64.low %v4460_v35, %v1100_v22  ;;  %v4491_v52 = vmul.u32.u64.high %v4460_v35, %v1100_v22, %v4490_v28  ;;  %v1096_v7 = vsel %vm1090_vm10, %v1093_v6, %v1095_v16 }
 0x255   :  { %v1026_v40 = vpop.f32.mrb[4].mxu1  ;;  %v4486_v12 = vmul.u32.u64.low %v4460_v35, %v1104_v60  ;;  %v4487_v41 = vmul.u32.u64.high %v4460_v35, %v1104_v60, %v4486_v12  ;;  %vm1172_vm6 = vcmp.gt.s32.totalorder %v1171_v55, 0  ;;  %v1112_v24 = vmul.u32 %v4460_v35, %v1096_v7 }
 0x256   :  { %v1027_v36 = vadd.f32 %v4445_v59, %v1026_v40  ;;  %v3029_v21 = vpop.f32.mrb[5].mxu1  ;;  %v1173_v13 = vsel %vm1172_vm6, %v1171_v55, 0  ;;  %v1115_v51 = vadd.s32 1, %v4491_v52  ;;  %v1168_v11 = vand.u32 8388607, %v1161_v27 }
 0x257   :  { %v1175_v56 = vand.u32 31, %v1173_v13  ;;  %vm1114_vm13 = vc.u32 %v4487_v41, %v4490_v28  ;;  %v1174_v20 = vshrl.u32 %v1173_v13, 5  ;;  %vm1163_vm6 = vcmp.lt.s32.totalorder %v4457_v30, 0 }
 0x258   :  { %v4494_v17 = vmul.f32 30.0, %v1027_v36  ;;  %v1116_v29 = vsel %vm1114_vm13, %v1115_v51, %v4491_v52  ;;  %v1169_v40 = vor.u32 8388608, %v1168_v11 }
 0x259   :  { %v1176_v9 = vsub.s32 32, %v1175_v56  ;;  %v1187_v0 = vshll.u32 %v5773_v1, %v1175_v56  ;;  %v1190_v54 = vshll.u32 %v5776_v39, %v1175_v56  ;;  %v1117_v5 = vadd.s32 %v1116_v29, %v1112_v24 }
 0x25a   :  { %v1268_v4 = vand.u32 2139095040, %v4494_v17  ;;  %v1178_v35 = vshll.u32 %v3502_v33, %v1175_v56  ;;  %v1181_v14 = vshll.u32 %v5772_v31, %v1175_v56  ;;  %v1184_v32 = vshll.u32 %v3501_v25, %v1175_v56 }
 0x25b   :  { %v1188_v15 = vshrl.u32 %v5776_v39, %v1176_v9  ;;  %v1191_v34 = vshrl.u32 %v5780_v57, %v1176_v9  ;;  %v1179_v43 = vshrl.u32 %v5772_v31, %v1176_v9  ;;  %v1182_v42 = vshrl.u32 %v3501_v25, %v1176_v9 }
 0x25c   :  { %v1269_v26 = vshrl.u32 %v1268_v4, 23  ;;  %v1118_v2 = vadd.s32 536870912, %v1117_v5  ;;  %v1185_v8 = vshrl.u32 %v5773_v1, %v1176_v9  ;;  %vm1196_vm14 = vcmp.lt.s32.totalorder %v1174_v20, 4 }
 0x25d   :  { %v1189_v49 = vor.u32 %v1188_v15, %v1187_v0  ;;  %v1180_v53 = vor.u32 %v1179_v43, %v1178_v35  ;;  %v1183_v3 = vor.u32 %v1182_v42, %v1181_v14  ;;  %v1192_v63 = vor.u32 %v1191_v34, %v1190_v54 }
 0x25e   :  { %v2838_v48 = vadd.s32 4294967169, %v1269_v26  ;;  %v1119_v62 = vshrl.u32 %v1118_v2, 30  ;;  %v1186_v58 = vor.u32 %v1185_v8, %v1184_v32  ;;  %vm1193_vm1 = vcmp.lt.s32.totalorder %v1174_v20, 1 }
 0x25f   :  { %v1202_v44 = vsel %vm1196_vm14, %v1189_v49, 920167782  ;;  %vm1195_vm15 = vcmp.lt.s32.totalorder %v1174_v20, 3  ;;  %v1201_v6 = vsel %vm1193_vm1, %v1180_v53, %v1183_v3  ;;  %v1206_v45 = vsel %vm1196_vm14, %v1192_v63, 1326507024 }
 0x260   :  { %v1275_v50 = vadd.s32 1, %v2838_v48  ;;  %v1120_v38 = vshll.u32 %v1119_v62, 30  ;;  %v1198_v36 = vsel %vm1196_vm14, %v1186_v58, 2102212464  ;;  %v1203_v21 = vsel %vm1195_vm15, %v1186_v58, %v1202_v44 }
 0x261   :  { %v1177_v16 = vshrl.u32 %v3502_v33, %v1176_v9  ;;  %vm1194_vm2 = vcmp.lt.s32.totalorder %v1174_v20, 2  ;;  %v1209_v22 = vshll.u32 %v1169_v40, 8  ;;  %v1205_v52 = vsel %vm1193_vm1, %v1183_v3, %v1186_v58 }
 0x262   :  { %vm1276_vm3 = vcmp.gt.s32.totalorder %v1275_v50, 0  ;;  %v1121_v10 = vsub.s32 %v1117_v5, %v1120_v38  ;;  %v1204_v12 = vsel %vm1194_vm2, %v1201_v6, %v1203_v21  ;;  %v1199_v37 = vsel %vm1195_vm15, %v1183_v3, %v1198_v36 }
 0x263   :  { %v1277_v55 = vsel %vm1276_vm3, %v1275_v50, 0  ;;  %v1197_v61 = vsel %vm1193_vm1, %v1177_v16, %v1180_v53  ;;  %v1207_v7 = vsel %vm1195_vm15, %v1189_v49, %v1206_v45  ;;  %v1143_v48 = vsub.s32 4, %v1119_v62 }
 0x264   :  { %v1123_v60 = vsub.s32 0, %v1121_v10  ;;  %v1208_v56 = vsel %vm1194_vm2, %v1205_v52, %v1207_v7  ;;  %v4522_v4 = vmul.u32.u64.low %v1209_v22, %v1204_v12  ;;  %v4523_v51 = vmul.u32.u64.high %v1209_v22, %v1204_v12, %v4522_v4 }
 0x265   :  { %v1279_v18 = vand.u32 31, %v1277_v55  ;;  %v4526_v9 = vmul.u32.u64.low %v1209_v22, %v1208_v56  ;;  %v4527_v11 = vmul.u32.u64.high %v1209_v22, %v1208_v56, %v4526_v9  ;;  %v1200_v29 = vsel %vm1194_vm2, %v1197_v61, %v1199_v37 }
 0x266   :  { %v2831_v13 = vmin.u32 %v1123_v60, %v1121_v10  ;;  %v1219_v26 = vadd.s32 1, %v4523_v51  ;;  %v1113_v20 = vadd.s32 %v4490_v28, %v4487_v41  ;;  %v1216_v43 = vmul.u32 %v1209_v22, %v1200_v29 }
 0x267   :  { %v4538_v15 = vsub.s32 32, %v1279_v18  ;;  %vm1218_vm4 = vc.u32 %v4527_v11, %v4522_v4  ;;  %v1265_v2 = vand.u32 2147483647, %v4494_v17  ;;  %v4549_v8 = vshrl.u32 %v1277_v55, 5 }
 0x268   :  { %v1125_v24 = vclz %v2831_v13  ;;  %v1220_v23 = vsel %vm1218_vm4, %v1219_v26, %v4523_v51  ;;  %v1144_v3 = vsel %vm1059_vm11, %v1143_v48, %v1119_v62  ;;  %v1291_v38 = vshll.u32 %v5773_v1, %v1279_v18 }
 0x269   :  { %v1221_v50 = vadd.s32 %v1220_v23, %v1216_v43  ;;  %v1292_v41 = vshrl.u32 %v5776_v39, %v4538_v15  ;;  %v1295_v28 = vshrl.u32 %v5780_v57, %v4538_v15  ;;  %v1294_v6 = vshll.u32 %v5776_v39, %v1279_v18 }
 0x26a   :  { %v2832_v0 = vadd.s32 4294967294, %v1125_v24  ;;  %v1286_v36 = vshrl.u32 %v3501_v25, %v4538_v15  ;;  %v1289_v60 = vshrl.u32 %v5773_v1, %v4538_v15  ;;  %v1146_v55 = vsel %vm4534_vm12, 0, %v1144_v3 }
 0x26b   :  { %v1222_v40 = vadd.s32 536870912, %v1221_v50  ;;  %v1296_v62 = vor.u32 %v1295_v28, %v1294_v6  ;;  %v1285_v12 = vshll.u32 %v5772_v31, %v1279_v18  ;;  %v1293_v61 = vor.u32 %v1292_v41, %v1291_v38 }
 0x26c   :  { %vm2833_vm9 = vcmp.lt.s32.totalorder %v2832_v0, 0  ;;  %v1288_v7 = vshll.u32 %v3501_v25, %v1279_v18  ;;  %vm1300_vm8 = vcmp.lt.s32.totalorder %v4549_v8, 4  ;;  %v1272_v13 = vand.u32 8388607, %v1265_v2 }
 0x26d   :  { %v1128_v14 = vsel %vm2833_vm9, 0, %v2832_v0  ;;  %v4562_v22 = vshrl.u32 %v1222_v40, 30  ;;  %v1283_v56 = vshrl.u32 %v5772_v31, %v4538_v15  ;;  %v1287_v51 = vor.u32 %v1286_v36, %v1285_v12 }
 0x26e   :  { %v1129_v49 = vsub.s32 32, %v1128_v14  ;;  %v1133_v32 = vsub.s32 4294967266, %v1128_v14  ;;  %v1130_v63 = vshll.u32 %v1121_v10, %v1128_v14  ;;  %v1290_v0 = vor.u32 %v1289_v60, %v1288_v7 }
 0x26f   :  { %v1031_v54 = vpop.f32.mrb[6].mxu1  ;;  %v1224_v37 = vshll.u32 %v4562_v22, 30  ;;  %v1273_v14 = vor.u32 8388608, %v1272_v13  ;;  %vm1297_vm10 = vcmp.lt.s32.totalorder %v4549_v8, 1  ;;  %vm1299_vm7 = vcmp.lt.s32.totalorder %v4549_v8, 3 }
 0x270   :  { %v1032_v34 = vadd.f32 %v4445_v59, %v1031_v54  ;;  %v3032_v35 = vpop.f32.mrb[7].mxu1  ;;  %v1131_v58 = vshrl.u32 %v1113_v20, %v1129_v49  ;;  %v1134_v44 = vadd.s32 127, %v1133_v32  ;;  %v1310_v54 = vsel %vm1300_vm8, %v1296_v62, 1326507024 }
 0x271   :  { %v4576_v29 = vsub.s32 %v1221_v50, %v1224_v37  ;;  %v1282_v35 = vshll.u32 %v3502_v33, %v1279_v18  ;;  %v1306_v20 = vsel %vm1300_vm8, %v1293_v61, 920167782  ;;  %v1309_v50 = vsel %vm1297_vm10, %v1287_v51, %v1290_v0 }
 0x272   :  { %v4545_v42 = vmul.f32 30.0, %v1032_v34  ;;  %v1132_v21 = vor.u32 %v1131_v58, %v1130_v63  ;;  %v1135_v16 = vshll.u32 %v1134_v44, 23  ;;  %v1150_v34 = vadd.s32 3, %v1146_v55 }
 0x273   :  { %v1227_v43 = vsub.s32 0, %v4576_v29  ;;  %v1284_v23 = vor.u32 %v1283_v56, %v1282_v35  ;;  %v1311_v18 = vsel %vm1299_vm7, %v1293_v61, %v1310_v54  ;;  %v1281_v28 = vshrl.u32 %v3502_v33, %v4538_v15 }
 0x274   :  { %v1372_v53 = vand.u32 2139095040, %v4545_v42  ;;  %v1136_v52 = vor.u32 4788187, %v1135_v16  ;;  %v1139_v9 = vcvt.s32.f32 %v1132_v21  ;;  %v4591_v41 = vand.u32 3, %v1150_v34 }
 0x275   :  { %v2835_v32 = vmin.u32 %v1227_v43, %v4576_v29  ;;  %v1247_v63 = vsub.s32 4, %v4562_v22  ;;  %vm1298_vm13 = vcmp.lt.s32.totalorder %v4549_v8, 2  ;;  %v1305_v44 = vsel %vm1297_vm10, %v1284_v23, %v1287_v51 }
 0x276   :  { %v1373_v45 = vshrl.u32 %v1372_v53, 23  ;;  %v1137_v24 = vand.u32 2147483647, %v1136_v52  ;;  %v1307_v40 = vsel %vm1299_vm7, %v1290_v0, %v1306_v20  ;;  %v1312_v15 = vsel %vm1298_vm13, %v1309_v50, %v1311_v18 }
 0x277   :  { %v1229_v3 = vclz %v2835_v32  ;;  %v1313_v36 = vshll.u32 %v1273_v14, 8  ;;  %v1217_v5 = vadd.s32 %v4522_v4, %v4527_v11  ;;  %v1302_v60 = vsel %vm1300_vm8, %v1290_v0, 2102212464 }
 0x278   :  { %v2842_v10 = vadd.s32 4294967169, %v1373_v45  ;;  %v1140_v48 = vmul.f32 %v1139_v9, %v1137_v24  ;;  %v1308_v62 = vsel %vm1298_vm13, %v1305_v44, %v1307_v40  ;;  %v1301_v37 = vsel %vm1297_vm10, %v1281_v28, %v1284_v23 }
 0x279   :  { %v2836_v45 = vadd.s32 4294967294, %v1229_v3  ;;  %v1248_v11 = vsel %vm1163_vm6, %v1247_v63, %v4562_v22  ;;  %v1303_v13 = vsel %vm1299_vm7, %v1287_v51, %v1302_v60  ;;  %vm4637_vm1 = vcmp.le.f32.partialorder %v1161_v27, 0.7853982 }
 0x27a   :  { %v1379_v26 = vadd.s32 1, %v2842_v10  ;;  %v1141_v49 = vxor.u32 2147483648, %v1140_v48  ;;  %v4616_v10 = vmul.u32.u64.low %v1313_v36, %v1312_v15  ;;  %v4617_v55 = vmul.u32.u64.high %v1313_v36, %v1312_v15, %v4616_v10 }
 0x27b   :  { %vm2837_vm14 = vcmp.lt.s32.totalorder %v2836_v45, 0  ;;  %v4631_v24 = vmul.u32.u64.low %v1313_v36, %v1308_v62  ;;  %v4632_v9 = vmul.u32.u64.high %v1313_v36, %v1308_v62, %v4631_v24  ;;  %vm1149_vm3 = vweird.f32 %v4448_v46 }
 0x27c   :  { %vm1380_vm5 = vcmp.gt.s32.totalorder %v1379_v26, 0  ;;  %v1142_v53 = vsel %vm1059_vm11, %v1141_v49, %v1140_v48  ;;  %v1232_v61 = vsel %vm2837_vm14, 0, %v2836_v45  ;;  %v1250_v35 = vsel %vm4637_vm1, 0, %v1248_v11 }
 0x27d   :  { %v1145_v58 = vsel %vm4534_vm12, %v4448_v46, %v1142_v53  ;;  %v1381_v38 = vsel %vm1380_vm5, %v1379_v26, 0  ;;  %v1233_v7 = vsub.s32 32, %v1232_v61  ;;  %v1237_v4 = vsub.s32 4294967266, %v1232_v61 }
 0x27e   :  { %3362 = vcosq.f32 %v1145_v58  ;;  %v4619_v12 = vand.u32 31, %v1381_v38  ;;  %v1234_v54 = vshll.u32 %v4576_v29, %v1232_v61  ;;  %v1304_v48 = vsel %vm1298_vm13, %v1301_v37, %v1303_v13 }
 0x27f   :  { %3364 = vsinq.f32 %v1145_v58  ;;  %v1235_v26 = vshrl.u32 %v1217_v5, %v1233_v7  ;;  %v1238_v34 = vadd.s32 127, %v1237_v4  ;;  %vm1152_vm15 = vcmp.lt.s32.totalorder %v4591_v41, 2 }
 0x280   :  { %v4643_v22 = vsub.s32 32, %v4619_v12  ;;  %vm1322_vm2 = vc.u32 %v4617_v55, %v4631_v24  ;;  %vm1153_vm11 = vcmp.eq.s32.totalorder %v4591_v41, 0  ;;  %vm1156_vm12 = vcmp.eq.s32.totalorder %v4591_v41, 2 }
 0x281   :  { %v1236_v27 = vor.u32 %v1235_v26, %v1234_v54  ;;  %v1239_v20 = vshll.u32 %v1238_v34, 23  ;;  %v1323_v43 = vadd.s32 1, %v4632_v9  ;;  %v4656_v23 = vshrl.u32 %v1381_v38, 5 }
 0x282   :  { %v1254_v8 = vadd.s32 3, %v1250_v35  ;;  %v1320_v32 = vmul.u32 %v1313_v36, %v1304_v48  ;;  %v1395_v18 = vshll.u32 %v5773_v1, %v4619_v12  ;;  %v1396_v28 = vshrl.u32 %v5776_v39, %v4643_v22 }
 0x283   :  { %v1240_v49 = vor.u32 4788187, %v1239_v20  ;;  %v1324_v3 = vsel %vm1322_vm2, %v1323_v43, %v4632_v9  ;;  %v1243_v44 = vcvt.s32.f32 %v1236_v27  ;;  %v1398_v15 = vshll.u32 %v5776_v39, %v4619_v12 }
 0x284   :  { %v1036_v6 = vpop.f32.mrb[8].mxu1  ;;  %v1325_v40 = vadd.s32 %v1324_v3, %v1320_v32  ;;  %v1399_v38 = vshrl.u32 %v5780_v57, %v4643_v22  ;;  %v1369_v5 = vand.u32 2147483647, %v4545_v42  ;;  %vm1404_vm9 = vcmp.lt.s32.totalorder %v4656_v23, 4 }
 0x285   :  { %v1037_v21 = vadd.f32 %v4445_v59, %v1036_v6  ;;  %v3035_v16 = vpop.f32.mrb[9].mxu1  ;;  %v1241_v58 = vand.u32 2147483647, %v1240_v49  ;;  %v1387_v62 = vshrl.u32 %v5772_v31, %v4643_v22  ;;  %v1390_v10 = vshrl.u32 %v3501_v25, %v4643_v22 }
 0x286   :  { %v1326_v16 = vadd.s32 536870912, %v1325_v40  ;;  %v1397_v61 = vor.u32 %v1396_v28, %v1395_v18  ;;  %v1386_v11 = vshll.u32 %v3502_v33, %v4619_v12  ;;  %v1389_v41 = vshll.u32 %v5772_v31, %v4619_v12 }
 0x287   :  { %v4621_v52 = vmul.f32 30.0, %v1037_v21  ;;  %v1244_v21 = vmul.f32 %v1243_v44, %v1241_v58  ;;  %v1393_v13 = vshrl.u32 %v5773_v1, %v4643_v22  ;;  %v1376_v54 = vand.u32 8388607, %v1369_v5 }
 0x288   :  { %v3363_v14 = vpop.eup %3362  ;;  %v4681_v4 = vshrl.u32 %v1326_v16, 30  ;;  %v1391_v35 = vor.u32 %v1390_v10, %v1389_v41  ;;  %v1392_v48 = vshll.u32 %v3501_v25, %v4619_v12  ;;  %v1255_v49 = vand.u32 3, %v1254_v8 }
 0x289   :  { %v1476_v56 = vand.u32 2139095040, %v4621_v52  ;;  %v3365_v50 = vpop.eup %3364  ;;  %v1157_v53 = vxor.u32 2147483648, %v3363_v14  ;;  %v1245_v7 = vxor.u32 2147483648, %v1244_v21  ;;  %v1377_v18 = vor.u32 8388608, %v1376_v54 }
 0x28a   :  { %v1154_v63 = vxor.u32 2147483648, %v3365_v50  ;;  %v1328_v9 = vshll.u32 %v4681_v4, 30  ;;  %v1394_v32 = vor.u32 %v1393_v13, %v1392_v48  ;;  %vm1401_vm8 = vcmp.lt.s32.totalorder %v4656_v23, 1 }
 0x28b   :  { %v1477_v51 = vshrl.u32 %v1476_v56, 23  ;;  %v1158_v45 = vsel %vm1156_vm12, %v1157_v53, %v3365_v50  ;;  %v1400_v56 = vor.u32 %v1399_v38, %v1398_v15  ;;  %v1246_v46 = vsel %vm1163_vm6, %v1245_v7, %v1244_v21 }
 0x28c   :  { %v1155_v36 = vsel %vm1153_vm11, %v3363_v14, %v1154_v63  ;;  %v1249_v34 = vsel %vm4637_vm1, %v4457_v30, %v1246_v46  ;;  %v4702_v43 = vsub.s32 %v1325_v40, %v1328_v9  ;;  %v1410_v14 = vsel %vm1404_vm9, %v1397_v61, 920167782 }
 0x28d   :  { %v2846_v29 = vadd.s32 4294967169, %v1477_v51  ;;  %v1159_v60 = vsel %vm1152_vm15, %v1155_v36, %v1158_v45  ;;  %v1388_v51 = vor.u32 %v1387_v62, %v1386_v11  ;;  %3366 = vcosq.f32 %v1249_v34 }
 0x28e   :  { %v1160_v37 = vsel %vm1149_vm3, nan, %v1159_v60  ;;  %3368 = vsinq.f32 %v1249_v34  ;;  %v1414_v0 = vsel %vm1404_vm9, %v1400_v56, 1326507024  ;;  %v1331_v12 = vsub.s32 0, %v4702_v43 }
 0x28f   :  { %v1483_v6 = vadd.s32 1, %v2846_v29  ;;  %3075 = vmatmul.mubr.f32.vlgmr.msra.gmra.mrb[14].mxu0 %v1160_v37  ;;  %vm1267_vm10 = vcmp.lt.s32.totalorder %v4494_v17, 0  ;;  %vm1403_vm7 = vcmp.lt.s32.totalorder %v4656_v23, 3  ;;  %v1409_v8 = vsel %vm1401_vm8, %v1388_v51, %v1391_v35 }
 0x290   :  { %3077 = vmatprep.mubr.msk.f32.mxu0 %vm3495_vm0, %v5775_v19  ;;  %v2839_v3 = vmin.u32 %v1331_v12, %v4702_v43  ;;  %vm1257_vm5 = vcmp.eq.s32.totalorder %v1255_v49, 0  ;;  %v1385_v63 = vshrl.u32 %v3502_v33, %v4643_v22  ;;  %v1411_v58 = vsel %vm1403_vm7, %v1394_v32, %v1410_v14 }
 0x291   :  { %vm1484_vm4 = vcmp.gt.s32.totalorder %v1483_v6, 0  ;;  %v1413_v44 = vsel %vm1401_vm8, %v1391_v35, %v1394_v32  ;;  %v1415_v40 = vsel %vm1403_vm7, %v1397_v61, %v1414_v0  ;;  %vm1256_vm6 = vcmp.lt.s32.totalorder %v1255_v49, 2 }
 0x292   :  { %v1485_v27 = vsel %vm1484_vm4, %v1483_v6, 0  ;;  %v1333_v38 = vclz %v2839_v3  ;;  %vm1402_vm13 = vcmp.lt.s32.totalorder %v4656_v23, 2  ;;  %v1417_v6 = vshll.u32 %v1377_v18, 8 }
 0x293   :  { %v4711_v28 = vand.u32 31, %v1485_v27  ;;  %vm4734_vm14 = vcmp.le.f32.partialorder %v1265_v2, 0.7853982  ;;  %v1406_v36 = vsel %vm1404_vm9, %v1394_v32, 2102212464  ;;  %v1412_v21 = vsel %vm1402_vm13, %v1409_v8, %v1411_v58 }
 0x294   :  { %v1416_v16 = vsel %vm1402_vm13, %v1413_v44, %v1415_v40  ;;  %vm1253_vm1 = vweird.f32 %v4457_v30  ;;  %v2840_v62 = vadd.s32 4294967294, %v1333_v38  ;;  %vm1260_vm3 = vcmp.eq.s32.totalorder %v1255_v49, 2 }
 0x295   :  { %v4730_v45 = vsub.s32 32, %v4711_v28  ;;  %v4745_v10 = vmul.u32.u64.low %v1417_v6, %v1416_v16  ;;  %v4746_v61 = vmul.u32.u64.high %v1417_v6, %v1416_v16, %v4745_v10  ;;  %v1351_v2 = vsub.s32 4, %v4681_v4 }
 0x296   :  { %v1041_v26 = vpop.f32.mrb[10].mxu1  ;;  %v4749_v37 = vmul.u32.u64.low %v1417_v6, %v1412_v21  ;;  %v4750_v7 = vmul.u32.u64.high %v1417_v6, %v1412_v21, %v4749_v37  ;;  %v1321_v41 = vadd.s32 %v4631_v24, %v4617_v55  ;;  %vm2841_vm15 = vcmp.lt.s32.totalorder %v2840_v62, 0 }
 0x297   :  { %v1042_v20 = vadd.f32 %v4445_v59, %v1041_v26  ;;  %v3038_v29 = vpop.f32.mrb[11].mxu1  ;;  %v3367_v11 = vpop.eup %3366  ;;  %v1405_v13 = vsel %vm1401_vm8, %v1385_v63, %v1388_v51  ;;  %v1407_v56 = vsel %vm1403_vm7, %v1391_v35, %v1406_v36  ;;  %v4759_v9 = vshrl.u32 %v1485_v27, 5 }
 0x298   :  { %v3369_v46 = vpop.eup %3368  ;;  %v1499_v54 = vshll.u32 %v5773_v1, %v4711_v28  ;;  %v1261_v26 = vxor.u32 2147483648, %v3367_v11  ;;  %v1336_v34 = vsel %vm2841_vm15, 0, %v2840_v62  ;;  %v1500_v48 = vshrl.u32 %v5776_v39, %v4730_v45 }
 0x299   :  { %v4708_v50 = vmul.f32 30.0, %v1042_v20  ;;  %v1258_v55 = vxor.u32 2147483648, %v3369_v46  ;;  %v1337_v24 = vsub.s32 32, %v1336_v34  ;;  %v1341_v51 = vsub.s32 4294967266, %v1336_v34 }
 0x29a   :  { %v1262_v29 = vsel %vm1260_vm3, %v1261_v26, %v3369_v46  ;;  %v1352_v35 = vsel %vm1267_vm10, %v1351_v2, %v4681_v4  ;;  %v1408_v27 = vsel %vm1402_vm13, %v1405_v13, %v1407_v56  ;;  %v1503_v14 = vshrl.u32 %v5780_v57, %v4730_v45 }
 0x29b   :  { %v1580_v53 = vand.u32 2139095040, %v4708_v50  ;;  %v1259_v32 = vsel %vm1257_vm5, %v3367_v11, %v1258_v55  ;;  %v1338_v0 = vshll.u32 %v4702_v43, %v1336_v34  ;;  %v1339_v12 = vshrl.u32 %v1321_v41, %v1337_v24 }
 0x29c   :  { %v1263_v18 = vsel %vm1256_vm6, %v1259_v32, %v1262_v29  ;;  %vm1426_vm2 = vc.u32 %v4746_v61, %v4749_v37  ;;  %v1427_v3 = vadd.s32 1, %v4750_v7  ;;  %v1502_v23 = vshll.u32 %v5776_v39, %v4711_v28 }
 0x29d   :  { %v1581_v15 = vshrl.u32 %v1580_v53, 23  ;;  %v1342_v53 = vadd.s32 127, %v1341_v51  ;;  %v1354_v4 = vsel %vm4734_vm14, 0, %v1352_v35  ;;  %v1424_v8 = vmul.u32 %v1417_v6, %v1408_v27 }
 0x29e   :  { %v1264_v43 = vsel %vm1253_vm1, nan, %v1263_v18  ;;  %v1340_v63 = vor.u32 %v1339_v12, %v1338_v0  ;;  %v1428_v58 = vsel %vm1426_vm2, %v1427_v3, %v4750_v7  ;;  %vm1508_vm12 = vcmp.lt.s32.totalorder %v4759_v9, 4 }
 0x29f   :  { %v2850_v60 = vadd.s32 4294967169, %v1581_v15  ;;  %v1343_v49 = vshll.u32 %v1342_v53, 23  ;;  %3078 = vmatmul.mubr.f32.gmra.mrb[16].mxu0 %v1264_v43  ;;  %v1429_v44 = vadd.s32 %v1428_v58, %v1424_v8  ;;  %v1501_v40 = vor.u32 %v1500_v48, %v1499_v54 }
 0x2a0   :  { %v1504_v15 = vor.u32 %v1503_v14, %v1502_v23  ;;  %3080 = vmatprep.mubr.msk.f32.mxu0 %vm3495_vm0, %v5775_v19  ;;  %v1358_v16 = vadd.s32 3, %v1354_v4  ;;  %v1473_v62 = vand.u32 2147483647, %v4621_v52  ;;  %v1347_v2 = vcvt.s32.f32 %v1340_v63 }
 0x2a1   :  { %v1587_v20 = vadd.s32 1, %v2850_v60  ;;  %v1344_v21 = vor.u32 4788187, %v1343_v49  ;;  %v1430_v60 = vadd.s32 536870912, %v1429_v44  ;;  %v1491_v7 = vshrl.u32 %v5772_v31, %v4730_v45 }
 0x2a2   :  { %v1494_v11 = vshrl.u32 %v3501_v25, %v4730_v45  ;;  %vm1371_vm9 = vcmp.lt.s32.totalorder %v4545_v42, 0  ;;  %v1490_v56 = vshll.u32 %v3502_v33, %v4711_v28  ;;  %v1493_v54 = vshll.u32 %v5772_v31, %v4711_v28 }
 0x2a3   :  { %vm1588_vm11 = vcmp.gt.s32.totalorder %v1587_v20, 0  ;;  %v1345_v10 = vand.u32 2147483647, %v1344_v21  ;;  %v1496_v26 = vshll.u32 %v3501_v25, %v4711_v28  ;;  %v1497_v34 = vshrl.u32 %v5773_v1, %v4730_v45 }
 0x2a4   :  { %v1589_v38 = vsel %vm1588_vm11, %v1587_v20, 0  ;;  %v1514_v48 = vsel %vm1508_vm12, %v1501_v40, 920167782  ;;  %v1480_v24 = vand.u32 8388607, %v1473_v62  ;;  %v1492_v28 = vor.u32 %v1491_v7, %v1490_v56 }
 0x2a5   :  { %v4795_v41 = vand.u32 31, %v1589_v38  ;;  %v1348_v46 = vmul.f32 %v1347_v2, %v1345_v10  ;;  %vm4815_vm4 = vcmp.le.f32.partialorder %v1369_v5, 0.7853982  ;;  %v1495_v35 = vor.u32 %v1494_v11, %v1493_v54 }
 0x2a6   :  { %v1498_v27 = vor.u32 %v1497_v34, %v1496_v26  ;;  %v1518_v14 = vsel %vm1508_vm12, %v1504_v15, 1326507024  ;;  %v4828_v53 = vand.u32 3, %v1358_v16  ;;  %vm1505_vm8 = vcmp.lt.s32.totalorder %v4759_v9, 1 }
 0x2a7   :  { %v1349_v29 = vxor.u32 2147483648, %v1348_v46  ;;  %v4822_v32 = vsub.s32 32, %v4795_v41  ;;  %vm1507_vm7 = vcmp.lt.s32.totalorder %v4759_v9, 3  ;;  %v1481_v8 = vor.u32 8388608, %v1480_v24 }
 0x2a8   :  { %v1046_v36 = vpop.f32.mrb[12].mxu1  ;;  %v1513_v43 = vsel %vm1505_vm8, %v1492_v28, %v1495_v35  ;;  %v1515_v63 = vsel %vm1507_vm7, %v1498_v27, %v1514_v48  ;;  %v1517_v22 = vsel %vm1505_vm8, %v1495_v35, %v1498_v27  ;;  %v1489_v15 = vshrl.u32 %v3502_v33, %v4730_v45 }
 0x2a9   :  { %v1047_v6 = vadd.f32 %v4445_v59, %v1046_v36  ;;  %v3041_v30 = vpop.f32.mrb[13].mxu1  ;;  %v1431_v59 = vshrl.u32 %v1430_v60, 30  ;;  %v1350_v18 = vsel %vm1267_vm10, %v1349_v29, %v1348_v46  ;;  %v1604_v49 = vshrl.u32 %v5776_v39, %v4822_v32 }
 0x2aa   :  { %v1353_v23 = vsel %vm4734_vm14, %v4494_v17, %v1350_v18  ;;  %vm1506_vm10 = vcmp.lt.s32.totalorder %v4759_v9, 2  ;;  %v1519_v36 = vsel %vm1507_vm7, %v1501_v40, %v1518_v14  ;;  %v1603_v21 = vshll.u32 %v5773_v1, %v4795_v41 }
 0x2ab   :  { %v4797_v13 = vmul.f32 30.0, %v1047_v6  ;;  %v1432_v55 = vshll.u32 %v1431_v59, 30  ;;  %v1455_v5 = vsub.s32 4, %v1431_v59  ;;  %3370 = vcosq.f32 %v1353_v23 }
 0x2ac   :  { %3372 = vsinq.f32 %v1353_v23  ;;  %v1516_v16 = vsel %vm1506_vm10, %v1513_v43, %v1515_v63  ;;  %v4856_v60 = vshrl.u32 %v1589_v38, 5  ;;  %v1510_v10 = vsel %vm1508_vm12, %v1498_v27, 2102212464 }
 0x2ad   :  { %v1684_v20 = vand.u32 2139095040, %v4797_v13  ;;  %v4824_v12 = vsub.s32 %v1429_v44, %v1432_v55  ;;  %v1456_v44 = vsel %vm1371_vm9, %v1455_v5, %v1431_v59  ;;  %v1520_v45 = vsel %vm1506_vm10, %v1517_v22, %v1519_v36 }
 0x2ae   :  { %v1521_v2 = vshll.u32 %v1481_v8, 8  ;;  %v4862_v7 = vor.u32 %v1604_v49, %v1603_v21  ;;  %v1607_v40 = vshrl.u32 %v5780_v57, %v4822_v32  ;;  %vm1361_vm5 = vcmp.eq.s32.totalorder %v4828_v53, 0 }
 0x2af   :  { %v1685_v0 = vshrl.u32 %v1684_v20, 23  ;;  %v1435_v4 = vsub.s32 0, %v4824_v12  ;;  %v1458_v59 = vsel %vm4815_vm4, 0, %v1456_v44  ;;  %vm1360_vm6 = vcmp.lt.s32.totalorder %v4828_v53, 2 }
 0x2b0   :  { %v4870_v38 = vmul.u32.u64.low %v1521_v2, %v1520_v45  ;;  %v4871_v56 = vmul.u32.u64.high %v1521_v2, %v1520_v45, %v4870_v38  ;;  %v4873_v46 = vmul.u32.u64.low %v1521_v2, %v1516_v16  ;;  %v4874_v54 = vmul.u32.u64.high %v1521_v2, %v1516_v16, %v4873_v46 }
 0x2b1   :  { %v2854_v3 = vadd.s32 4294967169, %v1685_v0  ;;  %v2843_v58 = vmin.u32 %v1435_v4, %v4824_v12  ;;  %v1606_v26 = vshll.u32 %v5776_v39, %v4795_v41  ;;  %vm1357_vm14 = vweird.f32 %v4494_v17 }
 0x2b2   :  { %v1509_v34 = vsel %vm1505_vm8, %v1489_v15, %v1492_v28  ;;  %v1511_v48 = vsel %vm1507_vm7, %v1495_v35, %v1510_v10  ;;  %vm1612_vm1 = vcmp.lt.s32.totalorder %v4856_v60, 4  ;;  %vm1364_vm3 = vcmp.eq.s32.totalorder %v4828_v53, 2 }
 0x2b3   :  { %v1691_v6 = vadd.s32 1, %v2854_v3  ;;  %v1437_v30 = vclz %v2843_v58  ;;  %v1425_v20 = vadd.s32 %v4749_v37, %v4746_v61  ;;  %v1608_v55 = vor.u32 %v1607_v40, %v1606_v26 }
 0x2b4   :  { %v1618_v24 = vsel %vm1612_vm1, %v4862_v7, 920167782  ;;  %v1462_v27 = vadd.s32 3, %v1458_v59  ;;  %v1512_v35 = vsel %vm1506_vm10, %v1509_v34, %v1511_v48  ;;  %vm1530_vm2 = vc.u32 %v4871_v56, %v4873_v46 }
 0x2b5   :  { %v2844_v11 = vadd.s32 4294967294, %v1437_v30  ;;  %vm1692_vm13 = vcmp.gt.s32.totalorder %v1691_v6, 0  ;;  %v3371_v14 = vpop.eup %3370  ;;  %v1577_v61 = vand.u32 2147483647, %v4708_v50  ;;  %v1531_v43 = vadd.s32 1, %v4874_v54 }
 0x2b6   :  { %v1693_v28 = vsel %vm1692_vm13, %v1691_v6, 0  ;;  %v3373_v5 = vpop.eup %3372  ;;  %v1365_v3 = vxor.u32 2147483648, %v3371_v14  ;;  %v1622_v63 = vsel %vm1612_vm1, %v1608_v55, 1326507024  ;;  %v4902_v49 = vand.u32 3, %v1462_v27 }
 0x2b7   :  { %vm2845_vm15 = vcmp.lt.s32.totalorder %v2844_v11, 0  ;;  %v1362_v37 = vxor.u32 2147483648, %v3373_v5  ;;  %v1528_v58 = vmul.u32 %v1521_v2, %v1512_v35  ;;  %v1532_v15 = vsel %vm1530_vm2, %v1531_v43, %v4874_v54 }
 0x2b8   :  { %v1440_v29 = vsel %vm2845_vm15, 0, %v2844_v11  ;;  %v1366_v9 = vsel %vm1364_vm3, %v1365_v3, %v3373_v5  ;;  %v4907_v36 = vand.u32 31, %v1693_v28  ;;  %v1595_v30 = vshrl.u32 %v5772_v31, %v4822_v32 }
 0x2b9   :  { %v1441_v0 = vsub.s32 32, %v1440_v29  ;;  %v1445_v18 = vsub.s32 4294967266, %v1440_v29  ;;  %v1442_v23 = vshll.u32 %v4824_v12, %v1440_v29  ;;  %v1363_v12 = vsel %vm1361_vm5, %v3371_v14, %v1362_v37 }
 0x2ba   :  { %v1367_v21 = vsel %vm1360_vm6, %v1363_v12, %v1366_v9  ;;  %v1533_v6 = vadd.s32 %v1532_v15, %v1528_v58  ;;  %v1584_v45 = vand.u32 8388607, %v1577_v61  ;;  %v1594_v2 = vshll.u32 %v3502_v33, %v4795_v41 }
 0x2bb   :  { %v1443_v4 = vshrl.u32 %v1425_v20, %v1441_v0  ;;  %v1446_v8 = vadd.s32 127, %v1445_v18  ;;  %v1368_v16 = vsel %vm1357_vm14, nan, %v1367_v21  ;;  %v1597_v53 = vshll.u32 %v5772_v31, %v4795_v41 }
 0x2bc   :  { %3081 = vmatmul.mubr.f32.gmra.mrb[18].mxu0 %v1368_v16  ;;  %v1534_v11 = vadd.s32 536870912, %v1533_v6  ;;  %v1598_v59 = vshrl.u32 %v3501_v25, %v4822_v32  ;;  %v1596_v38 = vor.u32 %v1595_v30, %v1594_v2  ;;  %v1600_v54 = vshll.u32 %v3501_v25, %v4795_v41 }
 0x2bd   :  { %v1444_v22 = vor.u32 %v1443_v4, %v1442_v23  ;;  %v1447_v44 = vshll.u32 %v1446_v8, 23  ;;  %3083 = vmatprep.mubr.msk.f32.mxu0 %vm3495_vm0, %v5775_v19  ;;  %v1601_v26 = vshrl.u32 %v5773_v1, %v4822_v32  ;;  %v4929_v34 = vshrl.u32 %v1693_v28, 5 }
 0x2be   :  { %v4932_v48 = vsub.s32 32, %v4907_v36  ;;  %v4934_v20 = vshrl.u32 %v1534_v11, 30  ;;  %v1599_v55 = vor.u32 %v1598_v59, %v1597_v53  ;;  %v1585_v27 = vor.u32 8388608, %v1584_v45 }
 0x2bf   :  { %v1448_v10 = vor.u32 4788187, %v1447_v44  ;;  %v1451_v40 = vcvt.s32.f32 %v1444_v22  ;;  %v1602_v14 = vor.u32 %v1601_v26, %v1600_v54  ;;  %vm1611_vm11 = vcmp.lt.s32.totalorder %v4856_v60, 3 }
 0x2c0   :  { %v1536_v0 = vshll.u32 %v4934_v20, 30  ;;  %v1593_v41 = vshrl.u32 %v3502_v33, %v4822_v32  ;;  %vm1609_vm12 = vcmp.lt.s32.totalorder %v4856_v60, 1  ;;  %v1623_v28 = vsel %vm1611_vm11, %v4862_v7, %v1622_v63 }
 0x2c1   :  { %v1449_v17 = vand.u32 2147483647, %v1448_v10  ;;  %v1617_v35 = vsel %vm1609_vm12, %v1596_v38, %v1599_v55  ;;  %v1619_v5 = vsel %vm1611_vm11, %v1602_v14, %v1618_v24  ;;  %v1621_v3 = vsel %vm1609_vm12, %v1599_v55, %v1602_v14 }
 0x2c2   :  { %v1708_v23 = vshrl.u32 %v5776_v39, %v4932_v48  ;;  %v4952_v32 = vsub.s32 %v1533_v6, %v1536_v0  ;;  %vm1610_vm8 = vcmp.lt.s32.totalorder %v4856_v60, 2  ;;  %v1614_v7 = vsel %vm1612_vm1, %v1602_v14, 2102212464 }
 0x2c3   :  { %v1452_v29 = vmul.f32 %v1451_v40, %v1449_v17  ;;  %v1707_v37 = vshll.u32 %v5773_v1, %v4907_v36  ;;  %v1624_v24 = vsel %vm1610_vm8, %v1621_v3, %v1623_v28  ;;  %v1625_v8 = vshll.u32 %v1585_v27, 8 }
 0x2c4   :  { %v1539_v63 = vsub.s32 0, %v4952_v32  ;;  %v1613_v9 = vsel %vm1609_vm12, %v1593_v41, %v1596_v38  ;;  %v1620_v58 = vsel %vm1610_vm8, %v1617_v35, %v1619_v5  ;;  %v1615_v12 = vsel %vm1611_vm11, %v1599_v55, %v1614_v7 }
 0x2c5   :  { %v1453_v18 = vxor.u32 2147483648, %v1452_v29  ;;  %v4973_v22 = vmul.u32.u64.low %v1625_v8, %v1624_v24  ;;  %v4974_v44 = vmul.u32.u64.high %v1625_v8, %v1624_v24, %v4973_v22  ;;  %v1709_v15 = vor.u32 %v1708_v23, %v1707_v37 }
 0x2c6   :  { %v1711_v51 = vshrl.u32 %v5780_v57, %v4932_v48  ;;  %v2847_v21 = vmin.u32 %v1539_v63, %v4952_v32  ;;  %v4979_v6 = vmul.u32.u64.low %v1625_v8, %v1620_v58  ;;  %v4980_v30 = vmul.u32.u64.high %v1625_v8, %v1620_v58, %v4979_v6 }
 0x2c7   :  { %v1454_v4 = vsel %vm1371_vm9, %v1453_v18, %v1452_v29  ;;  %v1710_v16 = vshll.u32 %v5776_v39, %v4907_v36  ;;  %v1616_v45 = vsel %vm1610_vm8, %v1613_v9, %v1615_v12  ;;  %v1681_v2 = vand.u32 2147483647, %v4797_v13 }
 0x2c8   :  { %v1457_v43 = vsel %vm4815_vm4, %v4545_v42, %v1454_v4  ;;  %v1541_v10 = vclz %v2847_v21  ;;  %vm1716_vm9 = vcmp.lt.s32.totalorder %v4929_v34, 4  ;;  %vm1468_vm4 = vcmp.eq.s32.totalorder %v4902_v49, 2 }
 0x2c9   :  { %3374 = vcosq.f32 %v1457_v43  ;;  %v1529_v40 = vadd.s32 %v4873_v46, %v4871_v56  ;;  %v1712_v11 = vor.u32 %v1711_v51, %v1710_v16  ;;  %v1722_v53 = vsel %vm1716_vm9, %v1709_v15, 920167782 }
 0x2ca   :  { %3376 = vsinq.f32 %v1457_v43  ;;  %vm1465_vm7 = vcmp.eq.s32.totalorder %v4902_v49, 0  ;;  %v2848_v59 = vadd.s32 4294967294, %v1541_v10  ;;  %vm1634_vm10 = vc.u32 %v4974_v44, %v4979_v6 }
 0x2cb   :  { %vm1464_vm5 = vcmp.lt.s32.totalorder %v4902_v49, 2  ;;  %v1632_v60 = vmul.u32 %v1625_v8, %v1616_v45  ;;  %v1635_v17 = vadd.s32 1, %v4980_v30  ;;  %v1699_v38 = vshrl.u32 %v5772_v31, %v4932_v48 }
 0x2cc   :  { %v1702_v56 = vshrl.u32 %v3501_v25, %v4932_v48  ;;  %vm1461_vm6 = vweird.f32 %v4545_v42  ;;  %vm2849_vm13 = vcmp.lt.s32.totalorder %v2848_v59, 0  ;;  %v1688_v46 = vand.u32 8388607, %v1681_v2 }
 0x2cd   :  { %v1698_v54 = vshll.u32 %v3502_v33, %v4907_v36  ;;  %v1705_v26 = vshrl.u32 %v5773_v1, %v4932_v48  ;;  %v1544_v55 = vsel %vm2849_vm13, 0, %v2848_v59  ;;  %v1636_v29 = vsel %vm1634_vm10, %v1635_v17, %v4980_v30 }
 0x2ce   :  { %v1701_v27 = vshll.u32 %v5772_v31, %v4907_v36  ;;  %v1704_v14 = vshll.u32 %v3501_v25, %v4907_v36  ;;  %v1726_v0 = vsel %vm1716_vm9, %v1712_v11, 1326507024  ;;  %v1545_v41 = vsub.s32 32, %v1544_v55 }
 0x2cf   :  { %v1549_v28 = vsub.s32 4294967266, %v1544_v55  ;;  %v1637_v18 = vadd.s32 %v1636_v29, %v1632_v60  ;;  %v1546_v5 = vshll.u32 %v4952_v32, %v1544_v55  ;;  %v1700_v3 = vor.u32 %v1699_v38, %v1698_v54 }
 0x2d0   :  { %v1703_v23 = vor.u32 %v1702_v56, %v1701_v27  ;;  %v1706_v7 = vor.u32 %v1705_v26, %v1704_v14  ;;  %v1547_v24 = vshrl.u32 %v1529_v40, %v1545_v41  ;;  %v1689_v9 = vor.u32 8388608, %v1688_v46 }
 0x2d1   :  { %v1550_v8 = vadd.s32 127, %v1549_v28  ;;  %v1638_v43 = vadd.s32 536870912, %v1637_v18  ;;  %vm1713_vm14 = vcmp.lt.s32.totalorder %v4929_v34, 1  ;;  %vm1715_vm1 = vcmp.lt.s32.totalorder %v4929_v34, 3 }
 0x2d2   :  { %v1548_v58 = vor.u32 %v1547_v24, %v1546_v5  ;;  %v1721_v51 = vsel %vm1713_vm14, %v1700_v3, %v1703_v23  ;;  %v1725_v21 = vsel %vm1713_vm14, %v1703_v23, %v1706_v7  ;;  %v1727_v30 = vsel %vm1715_vm1, %v1709_v15, %v1726_v0 }
 0x2d3   :  { %v3375_v35 = vpop.eup %3374  ;;  %v1551_v12 = vshll.u32 %v1550_v8, 23  ;;  %v5022_v32 = vshrl.u32 %v1638_v43, 30  ;;  %v1723_v40 = vsel %vm1715_vm1, %v1706_v7, %v1722_v53  ;;  %vm1714_vm3 = vcmp.lt.s32.totalorder %v4929_v34, 2 }
 0x2d4   :  { %v3377_v37 = vpop.eup %3376  ;;  %v1469_v4 = vxor.u32 2147483648, %v3375_v35  ;;  %v1718_v59 = vsel %vm1716_vm9, %v1706_v7, 2102212464  ;;  %v1555_v15 = vcvt.s32.f32 %v1548_v58  ;;  %v1728_v49 = vsel %vm1714_vm3, %v1725_v21, %v1727_v30 }
 0x2d5   :  { %v1466_v63 = vxor.u32 2147483648, %v3377_v37  ;;  %v1552_v10 = vor.u32 4788187, %v1551_v12  ;;  %v1640_v45 = vshll.u32 %v5022_v32, 30  ;;  %v1559_v53 = vsub.s32 4, %v4934_v20 }
 0x2d6   :  { %v1470_v36 = vsel %vm1468_vm4, %v1469_v4, %v3377_v37  ;;  %v1697_v42 = vshrl.u32 %v3502_v33, %v4932_v48  ;;  %v1724_v38 = vsel %vm1714_vm3, %v1721_v51, %v1723_v40  ;;  %v1729_v56 = vshll.u32 %v1689_v9, 8 }
 0x2d7   :  { %v1467_v22 = vsel %vm1465_vm7, %v3375_v35, %v1466_v63  ;;  %v1553_v60 = vand.u32 2147483647, %v1552_v10  ;;  %v1641_v17 = vsub.s32 %v1637_v18, %v1640_v45  ;;  %vm1475_vm15 = vcmp.lt.s32.totalorder %v4621_v52, 0 }
 0x2d8   :  { %v1471_v16 = vsel %vm1464_vm5, %v1467_v22, %v1470_v36  ;;  %v1717_v26 = vsel %vm1713_vm14, %v1697_v42, %v1700_v3  ;;  %v1719_v55 = vsel %vm1715_vm1, %v1703_v23, %v1718_v59  ;;  %v1560_v28 = vsel %vm1475_vm15, %v1559_v53, %v4934_v20 }
 0x2d9   :  { %v1472_v11 = vsel %vm1461_vm6, nan, %v1471_v16  ;;  %v1556_v46 = vmul.f32 %v1555_v15, %v1553_v60  ;;  %v1643_v54 = vsub.s32 0, %v1641_v17  ;;  %vm1474_vm2 = vcmp.le.f32.partialorder %v1473_v62, 0.7853982 }
 0x2da   :  { %3084 = vmatmul.mubr.f32.gmra.mrb[20].mxu0 %v1472_v11  ;;  %v5056_v29 = vmul.u32.u64.low %v1729_v56, %v1728_v49  ;;  %v5057_v27 = vmul.u32.u64.high %v1729_v56, %v1728_v49, %v5056_v29  ;;  %v5059_v48 = vmul.u32.u64.low %v1729_v56, %v1724_v38  ;;  %v5060_v41 = vmul.u32.u64.high %v1729_v56, %v1724_v38, %v5059_v48 }
 0x2db   :  { %3086 = vmatprep.mubr.msk.f32.mxu0 %vm3495_vm0, %v5775_v19  ;;  %v1557_v14 = vxor.u32 2147483648, %v1556_v46  ;;  %v2851_v0 = vmin.u32 %v1643_v54, %v1641_v17  ;;  %v1720_v3 = vsel %vm1714_vm3, %v1717_v26, %v1719_v55  ;;  %v1562_v23 = vsel %vm1474_vm2, 0, %v1560_v28 }
 0x2dc   :  { %vm1738_vm11 = vc.u32 %v5057_v27, %v5059_v48  ;;  %v1739_v37 = vadd.s32 1, %v5060_v41  ;;  %v1736_v20 = vmul.u32 %v1729_v56, %v1720_v3  ;;  %v1566_v4 = vadd.s32 3, %v1562_v23 }
 0x2dd   :  { %v1558_v18 = vsel %vm1475_vm15, %v1557_v14, %v1556_v46  ;;  %v1645_v35 = vclz %v2851_v0  ;;  %v1633_v8 = vadd.s32 %v4979_v6, %v4974_v44  ;;  %v1663_v53 = vsub.s32 4, %v5022_v32 }
 0x2de   :  { %v1561_v5 = vsel %vm1474_vm2, %v4621_v52, %v1558_v18  ;;  %v1740_v24 = vsel %vm1738_vm11, %v1739_v37, %v5060_v41  ;;  %v1567_v22 = vand.u32 3, %v1566_v4  ;;  %vm1565_vm7 = vweird.f32 %v4621_v52 }
 0x2df   :  { %3378 = vcosq.f32 %v1561_v5  ;;  %v2852_v7 = vadd.s32 4294967294, %v1645_v35  ;;  %v1741_v63 = vadd.s32 %v1740_v24, %v1736_v20  ;;  %vm1579_vm10 = vcmp.lt.s32.totalorder %v4708_v50, 0 }
 0x2e0   :  { %3380 = vsinq.f32 %v1561_v5  ;;  %vm1572_vm8 = vcmp.eq.s32.totalorder %v1567_v22, 2  ;;  %vm1568_vm9 = vcmp.lt.s32.totalorder %v1567_v22, 2  ;;  %vm1569_vm4 = vcmp.eq.s32.totalorder %v1567_v22, 0 }
 0x2e1   :  { %vm2853_vm12 = vcmp.lt.s32.totalorder %v2852_v7, 0  ;;  %v1742_v12 = vadd.s32 536870912, %v1741_v63  ;;  %vm1578_vm5 = vcmp.le.f32.partialorder %v1577_v61, 0.7853982  ;;  %v1664_v55 = vsel %vm1579_vm10, %v1663_v53, %v5022_v32 }
 0x2e2   :  { %v1648_v62 = vsel %vm2853_vm12, 0, %v2852_v7  ;;  %v1666_v0 = vsel %vm1578_vm5, 0, %v1664_v55  ;;  %v1737_v18 = vadd.s32 %v5059_v48, %v5057_v27  ;;  %vm1669_vm3 = vweird.f32 %v4708_v50 }
 0x2e3   :  { %v1649_v34 = vsub.s32 32, %v1648_v62  ;;  %v1653_v43 = vsub.s32 4294967266, %v1648_v62  ;;  %v1650_v9 = vshll.u32 %v1641_v17, %v1648_v62  ;;  %v5075_v30 = vshrl.u32 %v1742_v12, 30 }
 0x2e4   :  { %v1670_v28 = vadd.s32 3, %v1666_v0  ;;  %vm1683_vm15 = vcmp.lt.s32.totalorder %v4797_v13, 0  ;;  %vm1682_vm2 = vcmp.le.f32.partialorder %v1681_v2, 0.7853982 }
 0x2e5   :  { %v1651_v36 = vshrl.u32 %v1633_v8, %v1649_v34  ;;  %v1654_v58 = vadd.s32 127, %v1653_v43  ;;  %v1744_v45 = vshll.u32 %v5075_v30, 30 }
 0x2e6   :  { %v1671_v7 = vand.u32 3, %v1670_v28 }
 0x2e7   :  { %v1652_v51 = vor.u32 %v1651_v36, %v1650_v9  ;;  %v1655_v21 = vshll.u32 %v1654_v58, 23  ;;  %v1745_v60 = vsub.s32 %v1741_v63, %v1744_v45  ;;  %v1767_v9 = vsub.s32 4, %v5075_v30 }
 0x2e8   :  { %vm1676_vm13 = vcmp.eq.s32.totalorder %v1671_v7, 2  ;;  %vm1673_vm14 = vcmp.eq.s32.totalorder %v1671_v7, 0  ;;  %vm1672_vm1 = vcmp.lt.s32.totalorder %v1671_v7, 2 }
 0x2e9   :  { %v3379_v16 = vpop.eup %3378  ;;  %v1656_v10 = vor.u32 4788187, %v1655_v21  ;;  %v1659_v59 = vcvt.s32.f32 %v1652_v51  ;;  %v1747_v42 = vsub.s32 0, %v1745_v60  ;;  %v1768_v51 = vsel %vm1683_vm15, %v1767_v9, %v5075_v30 }
 0x2ea   :  { %v3381_v40 = vpop.eup %3380  ;;  %v1573_v11 = vxor.u32 2147483648, %v3379_v16 }
 0x2eb   :  { %v1570_v44 = vxor.u32 2147483648, %v3381_v40  ;;  %v1657_v6 = vand.u32 2147483647, %v1656_v10  ;;  %v2855_v54 = vmin.u32 %v1747_v42, %v1745_v60 }
 0x2ec   :  { %v1574_v15 = vsel %vm1572_vm8, %v1573_v11, %v3381_v40 }
 0x2ed   :  { %v1571_v17 = vsel %vm1569_vm4, %v3379_v16, %v1570_v44  ;;  %v1660_v49 = vmul.f32 %v1659_v59, %v1657_v6  ;;  %v1749_v29 = vclz %v2855_v54  ;;  %v1770_v16 = vsel %vm1682_vm2, 0, %v1768_v51 }
 0x2ee   :  { %v1575_v38 = vsel %vm1568_vm9, %v1571_v17, %v1574_v15  ;;  %vm1773_vm9 = vweird.f32 %v4797_v13 }
 0x2ef   :  { %v1576_v56 = vsel %vm1565_vm7, nan, %v1575_v38  ;;  %v1661_v46 = vxor.u32 2147483648, %v1660_v49  ;;  %v2856_v52 = vadd.s32 4294967294, %v1749_v29 }
 0x2f0   :  { %3087 = vmatmul.mubr.f32.gmra.mrb[22].mxu0 %v1576_v56 }
 0x2f1   :  { %3089 = vmatprep.mubr.msk.f32.mxu0 %vm3495_vm0, %v5775_v19  ;;  %v1662_v26 = vsel %vm1579_vm10, %v1661_v46, %v1660_v49  ;;  %vm2857_vm6 = vcmp.lt.s32.totalorder %v2856_v52, 0 }
 0x2f2   :  { %v1665_v14 = vsel %vm1578_vm5, %v4708_v50, %v1662_v26  ;;  %v1752_v41 = vsel %vm2857_vm6, 0, %v2856_v52  ;;  %v1774_v50 = vadd.s32 3, %v1770_v16 }
 0x2f3   :  { %3382 = vcosq.f32 %v1665_v14  ;;  %v1753_v35 = vsub.s32 32, %v1752_v41  ;;  %v1757_v5 = vsub.s32 4294967266, %v1752_v41  ;;  %v1754_v3 = vshll.u32 %v1745_v60, %v1752_v41  ;;  %v5104_v60 = vld [vmem:[%s5747_s4 + $0x1] ss:$0 sm:$0xff] }
 0x2f4   :  { %3384 = vsinq.f32 %v1665_v14  ;;  %v1775_v10 = vand.u32 3, %v1774_v50 }
 0x2f5   :  { %v1755_v61 = vshrl.u32 %v1737_v18, %v1753_v35  ;;  %v1758_v23 = vadd.s32 127, %v1757_v5 }
 0x2f6   :  { %vm1780_vm11 = vcmp.eq.s32.totalorder %v1775_v10, 2  ;;  %vm1777_vm12 = vcmp.eq.s32.totalorder %v1775_v10, 0  ;;  %vm1776_vm8 = vcmp.lt.s32.totalorder %v1775_v10, 2 }
 0x2f7   :  { %v1756_v32 = vor.u32 %v1755_v61, %v1754_v3  ;;  %v1759_v37 = vshll.u32 %v1758_v23, 23 }
 0x2f9   :  { %v1760_v4 = vor.u32 4788187, %v1759_v37  ;;  %v1763_v43 = vcvt.s32.f32 %v1756_v32 }
 0x2fb   :  { %v1761_v34 = vand.u32 2147483647, %v1760_v4 }
 0x2fd   :  { %v3383_v20 = vpop.eup %3382  ;;  %v1764_v48 = vmul.f32 %v1763_v43, %v1761_v34 }
 0x2fe   :  { %v3385_v62 = vpop.eup %3384  ;;  %v1677_v24 = vxor.u32 2147483648, %v3383_v20 }
 0x2ff   :  { %v1674_v8 = vxor.u32 2147483648, %v3385_v62  ;;  %v1765_v12 = vxor.u32 2147483648, %v1764_v48 }
 0x300   :  { %v1678_v63 = vsel %vm1676_vm13, %v1677_v24, %v3385_v62 }
 0x301   :  { %v1675_v27 = vsel %vm1673_vm14, %v3383_v20, %v1674_v8  ;;  %v1766_v22 = vsel %vm1683_vm15, %v1765_v12, %v1764_v48 }
 0x302   :  { %v1679_v36 = vsel %vm1672_vm1, %v1675_v27, %v1678_v63  ;;  %v1769_v21 = vsel %vm1682_vm2, %v4797_v13, %v1766_v22 }
 0x303   :  { %v1680_v58 = vsel %vm1669_vm3, nan, %v1679_v36  ;;  %3386 = vcosq.f32 %v1769_v21 }
 0x304   :  { %3090 = vmatmul.mubr.f32.gmra.mrb[24].mxu0 %v1680_v58  ;;  %3388 = vsinq.f32 %v1769_v21 }
 0x305   :  { %3092 = vmatprep.mubr.msk.f32.mxu0 %vm3495_vm0, %v5775_v19 }
 0x30d   :  { %v3387_v45 = vpop.eup %3386 }
 0x30e   :  { %v3389_v40 = vpop.eup %3388  ;;  %v1781_v11 = vxor.u32 2147483648, %v3387_v45 }
 0x30f   :  { %v1778_v44 = vxor.u32 2147483648, %v3389_v40 }
 0x310   :  { %v1782_v6 = vsel %vm1780_vm11, %v1781_v11, %v3389_v40 }
 0x311   :  { %v1779_v59 = vsel %vm1777_vm12, %v3387_v45, %v1778_v44 }
 0x312   :  { %v1783_v2 = vsel %vm1776_vm8, %v1779_v59, %v1782_v6 }
 0x313   :  { %v1784_v30 = vsel %vm1773_vm9, nan, %v1783_v2 }
 0x314   :  { %3093 = vmatmul.mubr.f32.gmra.mrb[26].mxu0 %v1784_v30 }
 0x315   :  { %3127 = vmatprep.mubr.msk.f32.mxu0 %vm3495_vm0, %v5775_v19 }
 0x362   :  { %v1876_v15 = vpop.f32.mrb[14].mxu0 }
 0x363   :  { %v1877_v17 = vadd.f32 %v5104_v60, %v1876_v15  ;;  %v3076_v49 = vpop.f32.mrb[15].mxu0 }
 0x365   :  { %v5107_v53 = vmul.f32 30.0, %v1877_v17 }
 0x367   :  { %v1920_v42 = vand.u32 2139095040, %v5107_v53  ;;  %v1917_v13 = vand.u32 2147483647, %v5107_v53  ;;  %vm1919_vm8 = vcmp.lt.s32.totalorder %v5107_v53, 0 }
 0x369   :  { %v1921_v38 = vshrl.u32 %v1920_v42, 23  ;;  %v1924_v46 = vand.u32 8388607, %v1917_v13 }
 0x36b   :  { %v2860_v56 = vadd.s32 4294967169, %v1921_v38  ;;  %v1925_v26 = vor.u32 8388608, %v1924_v46  ;;  %v2645_v46 = vld [vmem:[#allocation5] sm:$0xff] }
 0x36d   :  { %v1927_v54 = vadd.s32 1, %v2860_v56  ;;  %v1965_v28 = vshll.u32 %v1925_v26, 8  ;;  %v2647_v26 = vld [vmem:[#allocation5 + $0x10] sm:$0xff] }
 0x36f   :  { %vm1928_vm4 = vcmp.gt.s32.totalorder %v1927_v54, 0 }
 0x370   :  { %v1929_v55 = vsel %vm1928_vm4, %v1927_v54, 0  ;;  %v2646_v54 = vld [vmem:[#allocation5 + $0x8] sm:$0xff]  ;;  %vm5243_vm4 = vcmp.le.f32.partialorder %v1917_v13, 0.7853982 }
 0x371   :  { %v1931_v29 = vand.u32 31, %v1929_v55  ;;  %v1930_v14 = vshrl.u32 %v1929_v55, 5 }
 0x372   :  { %v1881_v62 = vpop.f32.mrb[16].mxu0 }
 0x373   :  { %v1932_v52 = vsub.s32 32, %v1931_v29  ;;  %v1934_v0 = vshll.u32 %v3502_v33, %v1931_v29  ;;  %v1937_v41 = vshll.u32 %v5772_v31, %v1931_v29  ;;  %v1940_v5 = vshll.u32 %v3501_v25, %v1931_v29  ;;  %v3079_v43 = vpop.f32.mrb[17].mxu0 }
 0x374   :  { %v1943_v61 = vshll.u32 %v5773_v1, %v1931_v29  ;;  %v1946_v7 = vshll.u32 %v5776_v39, %v1931_v29  ;;  %vm1949_vm7 = vcmp.lt.s32.totalorder %v1930_v14, 1  ;;  %vm1952_vm10 = vcmp.lt.s32.totalorder %v1930_v14, 4 }
 0x375   :  { %v1935_v18 = vshrl.u32 %v5772_v31, %v1932_v52  ;;  %v1938_v35 = vshrl.u32 %v3501_v25, %v1932_v52  ;;  %v1941_v3 = vshrl.u32 %v5773_v1, %v1932_v52  ;;  %v1944_v23 = vshrl.u32 %v5776_v39, %v1932_v52 }
 0x376   :  { %v1947_v32 = vshrl.u32 %v5780_v57, %v1932_v52  ;;  %v1882_v34 = vadd.f32 %v5104_v60, %v1881_v62  ;;  %v1933_v63 = vshrl.u32 %v3502_v33, %v1932_v52  ;;  %vm1951_vm5 = vcmp.lt.s32.totalorder %v1930_v14, 3 }
 0x377   :  { %v1936_v37 = vor.u32 %v1935_v18, %v1934_v0  ;;  %v1939_v20 = vor.u32 %v1938_v35, %v1937_v41  ;;  %v1942_v4 = vor.u32 %v1941_v3, %v1940_v5  ;;  %v1945_v24 = vor.u32 %v1944_v23, %v1943_v61  ;;  %v2648_v0 = vld [vmem:[#allocation5 + $0x18] sm:$0xff]  ;;  %v2649_v5 = vld [vmem:[#allocation5 + $0x20] sm:$0xff]  ;;  %v2650_v3 = vld [vmem:[#allocation5 + $0x28] sm:$0xff] }
 0x378   :  { %v1948_v8 = vor.u32 %v1947_v32, %v1946_v7  ;;  %v5127_v12 = vmul.f32 30.0, %v1882_v34  ;;  %vm1950_vm6 = vcmp.lt.s32.totalorder %v1930_v14, 2  ;;  %v3197_v52 = vpack.c.bf16 %v2646_v54, %v2645_v46  ;;  %v2652_v34 = vld [vmem:[#allocation5 + $0x38] sm:$0xff] }
 0x379   :  { %v1954_v27 = vsel %vm1952_vm10, %v1942_v4, 2102212464  ;;  %v1957_v48 = vsel %vm1949_vm7, %v1936_v37, %v1939_v20  ;;  %v1961_v9 = vsel %vm1949_vm7, %v1939_v20, %v1942_v4  ;;  %v1958_v36 = vsel %vm1952_vm10, %v1945_v24, 920167782 }
 0x37a   :  { %v1962_v58 = vsel %vm1952_vm10, %v1948_v8, 1326507024  ;;  %v1953_v22 = vsel %vm1949_vm7, %v1933_v63, %v1936_v37  ;;  %v1959_v51 = vsel %vm1951_vm5, %v1942_v4, %v1958_v36  ;;  %v1955_v16 = vsel %vm1951_vm5, %v1939_v20, %v1954_v27  ;;  %3198 = vmatpush3.bf16.msra.mxu0 %v3197_v52  ;;  %3228 = vmatpush3.bf16.msra.mxu1 %v3197_v52  ;;  %v2651_v8 = vld [vmem:[#allocation5 + $0x30] sm:$0xff] }
 0x37b   :  { %v1963_v21 = vsel %vm1951_vm5, %v1945_v24, %v1962_v58  ;;  %v1960_v50 = vsel %vm1950_vm6, %v1957_v48, %v1959_v51  ;;  %v2024_v45 = vand.u32 2139095040, %v5127_v12  ;;  %v1956_v2 = vsel %vm1950_vm6, %v1953_v22, %v1955_v16  ;;  %3199 = vmatprep.subr.bf16.mxu0 %v5783_v47  ;;  %3221 = vmatprep.subr.bf16.mxu1 %v5783_v47 }
 0x37c   :  { %v1964_v10 = vsel %vm1950_vm6, %v1961_v9, %v1963_v21  ;;  %v5134_v44 = vmul.u32.u64.low %v1965_v28, %v1960_v50  ;;  %v5135_v6 = vmul.u32.u64.high %v1965_v28, %v1960_v50, %v5134_v44  ;;  %v1972_v17 = vmul.u32 %v1965_v28, %v1956_v2  ;;  %v2653_v50 = vld [vmem:[#allocation5 + $0x40] sm:$0xff]  ;;  %v2655_v2 = vld [vmem:[#allocation5 + $0x50] sm:$0xff] }
 0x37d   :  { %v5131_v40 = vmul.u32.u64.low %v1965_v28, %v1964_v10  ;;  %v5132_v11 = vmul.u32.u64.high %v1965_v28, %v1964_v10, %v5131_v40  ;;  %v2025_v59 = vshrl.u32 %v2024_v45, 23  ;;  %v2021_v55 = vand.u32 2147483647, %v5127_v12  ;;  %v2654_v10 = vld [vmem:[#allocation5 + $0x48] sm:$0xff] }
 0x37e   :  { %v1975_v15 = vadd.s32 1, %v5135_v6  ;;  %v3200_v28 = vpack.c.bf16 %v2648_v0, %v2647_v26  ;;  %v3203_v24 = vpack.c.bf16 %v2650_v3, %v2649_v5  ;;  %v3206_v36 = vpack.c.bf16 %v2652_v34, %v2651_v8  ;;  %v2658_v8 = vld [vmem:[#allocation5 + $0x68] sm:$0xff] }
 0x37f   :  { %v2864_v30 = vadd.s32 4294967169, %v2025_v59  ;;  %vm1974_vm13 = vc.u32 %v5132_v11, %v5134_v44  ;;  %v2028_v61 = vand.u32 8388607, %v2021_v55 }
 0x380   :  { %v1976_v42 = vsel %vm1974_vm13, %v1975_v15, %v5135_v6  ;;  %3201 = vmatpush3.bf16.msra.mxu0 %v3200_v28  ;;  %3229 = vmatpush3.bf16.msra.mxu1 %v3200_v28  ;;  %v1973_v6 = vadd.s32 %v5134_v44, %v5132_v11 }
 0x381   :  { %v2031_v49 = vadd.s32 1, %v2864_v30  ;;  %v1977_v38 = vadd.s32 %v1976_v42, %v1972_v17  ;;  %3202 = vmatprep.subr.bf16.mxu0 %v5783_v47  ;;  %3222 = vmatprep.subr.bf16.mxu1 %v5783_v47  ;;  %v2029_v9 = vor.u32 8388608, %v2028_v61  ;;  %v2656_v30 = vld [vmem:[#allocation5 + $0x58] sm:$0xff] }
 0x383   :  { %vm2032_vm14 = vcmp.gt.s32.totalorder %v2031_v49, 0  ;;  %v1978_v29 = vadd.s32 536870912, %v1977_v38 }
 0x384   :  { %v2033_v56 = vsel %vm2032_vm14, %v2031_v49, 0  ;;  %3204 = vmatpush3.bf16.msra.mxu0 %v3203_v24  ;;  %3230 = vmatpush3.bf16.msra.mxu1 %v3203_v24  ;;  %v2657_v24 = vld [vmem:[#allocation5 + $0x60] sm:$0xff] }
 0x385   :  { %v2035_v14 = vand.u32 31, %v2033_v56  ;;  %v5143_v41 = vshrl.u32 %v1978_v29, 30  ;;  %v5147_v35 = vshrl.u32 %v2033_v56, 5  ;;  %3205 = vmatprep.subr.bf16.mxu0 %v5783_v47  ;;  %3223 = vmatprep.subr.bf16.mxu1 %v5783_v47  ;;  %v5190_v56 = vshll.u32 %v2029_v9, 8 }
 0x386   :  { %v3212_v29 = vpack.c.bf16 %v2656_v30, %v2655_v2 }
 0x387   :  { %v5145_v18 = vsub.s32 32, %v2035_v14  ;;  %v1980_v23 = vshll.u32 %v5143_v41, 30  ;;  %v2050_v32 = vshll.u32 %v5776_v39, %v2035_v14  ;;  %v2047_v20 = vshll.u32 %v5773_v1, %v2035_v14 }
 0x388   :  { %v2038_v63 = vshll.u32 %v3502_v33, %v2035_v14  ;;  %vm2056_vm1 = vcmp.lt.s32.totalorder %v5147_v35, 4  ;;  %v2041_v22 = vshll.u32 %v5772_v31, %v2035_v14  ;;  %v2044_v45 = vshll.u32 %v3501_v25, %v2035_v14  ;;  %3207 = vmatpush3.bf16.msra.mxu0 %v3206_v36  ;;  %3231 = vmatpush3.bf16.msra.mxu1 %v3206_v36 }
 0x389   :  { %v2048_v7 = vshrl.u32 %v5776_v39, %v5145_v18  ;;  %v2051_v37 = vshrl.u32 %v5780_v57, %v5145_v18  ;;  %v5160_v4 = vsub.s32 %v1977_v38, %v1980_v23  ;;  %v2039_v27 = vshrl.u32 %v5772_v31, %v5145_v18  ;;  %3208 = vmatprep.subr.bf16.mxu0 %v5783_v47 }
 0x38a   :  { %v2042_v51 = vshrl.u32 %v3501_v25, %v5145_v18  ;;  %v2045_v40 = vshrl.u32 %v5773_v1, %v5145_v18  ;;  %vm2053_vm3 = vcmp.lt.s32.totalorder %v5147_v35, 1  ;;  %vm2055_vm15 = vcmp.lt.s32.totalorder %v5147_v35, 3  ;;  %3224 = vmatprep.subr.bf16.mxu1 %v5783_v47 }
 0x38b   :  { %v2052_v62 = vor.u32 %v2051_v37, %v2050_v32  ;;  %v2049_v43 = vor.u32 %v2048_v7, %v2047_v20  ;;  %v1983_v48 = vsub.s32 0, %v5160_v4  ;;  %v2040_v58 = vor.u32 %v2039_v27, %v2038_v63 }
 0x38c   :  { %v2043_v15 = vor.u32 %v2042_v51, %v2041_v22  ;;  %v2046_v49 = vor.u32 %v2045_v40, %v2044_v45  ;;  %v3209_v38 = vpack.c.bf16 %v2654_v10, %v2653_v50  ;;  %v2037_v52 = vshrl.u32 %v3502_v33, %v5145_v18  ;;  %v2659_v10 = vld [vmem:[#allocation5 + $0x70] sm:$0xff]  ;;  %v2660_v45 = vld [vmem:[#allocation5 + $0x78] sm:$0xff] }
 0x38d   :  { %v2861_v21 = vmin.u32 %v1983_v48, %v5160_v4  ;;  %v2066_v16 = vsel %vm2056_vm1, %v2052_v62, 1326507024  ;;  %v2062_v59 = vsel %vm2056_vm1, %v2049_v43, 920167782  ;;  %vm2054_vm2 = vcmp.lt.s32.totalorder %v5147_v35, 2 }
 0x38e   :  { %v2061_v11 = vsel %vm2053_vm3, %v2040_v58, %v2043_v15  ;;  %v2067_v44 = vsel %vm2055_vm15, %v2049_v43, %v2066_v16  ;;  %v2063_v14 = vsel %vm2055_vm15, %v2046_v49, %v2062_v59  ;;  %v2058_v0 = vsel %vm2056_vm1, %v2046_v49, 2102212464  ;;  %3210 = vmatpush3.bf16.msra.mxu0 %v3209_v38  ;;  %3232 = vmatpush3.bf16.msra.mxu1 %v3209_v38 }
 0x38f   :  { %v1985_v17 = vclz %v2861_v21  ;;  %v1886_v42 = vpop.f32.mrb[18].mxu0  ;;  %v2065_v28 = vsel %vm2053_vm3, %v2043_v15, %v2046_v49  ;;  %v2064_v3 = vsel %vm2054_vm2, %v2061_v11, %v2063_v14  ;;  %v2057_v18 = vsel %vm2053_vm3, %v2037_v52, %v2040_v58  ;;  %3211 = vmatprep.subr.bf16.mxu0 %v5783_v47  ;;  %3225 = vmatprep.subr.bf16.mxu1 %v5783_v47 }
 0x390   :  { %v1887_v54 = vadd.f32 %v5104_v60, %v1886_v42  ;;  %v3082_v26 = vpop.f32.mrb[19].mxu0  ;;  %v2068_v61 = vsel %vm2054_vm2, %v2065_v28, %v2067_v44  ;;  %v2059_v34 = vsel %vm2055_vm15, %v2043_v15, %v2058_v0  ;;  %v3215_v58 = vpack.c.bf16 %v2658_v8, %v2657_v24 }
 0x391   :  { %v2862_v46 = vadd.s32 4294967294, %v1985_v17  ;;  %v5213_v7 = vmul.u32.u64.low %v5190_v56, %v2068_v61  ;;  %v5214_v32 = vmul.u32.u64.high %v5190_v56, %v2068_v61, %v5213_v7  ;;  %v2003_v22 = vsub.s32 4, %v5143_v41 }
 0x392   :  { %v5204_v5 = vmul.f32 30.0, %v1887_v54  ;;  %v5222_v43 = vmul.u32.u64.low %v5190_v56, %v2064_v3  ;;  %v5223_v63 = vmul.u32.u64.high %v5190_v56, %v2064_v3, %v5222_v43  ;;  %v2060_v51 = vsel %vm2054_vm2, %v2057_v18, %v2059_v34  ;;  %3213 = vmatpush3.bf16.msra.mxu0 %v3212_v29  ;;  %3233 = vmatpush3.bf16.msra.mxu1 %v3212_v29 }
 0x393   :  { %vm2863_vm11 = vcmp.lt.s32.totalorder %v2862_v46, 0  ;;  %3214 = vmatprep.subr.bf16.mxu0 %v5783_v47  ;;  %3226 = vmatprep.subr.bf16.mxu1 %v5783_v47  ;;  %v3218_v59 = vpack.c.bf16 %v2660_v45, %v2659_v10  ;;  %v2004_v2 = vsel %vm1919_vm8, %v2003_v22, %v5143_v41  ;;  %vm2009_vm15 = vweird.f32 %v5107_v53 }
 0x394   :  { %v1988_v23 = vsel %vm2863_vm11, 0, %v2862_v46  ;;  %v2128_v62 = vand.u32 2139095040, %v5204_v5  ;;  %vm2078_vm12 = vc.u32 %v5214_v32, %v5222_v43  ;;  %v2125_v41 = vand.u32 2147483647, %v5204_v5 }
 0x395   :  { %v1989_v37 = vsub.s32 32, %v1988_v23  ;;  %v1993_v20 = vsub.s32 4294967266, %v1988_v23  ;;  %v1990_v27 = vshll.u32 %v5160_v4, %v1988_v23  ;;  %v2079_v4 = vadd.s32 1, %v5223_v63 }
 0x396   :  { %v2129_v36 = vshrl.u32 %v2128_v62, 23  ;;  %3216 = vmatpush3.bf16.msra.mxu0 %v3215_v58  ;;  %3234 = vmatpush3.bf16.msra.mxu1 %v3215_v58 }
 0x397   :  { %v1991_v48 = vshrl.u32 %v1973_v6, %v1989_v37  ;;  %v1994_v9 = vadd.s32 127, %v1993_v20  ;;  %v2076_v6 = vmul.u32 %v5190_v56, %v2060_v51  ;;  %v2080_v30 = vsel %vm2078_vm12, %v2079_v4, %v5223_v63  ;;  %3217 = vmatprep.subr.bf16.mxu0 %v5783_v47  ;;  %3227 = vmatprep.subr.bf16.mxu1 %v5783_v47 }
 0x398   :  { %v2868_v50 = vadd.s32 4294967169, %v2129_v36  ;;  %v2006_v56 = vsel %vm5243_vm4, 0, %v2004_v2  ;;  %v2132_v47 = vand.u32 8388607, %v2125_v41  ;;  %vm2023_vm12 = vcmp.lt.s32.totalorder %v5127_v12, 0 }
 0x399   :  { %v1992_v21 = vor.u32 %v1991_v48, %v1990_v27  ;;  %v1995_v16 = vshll.u32 %v1994_v9, 23  ;;  %v2081_v49 = vadd.s32 %v2080_v30, %v2076_v6  ;;  %v2010_v14 = vadd.s32 3, %v2006_v56 }
 0x39a   :  { %v2135_v40 = vadd.s32 1, %v2868_v50  ;;  %3219 = vmatpush3.bf16.msra.mxu0 %v3218_v59  ;;  %3235 = vmatpush3.bf16.msra.mxu1 %v3218_v59  ;;  %v2133_v51 = vor.u32 8388608, %v2132_v47 }
 0x39b   :  { %v1996_v35 = vor.u32 4788187, %v1995_v16  ;;  %v1999_v17 = vcvt.s32.f32 %v1992_v21  ;;  %v2082_v46 = vadd.s32 536870912, %v2081_v49  ;;  %v2011_v27 = vand.u32 3, %v2010_v14 }
 0x39c   :  { %vm2136_vm9 = vcmp.gt.s32.totalorder %v2135_v40, 0 }
 0x39d   :  { %v1997_v15 = vand.u32 2147483647, %v1996_v35  ;;  %v2137_v38 = vsel %vm2136_vm9, %v2135_v40, 0  ;;  %v5255_v52 = vshrl.u32 %v2082_v46, 30  ;;  %vm2012_vm5 = vcmp.lt.s32.totalorder %v2011_v27, 2 }
 0x39e   :  { %v2139_v44 = vand.u32 31, %v2137_v38  ;;  %v5252_v54 = vshrl.u32 %v2137_v38, 5  ;;  %vm2013_vm6 = vcmp.eq.s32.totalorder %v2011_v27, 0  ;;  %vm2016_vm14 = vcmp.eq.s32.totalorder %v2011_v27, 2 }
 0x39f   :  { %v2000_v11 = vmul.f32 %v1999_v17, %v1997_v15  ;;  %v2084_v18 = vshll.u32 %v5255_v52, 30  ;;  %v2173_v38 = vshll.u32 %v2133_v51, 8 }
 0x3a0   :  { %v2140_v13 = vsub.s32 32, %v2139_v44  ;;  %v2151_v29 = vshll.u32 %v5773_v1, %v2139_v44  ;;  %v2154_v3 = vshll.u32 %v5776_v39, %v2139_v44  ;;  %vm2160_vm7 = vcmp.lt.s32.totalorder %v5252_v54, 4 }
 0x3a1   :  { %v2001_v26 = vxor.u32 2147483648, %v2000_v11  ;;  %v2142_v20 = vshll.u32 %v3502_v33, %v2139_v44  ;;  %v5272_v8 = vsub.s32 %v2081_v49, %v2084_v18  ;;  %v2145_v34 = vshll.u32 %v5772_v31, %v2139_v44 }
 0x3a2   :  { %v2152_v28 = vshrl.u32 %v5776_v39, %v2140_v13  ;;  %v2155_v61 = vshrl.u32 %v5780_v57, %v2140_v13  ;;  %v2143_v7 = vshrl.u32 %v5772_v31, %v2140_v13  ;;  %v2146_v62 = vshrl.u32 %v3501_v25, %v2140_v13 }
 0x3a3   :  { %v2002_v0 = vsel %vm1919_vm8, %v2001_v26, %v2000_v11  ;;  %v2087_v9 = vsub.s32 0, %v5272_v8  ;;  %v2148_v58 = vshll.u32 %v3501_v25, %v2139_v44  ;;  %v2149_v22 = vshrl.u32 %v5773_v1, %v2140_v13 }
 0x3a4   :  { %v2005_v23 = vsel %vm5243_vm4, %v5107_v53, %v2002_v0  ;;  %v2156_v37 = vor.u32 %v2155_v61, %v2154_v3  ;;  %v2153_v24 = vor.u32 %v2152_v28, %v2151_v29  ;;  %v2144_v48 = vor.u32 %v2143_v7, %v2142_v20 }
 0x3a5   :  { %3390 = vcosq.f32 %v2005_v23  ;;  %v2147_v36 = vor.u32 %v2146_v62, %v2145_v34  ;;  %v2865_v50 = vmin.u32 %v2087_v9, %v5272_v8  ;;  %v2150_v10 = vor.u32 %v2149_v22, %v2148_v58 }
 0x3a6   :  { %3392 = vsinq.f32 %v2005_v23  ;;  %v2170_v63 = vsel %vm2160_vm7, %v2156_v37, 1326507024  ;;  %v2166_v21 = vsel %vm2160_vm7, %v2153_v24, 920167782  ;;  %vm2159_vm10 = vcmp.lt.s32.totalorder %v5252_v54, 3 }
 0x3a7   :  { %vm2157_vm13 = vcmp.lt.s32.totalorder %v5252_v54, 1  ;;  %v2171_v35 = vsel %vm2159_vm10, %v2153_v24, %v2170_v63  ;;  %v2089_v40 = vclz %v2865_v50  ;;  %v2141_v6 = vshrl.u32 %v3502_v33, %v2140_v13 }
 0x3a8   :  { %v2165_v59 = vsel %vm2157_vm13, %v2144_v48, %v2147_v36  ;;  %vm2158_vm1 = vcmp.lt.s32.totalorder %v5252_v54, 2  ;;  %v2167_v30 = vsel %vm2159_vm10, %v2150_v10, %v2166_v21  ;;  %v2169_v15 = vsel %vm2157_vm13, %v2147_v36, %v2150_v10 }
 0x3a9   :  { %v2866_v17 = vadd.s32 4294967294, %v2089_v40  ;;  %v2162_v49 = vsel %vm2160_vm7, %v2150_v10, 2102212464  ;;  %v2172_v42 = vsel %vm2158_vm1, %v2169_v15, %v2171_v35  ;;  %v2161_v46 = vsel %vm2157_vm13, %v2141_v6, %v2144_v48 }
 0x3aa   :  { %v2168_v26 = vsel %vm2158_vm1, %v2165_v59, %v2167_v30  ;;  %v5308_v14 = vmul.u32.u64.low %v2173_v38, %v2172_v42  ;;  %v5309_v47 = vmul.u32.u64.high %v2173_v38, %v2172_v42, %v5308_v14  ;;  %v2163_v61 = vsel %vm2159_vm10, %v2147_v36, %v2162_v49 }
 0x3ab   :  { %vm2867_vm3 = vcmp.lt.s32.totalorder %v2866_v17, 0  ;;  %v5316_v7 = vmul.u32.u64.low %v2173_v38, %v2168_v26  ;;  %v5317_v37 = vmul.u32.u64.high %v2173_v38, %v2168_v26, %v5316_v7  ;;  %v2077_v24 = vadd.s32 %v5222_v43, %v5214_v32 }
 0x3ac   :  { %v2092_v18 = vsel %vm2867_vm3, 0, %v2866_v17  ;;  %v2164_v9 = vsel %vm2158_vm1, %v2161_v46, %v2163_v61  ;;  %vm2022_vm10 = vcmp.le.f32.partialorder %v2021_v55, 0.7853982  ;;  %vm2127_vm1 = vcmp.lt.s32.totalorder %v5204_v5, 0 }
 0x3ad   :  { %v1891_v16 = vpop.f32.mrb[20].mxu0  ;;  %v2093_v34 = vsub.s32 32, %v2092_v18  ;;  %v2097_v48 = vsub.s32 4294967266, %v2092_v18  ;;  %v2094_v22 = vshll.u32 %v5272_v8, %v2092_v18  ;;  %vm2182_vm2 = vc.u32 %v5309_v47, %v5316_v7 }
 0x3ae   :  { %v1892_v45 = vadd.f32 %v5104_v60, %v1891_v16  ;;  %v3085_v4 = vpop.f32.mrb[21].mxu0  ;;  %v2183_v32 = vadd.s32 1, %v5317_v37  ;;  %v2180_v8 = vmul.u32 %v2173_v38, %v2164_v9 }
 0x3af   :  { %v3391_v11 = vpop.eup %3390  ;;  %v2095_v51 = vshrl.u32 %v2077_v24, %v2093_v34  ;;  %v2098_v16 = vadd.s32 127, %v2097_v48  ;;  %v2107_v4 = vsub.s32 4, %v5255_v52 }
 0x3b0   :  { %v5291_v2 = vmul.f32 30.0, %v1892_v45  ;;  %v3393_v13 = vpop.eup %3392  ;;  %v2017_v29 = vxor.u32 2147483648, %v3391_v11  ;;  %v2184_v27 = vsel %vm2182_vm2, %v2183_v32, %v5317_v37  ;;  %vm5394_vm2 = vcmp.le.f32.partialorder %v2125_v41, 0.7853982 }
 0x3b1   :  { %v2014_v3 = vxor.u32 2147483648, %v3393_v13  ;;  %v2096_v53 = vor.u32 %v2095_v51, %v2094_v22  ;;  %v2099_v54 = vshll.u32 %v2098_v16, 23  ;;  %v2185_v59 = vadd.s32 %v2184_v27, %v2180_v8 }
 0x3b2   :  { %v2229_v44 = vand.u32 2147483647, %v5291_v2  ;;  %v2232_v56 = vand.u32 2139095040, %v5291_v2  ;;  %v2018_v23 = vsel %vm2016_vm14, %v2017_v29, %v3393_v13  ;;  %vm2113_vm14 = vweird.f32 %v5127_v12 }
 0x3b3   :  { %v2015_v62 = vsel %vm2013_vm6, %v3391_v11, %v2014_v3  ;;  %v2100_v40 = vor.u32 4788187, %v2099_v54  ;;  %v2103_v6 = vcvt.s32.f32 %v2096_v53  ;;  %v2186_v61 = vadd.s32 536870912, %v2185_v59 }
 0x3b4   :  { %v2233_v0 = vshrl.u32 %v2232_v56, 23  ;;  %v2236_v28 = vand.u32 8388607, %v2229_v44  ;;  %v2019_v63 = vsel %vm2012_vm5, %v2015_v62, %v2018_v23 }
 0x3b5   :  { %v2020_v58 = vsel %vm2009_vm15, nan, %v2019_v63 }
 0x3b6   :  { %v2872_v20 = vadd.s32 4294967169, %v2233_v0  ;;  %v2237_v21 = vor.u32 8388608, %v2236_v28  ;;  %3128 = vmatmul.mubr.f32.vlgmr.msra.gmra.mrb[28].mxu0 %v2020_v58  ;;  %v2101_v0 = vand.u32 2147483647, %v2100_v40  ;;  %v2187_v58 = vshrl.u32 %v2186_v61, 30 }
 0x3b7   :  { %3130 = vmatprep.mubr.msk.f32.mxu0 %vm3495_vm0, %v5775_v19 }
 0x3b8   :  { %v2239_v36 = vadd.s32 1, %v2872_v20  ;;  %v5334_v45 = vshll.u32 %v2237_v21, 8  ;;  %v2104_v34 = vmul.f32 %v2103_v6, %v2101_v0  ;;  %v2188_v40 = vshll.u32 %v2187_v58, 30 }
 0x3ba   :  { %vm2240_vm11 = vcmp.gt.s32.totalorder %v2239_v36, 0  ;;  %v2105_v8 = vxor.u32 2147483648, %v2104_v34 }
 0x3bb   :  { %v2241_v43 = vsel %vm2240_vm11, %v2239_v36, 0 }
 0x3bc   :  { %v2243_v50 = vand.u32 31, %v2241_v43  ;;  %v2242_v10 = vshrl.u32 %v2241_v43, 5 }
 0x3be   :  { %v2244_v35 = vsub.s32 32, %v2243_v50  ;;  %v2246_v30 = vshll.u32 %v3502_v33, %v2243_v50  ;;  %v2249_v15 = vshll.u32 %v5772_v31, %v2243_v50  ;;  %v2252_v17 = vshll.u32 %v3501_v25, %v2243_v50 }
 0x3bf   :  { %v2255_v49 = vshll.u32 %v5773_v1, %v2243_v50  ;;  %v2258_v56 = vshll.u32 %v5776_v39, %v2243_v50  ;;  %vm2261_vm8 = vcmp.lt.s32.totalorder %v2242_v10, 1  ;;  %vm2262_vm9 = vcmp.lt.s32.totalorder %v2242_v10, 2 }
 0x3c0   :  { %v2247_v42 = vshrl.u32 %v5772_v31, %v2244_v35  ;;  %v2250_v38 = vshrl.u32 %v3501_v25, %v2244_v35  ;;  %v2253_v11 = vshrl.u32 %v5773_v1, %v2244_v35  ;;  %v2256_v46 = vshrl.u32 %v5776_v39, %v2244_v35 }
 0x3c1   :  { %v2259_v26 = vshrl.u32 %v5780_v57, %v2244_v35  ;;  %vm2264_vm4 = vcmp.lt.s32.totalorder %v2242_v10, 4  ;;  %v2245_v23 = vshrl.u32 %v3502_v33, %v2244_v35  ;;  %vm2263_vm7 = vcmp.lt.s32.totalorder %v2242_v10, 3 }
 0x3c2   :  { %v2248_v13 = vor.u32 %v2247_v42, %v2246_v30  ;;  %v2251_v29 = vor.u32 %v2250_v38, %v2249_v15  ;;  %v2254_v14 = vor.u32 %v2253_v11, %v2252_v17  ;;  %v2257_v28 = vor.u32 %v2256_v46, %v2255_v49 }
 0x3c3   :  { %v2260_v3 = vor.u32 %v2259_v26, %v2258_v56  ;;  %v1896_v36 = vpop.f32.mrb[22].mxu0  ;;  %v2108_v35 = vsel %vm2023_vm12, %v2107_v4, %v5255_v52  ;;  %v2106_v15 = vsel %vm2023_vm12, %v2105_v8, %v2104_v34  ;;  %v5374_v17 = vsub.s32 %v2185_v59, %v2188_v40 }
 0x3c4   :  { %v2266_v18 = vsel %vm2264_vm4, %v2254_v14, 2102212464  ;;  %v2269_v37 = vsel %vm2261_vm8, %v2248_v13, %v2251_v29  ;;  %v2273_v20 = vsel %vm2261_vm8, %v2251_v29, %v2254_v14  ;;  %v2270_v62 = vsel %vm2264_vm4, %v2257_v28, 920167782  ;;  %v3088_v32 = vpop.f32.mrb[23].mxu0 }
 0x3c5   :  { %v2274_v24 = vsel %vm2264_vm4, %v2260_v3, 1326507024  ;;  %v2265_v63 = vsel %vm2261_vm8, %v2245_v23, %v2248_v13  ;;  %v2271_v48 = vsel %vm2263_vm7, %v2254_v14, %v2270_v62  ;;  %v2267_v22 = vsel %vm2263_vm7, %v2251_v29, %v2266_v18 }
 0x3c6   :  { %v2275_v9 = vsel %vm2263_vm7, %v2257_v28, %v2274_v24  ;;  %v2272_v51 = vsel %vm2262_vm9, %v2269_v37, %v2271_v48  ;;  %v1897_v16 = vadd.f32 %v5104_v60, %v1896_v36  ;;  %v2268_v6 = vsel %vm2262_vm9, %v2265_v63, %v2267_v22 }
 0x3c7   :  { %v2276_v21 = vsel %vm2262_vm9, %v2273_v20, %v2275_v9  ;;  %v5360_v54 = vmul.u32.u64.low %v5334_v45, %v2272_v51  ;;  %v5361_v27 = vmul.u32.u64.high %v5334_v45, %v2272_v51, %v5360_v54  ;;  %v2109_v42 = vsel %vm2022_vm10, %v5127_v12, %v2106_v15 }
 0x3c8   :  { %v5356_v53 = vmul.u32.u64.low %v5334_v45, %v2276_v21  ;;  %v5357_v43 = vmul.u32.u64.high %v5334_v45, %v2276_v21, %v5356_v53  ;;  %v5363_v50 = vmul.f32 30.0, %v1897_v16  ;;  %v2110_v52 = vsel %vm2022_vm10, 0, %v2108_v35 }
 0x3c9   :  { %v2287_v49 = vadd.s32 1, %v5361_v27  ;;  %v2284_v10 = vmul.u32 %v5334_v45, %v2268_v6  ;;  %3394 = vcosq.f32 %v2109_v42  ;;  %v2191_v38 = vsub.s32 0, %v5374_v17 }
 0x3ca   :  { %v2336_v30 = vand.u32 2139095040, %v5363_v50  ;;  %vm2286_vm5 = vc.u32 %v5357_v43, %v5360_v54  ;;  %3396 = vsinq.f32 %v2109_v42  ;;  %v2114_v59 = vadd.s32 3, %v2110_v52 }
 0x3cb   :  { %v2288_v55 = vsel %vm2286_vm5, %v2287_v49, %v5361_v27  ;;  %v2869_v46 = vmin.u32 %v2191_v38, %v5374_v17  ;;  %v2211_v3 = vsub.s32 4, %v2187_v58  ;;  %v2181_v63 = vadd.s32 %v5316_v7, %v5309_v47 }
 0x3cc   :  { %v2337_v4 = vshrl.u32 %v2336_v30, 23  ;;  %v2289_v11 = vadd.s32 %v2288_v55, %v2284_v10  ;;  %v2115_v0 = vand.u32 3, %v2114_v59  ;;  %v2333_v41 = vand.u32 2147483647, %v5363_v50 }
 0x3cd   :  { %v2193_v29 = vclz %v2869_v46  ;;  %v5402_v9 = vsel %vm2127_vm1, %v2211_v3, %v2187_v58  ;;  %v2285_v21 = vadd.s32 %v5360_v54, %v5357_v43  ;;  %vm2231_vm8 = vcmp.lt.s32.totalorder %v5291_v2, 0 }
 0x3ce   :  { %v2876_v56 = vadd.s32 4294967169, %v2337_v4  ;;  %v2290_v26 = vadd.s32 536870912, %v2289_v11  ;;  %vm2116_vm3 = vcmp.lt.s32.totalorder %v2115_v0, 2  ;;  %vm2117_vm15 = vcmp.eq.s32.totalorder %v2115_v0, 0 }
 0x3cf   :  { %v2870_v45 = vadd.s32 4294967294, %v2193_v29  ;;  %vm2120_vm11 = vcmp.eq.s32.totalorder %v2115_v0, 2  ;;  %v2214_v8 = vsel %vm5394_vm2, 0, %v5402_v9  ;;  %v5425_v49 = vand.u32 8388607, %v2333_v41 }
 0x3d0   :  { %v2343_v13 = vadd.s32 1, %v2876_v56  ;;  %v5383_v14 = vshrl.u32 %v2290_v26, 30  ;;  %vm5453_vm4 = vcmp.le.f32.partialorder %v2229_v44, 0.7853982 }
 0x3d1   :  { %vm2871_vm13 = vcmp.lt.s32.totalorder %v2870_v45, 0 }
 0x3d2   :  { %vm2344_vm6 = vcmp.gt.s32.totalorder %v2343_v13, 0  ;;  %v2292_v61 = vshll.u32 %v5383_v14, 30  ;;  %v2196_v18 = vsel %vm2871_vm13, 0, %v2870_v45  ;;  %v2315_v4 = vsub.s32 4, %v5383_v14 }
 0x3d3   :  { %v2345_v28 = vsel %vm2344_vm6, %v2343_v13, 0  ;;  %v3395_v37 = vpop.eup %3394  ;;  %v2197_v48 = vsub.s32 32, %v2196_v18  ;;  %v2201_v53 = vsub.s32 4294967266, %v2196_v18  ;;  %v2198_v43 = vshll.u32 %v5374_v17, %v2196_v18 }
 0x3d4   :  { %v5386_v23 = vand.u32 31, %v2345_v28  ;;  %v5390_v20 = vsub.s32 %v2289_v11, %v2292_v61  ;;  %v3397_v24 = vpop.eup %3396  ;;  %v2121_v34 = vxor.u32 2147483648, %v3395_v37  ;;  %v5415_v35 = vshrl.u32 %v2345_v28, 5 }
 0x3d5   :  { %v2118_v51 = vxor.u32 2147483648, %v3397_v24  ;;  %v2199_v32 = vshrl.u32 %v2181_v63, %v2197_v48  ;;  %v2202_v54 = vadd.s32 127, %v2201_v53 }
 0x3d6   :  { %v2295_v36 = vsub.s32 0, %v5390_v20  ;;  %v5406_v22 = vsub.s32 32, %v5386_v23  ;;  %v2122_v27 = vsel %vm2120_vm11, %v2121_v34, %v3397_v24  ;;  %v2359_v17 = vshll.u32 %v5773_v1, %v5386_v23 }
 0x3d7   :  { %v1901_v16 = vpop.f32.mrb[24].mxu0  ;;  %v2119_v40 = vsel %vm2117_vm15, %v3395_v37, %v2118_v51  ;;  %v2200_v52 = vor.u32 %v2199_v32, %v2198_v43  ;;  %v2203_v10 = vshll.u32 %v2202_v54, 23  ;;  %v2362_v56 = vshll.u32 %v5776_v39, %v5386_v23 }
 0x3d8   :  { %v2873_v47 = vmin.u32 %v2295_v36, %v5390_v20  ;;  %v1902_v7 = vadd.f32 %v5104_v60, %v1901_v16  ;;  %v3091_v58 = vpop.f32.mrb[25].mxu0  ;;  %v2360_v30 = vshrl.u32 %v5776_v39, %v5406_v22  ;;  %v2123_v42 = vsel %vm2116_vm3, %v2119_v40, %v2122_v27 }
 0x3d9   :  { %v2124_v11 = vsel %vm2113_vm14, nan, %v2123_v42  ;;  %v2363_v59 = vshrl.u32 %v5780_v57, %v5406_v22  ;;  %vm2368_vm12 = vcmp.lt.s32.totalorder %v5415_v35, 4  ;;  %v2204_v46 = vor.u32 4788187, %v2203_v10 }
 0x3da   :  { %v2297_v6 = vclz %v2873_v47  ;;  %v5421_v15 = vmul.f32 30.0, %v1902_v7  ;;  %3131 = vmatmul.mubr.f32.gmra.mrb[30].mxu0 %v2124_v11  ;;  %v2361_v26 = vor.u32 %v2360_v30, %v2359_v17  ;;  %v2351_v12 = vshrl.u32 %v5772_v31, %v5406_v22 }
 0x3db   :  { %3133 = vmatprep.mubr.msk.f32.mxu0 %vm3495_vm0, %v5775_v19  ;;  %v2205_v0 = vand.u32 2147483647, %v2204_v46  ;;  %v2207_v45 = vcvt.s32.f32 %v2200_v52  ;;  %v2354_v28 = vshrl.u32 %v3501_v25, %v5406_v22  ;;  %v2350_v37 = vshll.u32 %v3502_v33, %v5386_v23 }
 0x3dc   :  { %v2874_v38 = vadd.s32 4294967294, %v2297_v6  ;;  %v2440_v55 = vand.u32 2139095040, %v5421_v15  ;;  %v2364_v34 = vor.u32 %v2363_v59, %v2362_v56  ;;  %v2353_v48 = vshll.u32 %v5772_v31, %v5386_v23 }
 0x3dd   :  { %v2208_v63 = vmul.f32 %v2207_v45, %v2205_v0  ;;  %v2352_v32 = vor.u32 %v2351_v12, %v2350_v37  ;;  %v2357_v7 = vshrl.u32 %v5773_v1, %v5406_v22  ;;  %v2374_v44 = vsel %vm2368_vm12, %v2361_v26, 920167782 }
 0x3de   :  { %vm2875_vm9 = vcmp.lt.s32.totalorder %v2874_v38, 0  ;;  %v2441_v13 = vshrl.u32 %v2440_v55, 23  ;;  %v2355_v47 = vor.u32 %v2354_v28, %v2353_v48  ;;  %v2218_v43 = vadd.s32 3, %v2214_v8 }
 0x3df   :  { %v2300_v29 = vsel %vm2875_vm9, 0, %v2874_v38  ;;  %v2209_v53 = vxor.u32 2147483648, %v2208_v63  ;;  %v2341_v30 = vor.u32 8388608, %v5425_v49  ;;  %vm2365_vm10 = vcmp.lt.s32.totalorder %v5415_v35, 1 }
 0x3e0   :  { %v2301_v3 = vsub.s32 32, %v2300_v29  ;;  %v2305_v61 = vsub.s32 4294967266, %v2300_v29  ;;  %v2880_v18 = vadd.s32 4294967169, %v2441_v13  ;;  %v2302_v24 = vshll.u32 %v5390_v20, %v2300_v29 }
 0x3e1   :  { %v2356_v20 = vshll.u32 %v3501_v25, %v5386_v23  ;;  %vm2367_vm5 = vcmp.lt.s32.totalorder %v5415_v35, 3  ;;  %v2316_v42 = vsel %vm2231_vm8, %v2315_v4, %v5383_v14  ;;  %v2373_v52 = vsel %vm2365_vm10, %v2352_v32, %v2355_v47 }
 0x3e2   :  { %v2303_v36 = vshrl.u32 %v2285_v21, %v2301_v3  ;;  %v2306_v51 = vadd.s32 127, %v2305_v61  ;;  %v2447_v16 = vadd.s32 1, %v2880_v18  ;;  %v2210_v21 = vsel %vm2127_vm1, %v2209_v53, %v2208_v63 }
 0x3e3   :  { %v2358_v54 = vor.u32 %v2357_v7, %v2356_v20  ;;  %v2213_v23 = vsel %vm5394_vm2, %v5204_v5, %v2210_v21  ;;  %v2378_v38 = vsel %vm2368_vm12, %v2364_v34, 1326507024  ;;  %v5482_v62 = vand.u32 3, %v2218_v43 }
 0x3e4   :  { %v2304_v58 = vor.u32 %v2303_v36, %v2302_v24  ;;  %v2307_v27 = vshll.u32 %v2306_v51, 23  ;;  %vm2448_vm7 = vcmp.gt.s32.totalorder %v2447_v16, 0  ;;  %3398 = vcosq.f32 %v2213_v23 }
 0x3e5   :  { %v2449_v40 = vsel %vm2448_vm7, %v2447_v16, 0  ;;  %v2375_v8 = vsel %vm2367_vm5, %v2358_v54, %v2374_v44  ;;  %v2349_v55 = vshrl.u32 %v3502_v33, %v5406_v22  ;;  %vm2366_vm6 = vcmp.lt.s32.totalorder %v5415_v35, 2 }
 0x3e6   :  { %v2308_v6 = vor.u32 4788187, %v2307_v27  ;;  %v2311_v49 = vcvt.s32.f32 %v2304_v58  ;;  %v5480_v17 = vand.u32 31, %v2449_v40  ;;  %3400 = vsinq.f32 %v2213_v23 }
 0x3e7   :  { %v2370_v4 = vsel %vm2368_vm12, %v2358_v54, 2102212464  ;;  %v2376_v11 = vsel %vm2366_vm6, %v2373_v52, %v2375_v8  ;;  %v1906_v56 = vpop.f32.mrb[26].mxu0  ;;  %v2318_v59 = vsel %vm5453_vm4, 0, %v2316_v42  ;;  %v2377_v46 = vsel %vm2365_vm10, %v2355_v47, %v2358_v54 }
 0x3e8   :  { %v2309_v10 = vand.u32 2147483647, %v2308_v6  ;;  %v2379_v22 = vsel %vm2367_vm5, %v2361_v26, %v2378_v38  ;;  %v2381_v13 = vshll.u32 %v2341_v30, 8  ;;  %v5498_v29 = vsub.s32 32, %v5480_v17  ;;  %v3094_v45 = vpop.f32.mrb[27].mxu0 }
 0x3e9   :  { %v1907_v0 = vadd.f32 %v5104_v60, %v1906_v56  ;;  %v2369_v28 = vsel %vm2365_vm10, %v2349_v55, %v2352_v32  ;;  %v2371_v3 = vsel %vm2367_vm5, %v2355_v47, %v2370_v4  ;;  %v2380_v61 = vsel %vm2366_vm6, %v2377_v46, %v2379_v22 }
 0x3ea   :  { %v2312_v14 = vmul.f32 %v2311_v49, %v2309_v10  ;;  %v5507_v18 = vmul.u32.u64.low %v2381_v13, %v2376_v11  ;;  %v5508_v37 = vmul.u32.u64.high %v2381_v13, %v2376_v11, %v5507_v18  ;;  %v2322_v60 = vadd.s32 3, %v2318_v59 }
 0x3eb   :  { %v5513_v24 = vmul.f32 30.0, %v1907_v0  ;;  %v5518_v63 = vshrl.u32 %v2449_v40, 5  ;;  %vm2220_vm13 = vcmp.lt.s32.totalorder %v5482_v62, 2  ;;  %vm2217_vm14 = vweird.f32 %v5204_v5 }
 0x3ec   :  { %v2313_v12 = vxor.u32 2147483648, %v2312_v14  ;;  %v5521_v48 = vmul.u32.u64.low %v2381_v13, %v2380_v61  ;;  %v5522_v36 = vmul.u32.u64.high %v2381_v13, %v2380_v61, %v5521_v48  ;;  %vm2221_vm1 = vcmp.eq.s32.totalorder %v5482_v62, 0 }
 0x3ed   :  { %v2544_v51 = vand.u32 2139095040, %v5513_v24  ;;  %v2372_v16 = vsel %vm2366_vm6, %v2369_v28, %v2371_v3  ;;  %v2464_v9 = vshrl.u32 %v5776_v39, %v5498_v29  ;;  %vm2224_vm3 = vcmp.eq.s32.totalorder %v5482_v62, 2 }
 0x3ee   :  { %v2314_v26 = vsel %vm2231_vm8, %v2313_v12, %v2312_v14  ;;  %v2391_v32 = vadd.s32 1, %v5508_v37  ;;  %v2463_v53 = vshll.u32 %v5773_v1, %v5480_v17  ;;  %v2466_v47 = vshll.u32 %v5776_v39, %v5480_v17  ;;  %v3399_v58 = vpop.eup %3398 }
 0x3ef   :  { %v2317_v34 = vsel %vm5453_vm4, %v5291_v2, %v2314_v26  ;;  %v2545_v20 = vshrl.u32 %v2544_v51, 23  ;;  %v5537_v7 = vand.u32 3, %v2322_v60  ;;  %v2467_v35 = vshrl.u32 %v5780_v57, %v5498_v29 }
 0x3f0   :  { %3402 = vcosq.f32 %v2317_v34  ;;  %vm2472_vm15 = vcmp.lt.s32.totalorder %v5518_v63, 4  ;;  %v2388_v27 = vmul.u32 %v2381_v13, %v2372_v16  ;;  %vm2390_vm2 = vc.u32 %v5522_v36, %v5507_v18  ;;  %v3401_v44 = vpop.eup %3400 }
 0x3f1   :  { %3404 = vsinq.f32 %v2317_v34  ;;  %v2884_v40 = vadd.s32 4294967169, %v2545_v20  ;;  %v2225_v21 = vxor.u32 2147483648, %v3399_v58  ;;  %v2392_v43 = vsel %vm2390_vm2, %v2391_v32, %v5508_v37 }
 0x3f2   :  { %v2437_v54 = vand.u32 2147483647, %v5421_v15  ;;  %v2465_v6 = vor.u32 %v2464_v9, %v2463_v53  ;;  %v2222_v30 = vxor.u32 2147483648, %v3401_v44  ;;  %v2393_v23 = vadd.s32 %v2392_v43, %v2388_v27 }
 0x3f3   :  { %v2461_v42 = vshrl.u32 %v5773_v1, %v5498_v29  ;;  %v2551_v52 = vadd.s32 1, %v2884_v40  ;;  %v2226_v8 = vsel %vm2224_vm3, %v2225_v21, %v3401_v44  ;;  %vm2325_vm11 = vcmp.eq.s32.totalorder %v5537_v7, 0 }
 0x3f4   :  { %v2455_v10 = vshrl.u32 %v5772_v31, %v5498_v29  ;;  %v2458_v49 = vshrl.u32 %v3501_v25, %v5498_v29  ;;  %v2468_v38 = vor.u32 %v2467_v35, %v2466_v47  ;;  %v2223_v55 = vsel %vm2221_vm1, %v3399_v58, %v2222_v30 }
 0x3f5   :  { %vm2324_vm12 = vcmp.lt.s32.totalorder %v5537_v7, 2  ;;  %v2394_v14 = vadd.s32 536870912, %v2393_v23  ;;  %v2460_v4 = vshll.u32 %v3501_v25, %v5480_v17  ;;  %vm2552_vm8 = vcmp.gt.s32.totalorder %v2551_v52, 0 }
 0x3f6   :  { %v2227_v11 = vsel %vm2220_vm13, %v2223_v55, %v2226_v8  ;;  %vm2321_vm9 = vweird.f32 %v5291_v2  ;;  %v2454_v56 = vshll.u32 %v3502_v33, %v5480_v17  ;;  %v2457_v59 = vshll.u32 %v5772_v31, %v5480_v17 }
 0x3f7   :  { %v2553_v46 = vsel %vm2552_vm8, %v2551_v52, 0  ;;  %v2228_v22 = vsel %vm2217_vm14, nan, %v2227_v11  ;;  %v5569_v13 = vshrl.u32 %v2394_v14, 30  ;;  %v2462_v12 = vor.u32 %v2461_v42, %v2460_v4 }
 0x3f8   :  { %v5571_v45 = vand.u32 31, %v2553_v46  ;;  %3134 = vmatmul.mubr.f32.gmra.mrb[32].mxu0 %v2228_v22  ;;  %v2444_v62 = vand.u32 8388607, %v2437_v54  ;;  %v2456_v28 = vor.u32 %v2455_v10, %v2454_v56  ;;  %v2459_v3 = vor.u32 %v2458_v49, %v2457_v59 }
 0x3f9   :  { %v2478_v17 = vsel %vm2472_vm15, %v2465_v6, 920167782  ;;  %vm2328_vm4 = vcmp.eq.s32.totalorder %v5537_v7, 2  ;;  %v2396_v37 = vshll.u32 %v5569_v13, 30  ;;  %v2482_v26 = vsel %vm2472_vm15, %v2468_v38, 1326507024 }
 0x3fa   :  { %v3403_v0 = vpop.eup %3402  ;;  %v2453_v60 = vshrl.u32 %v3502_v33, %v5498_v29  ;;  %vm2469_vm7 = vcmp.lt.s32.totalorder %v5518_v63, 1  ;;  %vm2471_vm10 = vcmp.lt.s32.totalorder %v5518_v63, 3  ;;  %v2474_v16 = vsel %vm2472_vm15, %v2462_v12, 2102212464 }
 0x3fb   :  { %v3405_v61 = vpop.eup %3404  ;;  %v2329_v5 = vxor.u32 2147483648, %v3403_v0  ;;  %v2397_v51 = vsub.s32 %v2393_v23, %v2396_v37  ;;  %v5588_v9 = vsub.s32 32, %v5571_v45  ;;  %v2445_v32 = vor.u32 8388608, %v2444_v62 }
 0x3fc   :  { %v2326_v34 = vxor.u32 2147483648, %v3405_v61  ;;  %v2477_v53 = vsel %vm2469_vm7, %v2456_v28, %v2459_v3  ;;  %v2479_v47 = vsel %vm2471_vm10, %v2462_v12, %v2478_v17  ;;  %vm2470_vm5 = vcmp.lt.s32.totalorder %v5518_v63, 2 }
 0x3fd   :  { %v2330_v48 = vsel %vm2328_vm4, %v2329_v5, %v3405_v61  ;;  %v2399_v20 = vsub.s32 0, %v2397_v51  ;;  %v2481_v58 = vsel %vm2469_vm7, %v2459_v3, %v2462_v12  ;;  %v2473_v27 = vsel %vm2469_vm7, %v2453_v60, %v2456_v28 }
 0x3fe   :  { %v2327_v29 = vsel %vm2325_vm11, %v3403_v0, %v2326_v34  ;;  %v2475_v44 = vsel %vm2471_vm10, %v2459_v3, %v2474_v16  ;;  %v2483_v40 = vsel %vm2471_vm10, %v2465_v6, %v2482_v26  ;;  %v2480_v30 = vsel %vm2470_vm5, %v2477_v53, %v2479_v47 }
 0x3ff   :  { %v2331_v35 = vsel %vm2324_vm12, %v2327_v29, %v2330_v48  ;;  %v2877_v43 = vmin.u32 %v2399_v20, %v2397_v51  ;;  %v2484_v23 = vsel %vm2470_vm5, %v2481_v58, %v2483_v40  ;;  %v5607_v42 = vshrl.u32 %v2553_v46, 5 }
 0x400   :  { %v2332_v21 = vsel %vm2321_vm9, nan, %v2331_v35  ;;  %v2568_v7 = vshrl.u32 %v5776_v39, %v5588_v9  ;;  %v2485_v52 = vshll.u32 %v2445_v32, 8  ;;  %v2567_v6 = vshll.u32 %v5773_v1, %v5571_v45 }
 0x401   :  { %3137 = vmatmul.mubr.f32.vlgmr.msra.gmra.mrb[14].mxu1 %v2332_v21  ;;  %v2571_v2 = vshrl.u32 %v5780_v57, %v5588_v9  ;;  %v2401_v8 = vclz %v2877_v43  ;;  %v2476_v10 = vsel %vm2470_vm5, %v2473_v27, %v2475_v44  ;;  %v2570_v4 = vshll.u32 %v5776_v39, %v5571_v45 }
 0x402   :  { %3139 = vmatprep.mubr.msk.f32.mxu1 %vm3495_vm0, %v5775_v19  ;;  %v5619_v49 = vmul.u32.u64.low %v2485_v52, %v2484_v23  ;;  %v5620_v38 = vmul.u32.u64.high %v2485_v52, %v2484_v23, %v5619_v49  ;;  %v5622_v55 = vmul.u32.u64.low %v2485_v52, %v2480_v30  ;;  %v5623_v14 = vmul.u32.u64.high %v2485_v52, %v2480_v30, %v5622_v55 }
 0x403   :  { %v2878_v11 = vadd.s32 4294967294, %v2401_v8  ;;  %v2569_v56 = vor.u32 %v2568_v7, %v2567_v6  ;;  %vm2576_vm6 = vcmp.lt.s32.totalorder %v5607_v42, 4  ;;  %v2389_v57 = vadd.s32 %v5507_v18, %v5522_v36 }
 0x404   :  { %v2541_v63 = vand.u32 2147483647, %v5513_v24  ;;  %v2572_v59 = vor.u32 %v2571_v2, %v2570_v4  ;;  %v2492_v46 = vmul.u32 %v2485_v52, %v2476_v10  ;;  %v2559_v22 = vshrl.u32 %v5772_v31, %v5588_v9 }
 0x405   :  { %vm2879_vm13 = vcmp.lt.s32.totalorder %v2878_v11, 0  ;;  %vm2494_vm14 = vc.u32 %v5620_v38, %v5622_v55  ;;  %v2495_v39 = vadd.s32 1, %v5623_v14  ;;  %v2562_v0 = vshrl.u32 %v3501_v25, %v5588_v9 }
 0x406   :  { %v2404_v12 = vsel %vm2879_vm13, 0, %v2878_v11  ;;  %v2558_v18 = vshll.u32 %v3502_v33, %v5571_v45  ;;  %v2561_v36 = vshll.u32 %v5772_v31, %v5571_v45  ;;  %v2548_v17 = vand.u32 8388607, %v2541_v63 }
 0x407   :  { %v2405_v62 = vsub.s32 32, %v2404_v12  ;;  %v2409_v28 = vsub.s32 4294967266, %v2404_v12  ;;  %v2406_v3 = vshll.u32 %v2397_v51, %v2404_v12  ;;  %v2496_v61 = vsel %vm2494_vm14, %v2495_v39, %v5623_v14 }
 0x408   :  { %v2564_v5 = vshll.u32 %v3501_v25, %v5571_v45  ;;  %v2497_v60 = vadd.s32 %v2496_v61, %v2492_v46  ;;  %v2565_v34 = vshrl.u32 %v5773_v1, %v5588_v9  ;;  %v2582_v48 = vsel %vm2576_vm6, %v2569_v56, 920167782 }
 0x409   :  { %v2407_v37 = vshrl.u32 %v2389_v57, %v2405_v62  ;;  %v2410_v26 = vadd.s32 127, %v2409_v28  ;;  %v2586_v31 = vsel %vm2576_vm6, %v2572_v59, 1326507024  ;;  %v2560_v51 = vor.u32 %v2559_v22, %v2558_v18 }
 0x40a   :  { %v2563_v16 = vor.u32 %v2562_v0, %v2561_v36  ;;  %v2498_v47 = vadd.s32 536870912, %v2497_v60  ;;  %v2566_v29 = vor.u32 %v2565_v34, %v2564_v5  ;;  %v2549_v20 = vor.u32 8388608, %v2548_v17 }
 0x40b   :  { %v2408_v32 = vor.u32 %v2407_v37, %v2406_v3  ;;  %v2411_v53 = vshll.u32 %v2410_v26, 23  ;;  %vm2575_vm1 = vcmp.lt.s32.totalorder %v5607_v42, 3  ;;  %vm2573_vm3 = vcmp.lt.s32.totalorder %v5607_v42, 1 }
 0x40c   :  { %v5655_v45 = vshrl.u32 %v2498_v47, 30  ;;  %v2587_v1 = vsel %vm2575_vm1, %v2569_v56, %v2586_v31  ;;  %v2581_v58 = vsel %vm2573_vm3, %v2560_v51, %v2563_v16  ;;  %v2583_v35 = vsel %vm2575_vm1, %v2566_v29, %v2582_v48 }
 0x40d   :  { %v2412_v25 = vor.u32 4788187, %v2411_v53  ;;  %v2585_v27 = vsel %vm2573_vm3, %v2563_v16, %v2566_v29  ;;  %v2415_v40 = vcvt.s32.f32 %v2408_v32  ;;  %vm2574_vm15 = vcmp.lt.s32.totalorder %v5607_v42, 2 }
 0x40e   :  { %v2500_v21 = vshll.u32 %v5655_v45, 30  ;;  %v2419_v43 = vsub.s32 4, %v5569_v13  ;;  %v2578_v30 = vsel %vm2576_vm6, %v2566_v29, 2102212464  ;;  %v2588_v23 = vsel %vm2574_vm15, %v2585_v27, %v2587_v1 }
 0x40f   :  { %v2413_v44 = vand.u32 2147483647, %v2412_v25  ;;  %v2589_v7 = vshll.u32 %v2549_v20, 8  ;;  %v2557_v2 = vshrl.u32 %v3502_v33, %v5588_v9  ;;  %v2584_v8 = vsel %vm2574_vm15, %v2581_v58, %v2583_v35 }
 0x410   :  { %v2501_v6 = vsub.s32 %v2497_v60, %v2500_v21  ;;  %vm2335_vm2 = vcmp.lt.s32.totalorder %v5363_v50, 0  ;;  %v2579_v56 = vsel %vm2575_vm1, %v2563_v16, %v2578_v30  ;;  %vm2334_vm11 = vcmp.le.f32.partialorder %v2333_v41, 0.7853982 }
 0x411   :  { %v2416_v52 = vmul.f32 %v2415_v40, %v2413_v44  ;;  %v5678_v10 = vmul.u32.u64.low %v2589_v7, %v2588_v23  ;;  %v5679_v49 = vmul.u32.u64.high %v2589_v7, %v2588_v23, %v5678_v10  ;;  %v2577_v11 = vsel %vm2573_vm3, %v2557_v2, %v2560_v51 }
 0x412   :  { %v2503_v4 = vsub.s32 0, %v2501_v6  ;;  %v2420_v57 = vsel %vm2335_vm2, %v2419_v43, %v5569_v13  ;;  %v5686_v59 = vmul.u32.u64.low %v2589_v7, %v2584_v8  ;;  %v5687_v33 = vmul.u32.u64.high %v2589_v7, %v2584_v8, %v5686_v59 }
 0x413   :  { %v2417_v14 = vxor.u32 2147483648, %v2416_v52  ;;  %v2580_v12 = vsel %vm2574_vm15, %v2577_v11, %v2579_v56  ;;  %v2422_v39 = vsel %vm2334_vm11, 0, %v2420_v57  ;;  %v2493_v42 = vadd.s32 %v5622_v55, %v5620_v38 }
 0x414   :  { %v2881_v46 = vmin.u32 %v2503_v4, %v2501_v6  ;;  %vm2598_vm12 = vc.u32 %v5679_v49, %v5686_v59  ;;  %v2599_v13 = vadd.s32 1, %v5687_v33  ;;  %v2596_v28 = vmul.u32 %v2589_v7, %v2580_v12 }
 0x415   :  { %v2418_v9 = vsel %vm2335_vm2, %v2417_v14, %v2416_v52  ;;  %v2426_v18 = vadd.s32 3, %v2422_v39  ;;  %vm2425_vm10 = vweird.f32 %v5363_v50  ;;  %v2523_v21 = vsub.s32 4, %v5655_v45 }
 0x416   :  { %v2421_v22 = vsel %vm2334_vm11, %v5363_v50, %v2418_v9  ;;  %v2505_v0 = vclz %v2881_v46  ;;  %v2600_v41 = vsel %vm2598_vm12, %v2599_v13, %v5687_v33  ;;  %vm2439_vm5 = vcmp.lt.s32.totalorder %v5421_v15, 0 }
 0x417   :  { %3406 = vcosq.f32 %v2421_v22  ;;  %v2601_v36 = vadd.s32 %v2600_v41, %v2596_v28  ;;  %v2427_v37 = vand.u32 3, %v2426_v18  ;;  %vm2438_vm6 = vcmp.le.f32.partialorder %v2437_v54, 0.7853982 }
 0x418   :  { %3408 = vsinq.f32 %v2421_v22  ;;  %v2882_v62 = vadd.s32 4294967294, %v2505_v0  ;;  %v2524_v50 = vsel %vm2439_vm5, %v2523_v21, %v5655_v45  ;;  %v2597_v10 = vadd.s32 %v5686_v59, %v5679_v49 }
 0x419   :  { %v2602_v5 = vadd.s32 536870912, %v2601_v36  ;;  %vm2432_vm9 = vcmp.eq.s32.totalorder %v2427_v37, 2  ;;  %vm2428_vm4 = vcmp.lt.s32.totalorder %v2427_v37, 2  ;;  %vm2429_vm7 = vcmp.eq.s32.totalorder %v2427_v37, 0 }
 0x41a   :  { %vm2883_vm8 = vcmp.lt.s32.totalorder %v2882_v62, 0  ;;  %v2526_v2 = vsel %vm2438_vm6, 0, %v2524_v50  ;;  %vm2529_vm15 = vweird.f32 %v5421_v15  ;;  %vm2543_vm2 = vcmp.lt.s32.totalorder %v5513_v24, 0 }
 0x41b   :  { %v2508_v3 = vsel %vm2883_vm8, 0, %v2882_v62  ;;  %v5701_v48 = vshrl.u32 %v2602_v5, 30  ;;  %v2530_v11 = vadd.s32 3, %v2526_v2  ;;  %vm2542_vm11 = vcmp.le.f32.partialorder %v2541_v63, 0.7853982 }
 0x41c   :  { %v2509_v61 = vsub.s32 32, %v2508_v3  ;;  %v2513_v17 = vsub.s32 4294967266, %v2508_v3  ;;  %v2510_v26 = vshll.u32 %v2501_v6, %v2508_v3 }
 0x41d   :  { %v2604_v32 = vshll.u32 %v5701_v48, 30  ;;  %v2531_v45 = vand.u32 3, %v2530_v11  ;;  %v2627_v49 = vsub.s32 4, %v5701_v48 }
 0x41e   :  { %v2511_v60 = vshrl.u32 %v2493_v42, %v2509_v61  ;;  %v2514_v34 = vadd.s32 127, %v2513_v17 }
 0x41f   :  { %v2605_v38 = vsub.s32 %v2601_v36, %v2604_v32  ;;  %vm2536_vm14 = vcmp.eq.s32.totalorder %v2531_v45, 2  ;;  %vm2533_vm1 = vcmp.eq.s32.totalorder %v2531_v45, 0  ;;  %vm2532_vm3 = vcmp.lt.s32.totalorder %v2531_v45, 2 }
 0x420   :  { %v2512_v51 = vor.u32 %v2511_v60, %v2510_v26  ;;  %v2515_v16 = vshll.u32 %v2514_v34, 23  ;;  %v2628_v61 = vsel %vm2543_vm2, %v2627_v49, %v5701_v48 }
 0x421   :  { %v3407_v31 = vpop.eup %3406  ;;  %v2607_v35 = vsub.s32 0, %v2605_v38  ;;  %v2630_v5 = vsel %vm2542_vm11, 0, %v2628_v61 }
 0x422   :  { %v3409_v53 = vpop.eup %3408  ;;  %v2433_v47 = vxor.u32 2147483648, %v3407_v31  ;;  %v2516_v20 = vor.u32 4788187, %v2515_v16  ;;  %v2519_v58 = vcvt.s32.f32 %v2512_v51 }
 0x423   :  { %v2430_v29 = vxor.u32 2147483648, %v3409_v53  ;;  %v2885_v43 = vmin.u32 %v2607_v35, %v2605_v38 }
 0x424   :  { %v2434_v55 = vsel %vm2432_vm9, %v2433_v47, %v3409_v53  ;;  %v2517_v1 = vand.u32 2147483647, %v2516_v20 }
 0x425   :  { %v2431_v25 = vsel %vm2429_vm7, %v3407_v31, %v2430_v29  ;;  %v2609_v23 = vclz %v2885_v43 }
 0x426   :  { %v2435_v27 = vsel %vm2428_vm4, %v2431_v25, %v2434_v55  ;;  %v2520_v40 = vmul.f32 %v2519_v58, %v2517_v1  ;;  %vm2633_vm4 = vweird.f32 %v5513_v24 }
 0x427   :  { %v2436_v44 = vsel %vm2425_vm10, nan, %v2435_v27  ;;  %v2886_v52 = vadd.s32 4294967294, %v2609_v23 }
 0x428   :  { %3140 = vmatmul.mubr.f32.gmra.mrb[16].mxu1 %v2436_v44  ;;  %v2521_v30 = vxor.u32 2147483648, %v2520_v40 }
 0x429   :  { %3142 = vmatprep.mubr.msk.f32.mxu1 %vm3495_vm0, %v5775_v19  ;;  %vm2887_vm13 = vcmp.lt.s32.totalorder %v2886_v52, 0 }
 0x42a   :  { %v2522_v7 = vsel %vm2439_vm5, %v2521_v30, %v2520_v40  ;;  %v2612_v8 = vsel %vm2887_vm13, 0, %v2886_v52 }
 0x42b   :  { %v2525_v6 = vsel %vm2438_vm6, %v5421_v15, %v2522_v7  ;;  %v2613_v14 = vsub.s32 32, %v2612_v8  ;;  %v2617_v4 = vsub.s32 4294967266, %v2612_v8  ;;  %v2614_v56 = vshll.u32 %v2605_v38, %v2612_v8 }
 0x42c   :  { %3410 = vcosq.f32 %v2525_v6  ;;  %v2634_v15 = vadd.s32 3, %v2630_v5 }
 0x42d   :  { %3412 = vsinq.f32 %v2525_v6  ;;  %v2615_v57 = vshrl.u32 %v2597_v10, %v2613_v14  ;;  %v2618_v54 = vadd.s32 127, %v2617_v4 }
 0x42e   :  { %v2635_v37 = vand.u32 3, %v2634_v15 }
 0x42f   :  { %v2616_v33 = vor.u32 %v2615_v57, %v2614_v56  ;;  %v2619_v9 = vshll.u32 %v2618_v54, 23 }
 0x430   :  { %vm2640_vm12 = vcmp.eq.s32.totalorder %v2635_v37, 2  ;;  %vm2637_vm8 = vcmp.eq.s32.totalorder %v2635_v37, 0  ;;  %vm2636_vm9 = vcmp.lt.s32.totalorder %v2635_v37, 2 }
 0x431   :  { %v2620_v46 = vor.u32 4788187, %v2619_v9  ;;  %v2623_v39 = vcvt.s32.f32 %v2616_v33 }
 0x433   :  { %v2621_v12 = vand.u32 2147483647, %v2620_v46 }
 0x435   :  { %v2624_v28 = vmul.f32 %v2623_v39, %v2621_v12 }
 0x436   :  { %v3411_v22 = vpop.eup %3410 }
 0x437   :  { %v3413_v0 = vpop.eup %3412  ;;  %v2537_v13 = vxor.u32 2147483648, %v3411_v22  ;;  %v2625_v41 = vxor.u32 2147483648, %v2624_v28 }
 0x438   :  { %v2534_v62 = vxor.u32 2147483648, %v3413_v0 }
 0x439   :  { %v2538_v59 = vsel %vm2536_vm14, %v2537_v13, %v3413_v0  ;;  %v2626_v42 = vsel %vm2543_vm2, %v2625_v41, %v2624_v28 }
 0x43a   :  { %v2535_v18 = vsel %vm2533_vm1, %v3411_v22, %v2534_v62  ;;  %v2629_v17 = vsel %vm2542_vm11, %v5513_v24, %v2626_v42 }
 0x43b   :  { %v2539_v36 = vsel %vm2532_vm3, %v2535_v18, %v2538_v59  ;;  %3414 = vcosq.f32 %v2629_v17 }
 0x43c   :  { %v2540_v3 = vsel %vm2529_vm15, nan, %v2539_v36  ;;  %3416 = vsinq.f32 %v2629_v17 }
 0x43d   :  { %3143 = vmatmul.mubr.f32.gmra.mrb[18].mxu1 %v2540_v3 }
 0x43e   :  { %3145 = vmatprep.mubr.msk.f32.mxu1 %vm3495_vm0, %v5775_v19  ;;  %v2888_v19 = vld [vmem:[%s5749_s6] ss:$0 sm:$0xff]  ;;  %s3503_s6 = smov [#allocation7]  }
 0x43f   :  { %s2780_s24 = sshll.u32 %s3503_s6, 4  ;;  %s2781_s24 = int_to_ptr.vmem [resolvable:$true] %s2780_s24 }
 0x440   :  { %s3462_s3 = scalar_lea.vmem %s2781_s24, 896  ;;  %p3467_p3 = scmp.lt.s32.totalorder %s2781_s24, %s2781_s24 }
 0x441   :  { %p3463_p2 = scmp.ne.s32.totalorder %s2781_s24, %s3462_s3  ;;  %p3468_p4 = scmp.lt.s32.totalorder %s3462_s3, %s3462_s3 }
 0x443   :  { %p3469_p5 = por %p3468_p4, %p3467_p3 }
 0x445   :  { %v3415_v26 = vpop.eup %3414  ;;  %p3470_p6 = pnand %p3469_p5, %p3463_p2 }
 0x446   :  { %v3417_v60 = vpop.eup %3416  ;;  %v2641_v34 = vxor.u32 2147483648, %v3415_v26 }
 0x447   :  { %v2638_v31 = vxor.u32 2147483648, %v3417_v60 }
 0x448   :  { %v2642_v63 = vsel %vm2640_vm12, %v2641_v34, %v3417_v60 }
 0x449   :  { %v2639_v48 = vsel %vm2637_vm8, %v3415_v26, %v2638_v31 }
 0x44a   :  { %v2643_v51 = vsel %vm2636_vm9, %v2639_v48, %v2642_v63 }
 0x44b   :  { %v2644_v16 = vsel %vm2633_vm4, nan, %v2643_v51 }
 0x44c   :  { %3146 = vmatmul.mubr.f32.gmra.mrb[20].mxu1 %v2644_v16 }
 0x489   :  { %v2734_v32 = vpop.f32.mrb[28].mxu0 }
 0x48a   :  { %v2735_v53 = vadd.f32 %v2888_v19, %v2734_v32  ;;  %v3129_v47 = vpop.f32.mrb[29].mxu0 }
 0x48c   :  { %2768 = vst [vmem:[#allocation7] sm:$0xff] %v2735_v53 }
 0x4ad   :  { %v2739_v29 = vpop.f32.mrb[30].mxu0 }
 0x4ae   :  { %v2740_v20 = vadd.f32 %v2888_v19, %v2739_v29  ;;  %v3132_v38 = vpop.f32.mrb[31].mxu0 }
 0x4b0   :  { %2769 = vst [vmem:[#allocation7 + $0x8] sm:$0xff] %v2740_v20 }
 0x4cb   :  { %v2744_v55 = vpop.f32.mrb[32].mxu0 }
 0x4cc   :  { %v2745_v25 = vadd.f32 %v2888_v19, %v2744_v55  ;;  %v3135_v1 = vpop.f32.mrb[33].mxu0 }
 0x4ce   :  { %2770 = vst [vmem:[#allocation7 + $0x10] sm:$0xff] %v2745_v25 }
 0x4d4   :  { %v2749_v24 = vpop.f32.mrb[14].mxu1 }
 0x4d5   :  { %v2750_v58 = vadd.f32 %v2888_v19, %v2749_v24  ;;  %v3138_v35 = vpop.f32.mrb[15].mxu1 }
 0x4d7   :  { %2771 = vst [vmem:[#allocation7 + $0x18] sm:$0xff] %v2750_v58 }
 0x4fb   :  { %v2754_v27 = vpop.f32.mrb[16].mxu1 }
 0x4fc   :  { %v2755_v44 = vadd.f32 %v2888_v19, %v2754_v27  ;;  %v3141_v40 = vpop.f32.mrb[17].mxu1 }
 0x4fe   :  { %2772 = vst [vmem:[#allocation7 + $0x20] sm:$0xff] %v2755_v44 }
 0x510   :  { %v2759_v21 = vpop.f32.mrb[18].mxu1 }
 0x511   :  { %v2760_v43 = vadd.f32 %v2888_v19, %v2759_v21  ;;  %v3144_v30 = vpop.f32.mrb[19].mxu1 }
 0x513   :  { %2773 = vst [vmem:[#allocation7 + $0x28] sm:$0xff] %v2760_v43 }
 0x51f   :  { %v2764_v23 = vpop.f32.mrb[20].mxu1 }
 0x520   :  { %v2765_v7 = vadd.f32 %v2888_v19, %v2764_v23  ;;  %v3147_v50 = vpop.f32.mrb[21].mxu1 }
 0x522   :  { %2774 = vst [vmem:[#allocation7 + $0x30] sm:$0xff] %v2765_v7 }
 0x523   :  { %3473 = shalt.err (!%p3470_p6)
}
 0x524   :  { %s3474_s27 = scalar_lea.hbm %s5750_s7, 896 }
 0x525   :  { %p3475_p7 = scmp.ne.s32.totalorder %s5750_s7, %s3474_s27  ;;  %p3478_p8 = scmp.lt.u32.totalorder %s3474_s27, %s5750_s7 }
 0x527   :  { %p3480_p9 = pnand %p3478_p8, %p3475_p7 }
 0x529   :  { %3483 = shalt.err (!%p3480_p9)
}
 0x52a   :  { %2786 = dma.vmem_to_hbm [thread:$0]  %s2781_s24, 896, %s5750_s7, [#allocation4], %s3491_s11, %s3491_s11, %s3492_s12  }
 0x52b   :  { %3488 = dma.done.wait [#allocation4], 896  }
 0x52c   :  { %3489 = vsyncadd [#allocation4], 4294966400 }
 0x52d   :  { %2790 = vsyncpa [#allocation3], 1 }
 0x52e   :  { %2791 = vsyncpa [#allocation6], 1 }
 0x52f   :  { %2792 = vsyncpa [#allocation4], 1 }

</bundles_post_ra>
